<compile_context>
chip_gen: v6e
topology: v6e:2x2x1
jax: 0.10.0
libtpu: 0.0.40
codegen_flags: <defaults>
</compile_context>

<pallas_src>
import functools
import re

import jax
import jax.numpy as jnp
from jax import lax
from jax.experimental import pallas as pl
from jax.experimental.pallas import tpu as pltpu

java_code_snippets = [
    'public int add(int a, int b) { return a + b; }',
    'public boolean isEven(int number) { return number % 2 == 0; }',
    'public int factorial(int n) { if (n == 0) return 1; else return n * factorial(n - 1); }',
    'public int max(int a, int b) { return a > b ? a : b; }',
]


def tokenize_java_code(java_code):
    return re.findall(r'\b\w+\b|[^\w\s]', java_code)


def create_vocab(snippets):
    vocab = {'<PAD>': 0, '<UNK>': 1}
    for code in snippets:
        for tok in tokenize_java_code(code):
            if tok not in vocab:
                vocab[tok] = len(vocab)
    return vocab


# ----------------------------- Pallas kernel ------------------------------ #
def e2emn_kernel(x_ref, wih_ref, whh_ref, b_ref, wfc_ref, bfc_ref, out_ref,
                 gates_sc, hall_sc, *, seq_len, hidden):
    """Single-invocation E2EMN hot path.

    Phase 1: batched input projection over all timesteps (one MXU matmul).
    Phase 2: serial LSTM recurrence (only h @ W_hh^T on the dependency chain).
    Phase 3: batched fc projection over all timesteps (one MXU matmul).

    Gate column order in wih/whh/b is [i | f | o | g] (pre-permuted in the
    wrapper) so that one tanh-based sigmoid covers gates[:, :3H].
    """
    H = hidden
    T_pad = hall_sc.shape[0]

    # ---- Phase 1: gates_in[t] = x[t] @ W_ih^T + (b_ih + b_hh) ------------- #
    gates_sc[...] = (jnp.dot(x_ref[...], wih_ref[...],
                             preferred_element_type=jnp.float32)
                     + b_ref[...])                               # (T_pad, 4H)

    # Hoist the recurrent-weight load out of the unrolled loop so the MXU RHS
    # can stay resident across timesteps.
    whh = whh_ref[...]                                           # (H, 4H)

    def sigmoid_via_tanh(v):
        # single EUP pass: sigmoid(x) = 0.5 * tanh(0.5 * x) + 0.5
        return 0.5 * jnp.tanh(0.5 * v) + 0.5

    # ---- Phase 2: serial recurrence, static fully-unrolled ----------------- #
    h = jnp.zeros((1, H), jnp.float32)
    c = jnp.zeros((1, H), jnp.float32)
    zero_row = jnp.zeros((1, H), jnp.float32)

    n_tiles = T_pad // 8
    for tile in range(n_tiles):
        rows = []
        for r in range(8):
            t = tile * 8 + r
            if t < seq_len:
                gates = (jnp.dot(h, whh, preferred_element_type=jnp.float32)
                         + gates_sc[pl.ds(t, 1), :])             # (1, 4H)
                sg = sigmoid_via_tanh(gates[:, 0:3 * H])         # [i | f | o]
                i_g = sg[:, 0:H]
                f_g = sg[:, H:2 * H]
                o_g = sg[:, 2 * H:3 * H]
                g_g = jnp.tanh(gates[:, 3 * H:4 * H])
                c = f_g * c + i_g * g_g
                h = o_g * jnp.tanh(c)
                rows.append(h)
            else:
                rows.append(zero_row)
        # One unmasked full-tile (8, 128) store per 8 timesteps.
        hall_sc[pl.ds(tile * 8, 8), :] = jnp.concatenate(rows, axis=0)

    # ---- Phase 3: logits = H_all @ W_fc^T + b_fc --------------------------- #
    out_ref[...] = (jnp.dot(hall_sc[...], wfc_ref[...],
                            preferred_element_type=jnp.float32)
                    + bfc_ref[...])                              # (T_pad, Vp)


def _permute_gate_cols(w, axis):
    """PyTorch LSTM gate order [i, f, g, o] -> kernel order [i, f, o, g]."""
    i, f, g, o = jnp.split(w, 4, axis=axis)
    return jnp.concatenate([i, f, o, g], axis=axis)


def e2emn_forward(token_ids, params):
    """Numeric forward of E2EMN for a single sequence of token ids."""
    T = int(token_ids.shape[0])
    E = params['embedding'].shape[1]
    H = params['w_hh_t'].shape[0]
    V = params['w_fc_t'].shape[1]

    T_pad = ((T + 7) // 8) * 8
    V_pad = ((V + 127) // 128) * 128

    # Glue (plain JAX): embedding gather + one-time memory mean, pre-added.
    mem_mean = jnp.mean(params['memory'], axis=0)                # (E,)
    emb = jnp.take(params['embedding'], token_ids, axis=0)       # (T, E)
    x = (emb + mem_mean[None, :]).astype(jnp.float32)
    x = jnp.pad(x, ((0, T_pad - T), (0, 0)))                     # (T_pad, E)

    # One-time host-side weight prep:
    #  * permute gate columns [i,f,g,o] -> [i,f,o,g] for the fused sigmoid,
    #  * pad fc weights/bias to a lane-dense (multiple-of-128) output width.
    w_ih_t = _permute_gate_cols(params['w_ih_t'], axis=1)        # (E, 4H)
    w_hh_t = _permute_gate_cols(params['w_hh_t'], axis=1)        # (H, 4H)
    b_gate = _permute_gate_cols(params['b_gate'], axis=1)        # (1, 4H)
    w_fc_t = jnp.pad(params['w_fc_t'], ((0, 0), (0, V_pad - V))) # (H, V_pad)
    b_fc = jnp.pad(params['b_fc'], ((0, 0), (0, V_pad - V)))     # (1, V_pad)

    kernel = functools.partial(e2emn_kernel, seq_len=T, hidden=H)

    out = pl.pallas_call(
        kernel,
        out_shape=jax.ShapeDtypeStruct((T_pad, V_pad), jnp.float32),
        grid=(1,),
        in_specs=[
            pl.BlockSpec((T_pad, E), lambda i: (0, 0)),          # x
            pl.BlockSpec((E, 4 * H), lambda i: (0, 0)),          # W_ih^T
            pl.BlockSpec((H, 4 * H), lambda i: (0, 0)),          # W_hh^T
            pl.BlockSpec((1, 4 * H), lambda i: (0, 0)),          # b_gate
            pl.BlockSpec((H, V_pad), lambda i: (0, 0)),          # W_fc^T
            pl.BlockSpec((1, V_pad), lambda i: (0, 0)),          # b_fc
        ],
        out_specs=pl.BlockSpec((T_pad, V_pad), lambda i: (0, 0)),
        scratch_shapes=[
            pltpu.VMEM((T_pad, 4 * H), jnp.float32),             # gates_in
            pltpu.VMEM((T_pad, H), jnp.float32),                 # all h_t
        ],
        compiler_params=pltpu.CompilerParams(
            dimension_semantics=("arbitrary",)),
    )(x, w_ih_t, w_hh_t, b_gate, w_fc_t, b_fc)

    # Slice back to real sizes; (T, V) -> (1, T, V) matching batch_first.
    return out[:T, :V][None, :, :]


# -------------------------- pure-JAX reference ---------------------------- #
def e2emn_reference(token_ids, params):
    emb = jnp.take(params['embedding'], token_ids, axis=0)       # (T, E)
    mem_mean = jnp.mean(params['memory'], axis=0)                # (E,)
    x = emb + mem_mean[None, :]
    H = params['w_hh_t'].shape[0]

    def step(carry, xt):
        h, c = carry
        gates = (xt[None, :] @ params['w_ih_t'] + h @ params['w_hh_t']
                 + params['b_gate'])
        # PyTorch LSTM gate order: input, forget, cell(g), output
        i_g = jax.nn.sigmoid(gates[:, 0:H])
        f_g = jax.nn.sigmoid(gates[:, H:2 * H])
        g_g = jnp.tanh(gates[:, 2 * H:3 * H])
        o_g = jax.nn.sigmoid(gates[:, 3 * H:4 * H])
        c = f_g * c + i_g * g_g
        h = o_g * jnp.tanh(c)
        logits = h @ params['w_fc_t'] + params['b_fc']
        return (h, c), logits[0]

    h0 = jnp.zeros((1, H), jnp.float32)
    c0 = jnp.zeros((1, H), jnp.float32)
    _, logits = jax.lax.scan(step, (h0, c0), x)
    return logits[None, :, :]                                    # (1, T, V)


# ------------------------------- params ----------------------------------- #
def init_params(key, vocab_size, embed_size, hidden_size, memory_size):
    ks = jax.random.split(key, 8)
    s = 1.0 / float(hidden_size) ** 0.5
    embedding = jax.random.normal(ks[0], (vocab_size, embed_size), jnp.float32)
    memory = jax.random.normal(ks[1], (memory_size, embed_size), jnp.float32)
    w_ih = jax.random.uniform(ks[2], (4 * hidden_size, embed_size),
                              jnp.float32, -s, s)
    w_hh = jax.random.uniform(ks[3], (4 * hidden_size, hidden_size),
                              jnp.float32, -s, s)
    b_ih = jax.random.uniform(ks[4], (4 * hidden_size,), jnp.float32, -s, s)
    b_hh = jax.random.uniform(ks[5], (4 * hidden_size,), jnp.float32, -s, s)
    w_fc = jax.random.uniform(ks[6], (vocab_size, hidden_size),
                              jnp.float32, -s, s)
    b_fc = jax.random.uniform(ks[7], (vocab_size,), jnp.float32, -s, s)
    return {
        'embedding': embedding,
        'memory': memory,
        'w_ih_t': w_ih.T,                          # (E, 4H), gate cols [i,f,g,o]
        'w_hh_t': w_hh.T,                          # (H, 4H), gate cols [i,f,g,o]
        'b_gate': (b_ih + b_hh).reshape(1, -1),    # (1, 4H), gate cols [i,f,g,o]
        'w_fc_t': w_fc.T,                          # (H, V)
        'b_fc': b_fc.reshape(1, -1),               # (1, V)
    }


if __name__ == "__main__":
    vocab = create_vocab(java_code_snippets)
    vocab_size = len(vocab)
    embed_size, hidden_size, memory_size = 64, 128, 100

    params = init_params(jax.random.PRNGKey(0), vocab_size, embed_size,
                         hidden_size, memory_size)

    # Deterministic input sequence: tokenize + encode the first snippet.
    toks = tokenize_java_code(java_code_snippets[0])
    token_ids = jnp.array([vocab.get(t, vocab['<UNK>']) for t in toks],
                          dtype=jnp.int32)

    out = e2emn_forward(token_ids, params)
    out = jax.block_until_ready(out)

    ref = e2emn_reference(token_ids, params)
    assert out.shape == (1, token_ids.shape[0], vocab_size)
    assert jnp.allclose(out, ref, atol=1e-4, rtol=1e-4)

    print("KERNEL_OK")
</pallas_src>

<mosaic_0001>
module attributes {stable_mosaic.version = 11 : i64} {
  func.func @e2emn_kernel(%arg0: i32, %arg1: memref<24x64xf32, #tpu.memory_space<vmem>>, %arg2: memref<64x512xf32, #tpu.memory_space<vmem>>, %arg3: memref<128x512xf32, #tpu.memory_space<vmem>>, %arg4: memref<1x512xf32, #tpu.memory_space<vmem>>, %arg5: memref<128x128xf32, #tpu.memory_space<vmem>>, %arg6: memref<1x128xf32, #tpu.memory_space<vmem>>, %arg7: memref<24x128xf32, #tpu.memory_space<vmem>>, %arg8: memref<24x512xf32, #tpu.memory_space<vmem>>, %arg9: memref<24x128xf32, #tpu.memory_space<vmem>>) attributes {dimension_semantics = [#tpu.dimension_semantics<arbitrary>], iteration_bounds = array<i64: 1>, scalar_prefetch = 0 : i64, scratch_operands = 2 : i64, tpu.core_type = #tpu.core_type<tc>, window_params = [{pipeline_mode = #tpu.pipeline_mode<synchronous>, transform_indices = @transform_0, window_bounds = array<i64: 24, 64>}, {pipeline_mode = #tpu.pipeline_mode<synchronous>, transform_indices = @transform_1, window_bounds = array<i64: 64, 512>}, {pipeline_mode = #tpu.pipeline_mode<synchronous>, transform_indices = @transform_2, window_bounds = array<i64: 128, 512>}, {pipeline_mode = #tpu.pipeline_mode<synchronous>, transform_indices = @transform_3, window_bounds = array<i64: 1, 512>}, {pipeline_mode = #tpu.pipeline_mode<synchronous>, transform_indices = @transform_4, window_bounds = array<i64: 128, 128>}, {pipeline_mode = #tpu.pipeline_mode<synchronous>, transform_indices = @transform_5, window_bounds = array<i64: 1, 128>}, {pipeline_mode = #tpu.pipeline_mode<synchronous>, transform_indices = @transform_6, window_bounds = array<i64: 24, 128>}]} {
    %c0 = arith.constant 0 : index
    %c0_0 = arith.constant 0 : index
    %0 = vector.load %arg1[%c0, %c0_0] : memref<24x64xf32, #tpu.memory_space<vmem>>, vector<24x64xf32>
    %c0_1 = arith.constant 0 : index
    %c0_2 = arith.constant 0 : index
    %1 = vector.load %arg2[%c0_1, %c0_2] : memref<64x512xf32, #tpu.memory_space<vmem>>, vector<64x512xf32>
    %cst = arith.constant dense<0.000000e+00> : vector<24x512xf32>
    %2 = tpu.matmul %0, %1, %cst {dimension_numbers = #tpu.dot_dimension_numbers<[1], [0], [0], [1], [0, 0, 1, 1], [], []>} : vector<24x64xf32>, vector<64x512xf32>, vector<24x512xf32> -> vector<24x512xf32>
    %c0_3 = arith.constant 0 : index
    %c0_4 = arith.constant 0 : index
    %3 = vector.load %arg4[%c0_3, %c0_4] : memref<1x512xf32, #tpu.memory_space<vmem>>, vector<1x512xf32>
    %4 = vector.broadcast %3 : vector<1x512xf32> to vector<24x512xf32>
    %5 = arith.addf %2, %4 : vector<24x512xf32>
    %c0_5 = arith.constant 0 : index
    %c0_6 = arith.constant 0 : index
    %6 = vector.load %arg8[%c0_5, %c0_6] : memref<24x512xf32, #tpu.memory_space<vmem>>, vector<24x512xf32>
    tpu.vector_store %arg8[%c0_5, %c0_6], %5 {strides = array<i32>} : memref<24x512xf32, #tpu.memory_space<vmem>>, vector<24x512xf32>,
    %c0_7 = arith.constant 0 : index
    %c0_8 = arith.constant 0 : index
    %7 = vector.load %arg3[%c0_7, %c0_8] : memref<128x512xf32, #tpu.memory_space<vmem>>, vector<128x512xf32>
    %cst_9 = arith.constant 0.000000e+00 : f32
    %8 = vector.broadcast %cst_9 : f32 to vector<1x128xf32>
    %cst_10 = arith.constant 0.000000e+00 : f32
    %9 = vector.broadcast %cst_10 : f32 to vector<1x128xf32>
    %cst_11 = arith.constant 0.000000e+00 : f32
    %10 = vector.broadcast %cst_11 : f32 to vector<1x128xf32>
    %cst_12 = arith.constant dense<0.000000e+00> : vector<1x512xf32>
    %11 = tpu.matmul %8, %7, %cst_12 {dimension_numbers = #tpu.dot_dimension_numbers<[1], [0], [0], [1], [0, 0, 1, 1], [], []>} : vector<1x128xf32>, vector<128x512xf32>, vector<1x512xf32> -> vector<1x512xf32>
    %c0_13 = arith.constant 0 : index
    %c0_14 = arith.constant 0 : index
    %12 = vector.load %arg8[%c0_13, %c0_14] : memref<24x512xf32, #tpu.memory_space<vmem>>, vector<1x512xf32>
    %13 = arith.addf %11, %12 : vector<1x512xf32>
    %14 = vector.extract_strided_slice %13 {offsets = [0, 0], sizes = [1, 384], strides = [1, 1]} : vector<1x512xf32> to vector<1x384xf32>
    %cst_15 = arith.constant 5.000000e-01 : f32
    %15 = vector.broadcast %cst_15 : f32 to vector<1x384xf32>
    %16 = arith.mulf %15, %14 : vector<1x384xf32>
    %17 = math.tanh %16 : vector<1x384xf32>
    %cst_16 = arith.constant 5.000000e-01 : f32
    %18 = vector.broadcast %cst_16 : f32 to vector<1x384xf32>
    %19 = arith.mulf %18, %17 : vector<1x384xf32>
    %cst_17 = arith.constant 5.000000e-01 : f32
    %20 = vector.broadcast %cst_17 : f32 to vector<1x384xf32>
    %21 = arith.addf %19, %20 : vector<1x384xf32>
    %22 = vector.extract_strided_slice %21 {offsets = [0, 0], sizes = [1, 128], strides = [1, 1]} : vector<1x384xf32> to vector<1x128xf32>
    %23 = vector.extract_strided_slice %21 {offsets = [0, 128], sizes = [1, 128], strides = [1, 1]} : vector<1x384xf32> to vector<1x128xf32>
    %24 = vector.extract_strided_slice %21 {offsets = [0, 256], sizes = [1, 128], strides = [1, 1]} : vector<1x384xf32> to vector<1x128xf32>
    %25 = vector.extract_strided_slice %13 {offsets = [0, 384], sizes = [1, 128], strides = [1, 1]} : vector<1x512xf32> to vector<1x128xf32>
    %26 = math.tanh %25 : vector<1x128xf32>
    %27 = arith.mulf %23, %9 : vector<1x128xf32>
    %28 = arith.mulf %22, %26 : vector<1x128xf32>
    %29 = arith.addf %27, %28 : vector<1x128xf32>
    %30 = math.tanh %29 : vector<1x128xf32>
    %31 = arith.mulf %24, %30 : vector<1x128xf32>
    %cst_18 = arith.constant dense<0.000000e+00> : vector<1x512xf32>
    %32 = tpu.matmul %31, %7, %cst_18 {dimension_numbers = #tpu.dot_dimension_numbers<[1], [0], [0], [1], [0, 0, 1, 1], [], []>} : vector<1x128xf32>, vector<128x512xf32>, vector<1x512xf32> -> vector<1x512xf32>
    %c1 = arith.constant 1 : index
    %c0_19 = arith.constant 0 : index
    %33 = vector.load %arg8[%c1, %c0_19] : memref<24x512xf32, #tpu.memory_space<vmem>>, vector<1x512xf32>
    %34 = arith.addf %32, %33 : vector<1x512xf32>
    %35 = vector.extract_strided_slice %34 {offsets = [0, 0], sizes = [1, 384], strides = [1, 1]} : vector<1x512xf32> to vector<1x384xf32>
    %cst_20 = arith.constant 5.000000e-01 : f32
    %36 = vector.broadcast %cst_20 : f32 to vector<1x384xf32>
    %37 = arith.mulf %36, %35 : vector<1x384xf32>
    %38 = math.tanh %37 : vector<1x384xf32>
    %cst_21 = arith.constant 5.000000e-01 : f32
    %39 = vector.broadcast %cst_21 : f32 to vector<1x384xf32>
    %40 = arith.mulf %39, %38 : vector<1x384xf32>
    %cst_22 = arith.constant 5.000000e-01 : f32
    %41 = vector.broadcast %cst_22 : f32 to vector<1x384xf32>
    %42 = arith.addf %40, %41 : vector<1x384xf32>
    %43 = vector.extract_strided_slice %42 {offsets = [0, 0], sizes = [1, 128], strides = [1, 1]} : vector<1x384xf32> to vector<1x128xf32>
    %44 = vector.extract_strided_slice %42 {offsets = [0, 128], sizes = [1, 128], strides = [1, 1]} : vector<1x384xf32> to vector<1x128xf32>
    %45 = vector.extract_strided_slice %42 {offsets = [0, 256], sizes = [1, 128], strides = [1, 1]} : vector<1x384xf32> to vector<1x128xf32>
    %46 = vector.extract_strided_slice %34 {offsets = [0, 384], sizes = [1, 128], strides = [1, 1]} : vector<1x512xf32> to vector<1x128xf32>
    %47 = math.tanh %46 : vector<1x128xf32>
    %48 = arith.mulf %44, %29 : vector<1x128xf32>
    %49 = arith.mulf %43, %47 : vector<1x128xf32>
    %50 = arith.addf %48, %49 : vector<1x128xf32>
    %51 = math.tanh %50 : vector<1x128xf32>
    %52 = arith.mulf %45, %51 : vector<1x128xf32>
    %cst_23 = arith.constant dense<0.000000e+00> : vector<1x512xf32>
    %53 = tpu.matmul %52, %7, %cst_23 {dimension_numbers = #tpu.dot_dimension_numbers<[1], [0], [0], [1], [0, 0, 1, 1], [], []>} : vector<1x128xf32>, vector<128x512xf32>, vector<1x512xf32> -> vector<1x512xf32>
    %c2 = arith.constant 2 : index
    %c0_24 = arith.constant 0 : index
    %54 = vector.load %arg8[%c2, %c0_24] : memref<24x512xf32, #tpu.memory_space<vmem>>, vector<1x512xf32>
    %55 = arith.addf %53, %54 : vector<1x512xf32>
    %56 = vector.extract_strided_slice %55 {offsets = [0, 0], sizes = [1, 384], strides = [1, 1]} : vector<1x512xf32> to vector<1x384xf32>
    %cst_25 = arith.constant 5.000000e-01 : f32
    %57 = vector.broadcast %cst_25 : f32 to vector<1x384xf32>
    %58 = arith.mulf %57, %56 : vector<1x384xf32>
    %59 = math.tanh %58 : vector<1x384xf32>
    %cst_26 = arith.constant 5.000000e-01 : f32
    %60 = vector.broadcast %cst_26 : f32 to vector<1x384xf32>
    %61 = arith.mulf %60, %59 : vector<1x384xf32>
    %cst_27 = arith.constant 5.000000e-01 : f32
    %62 = vector.broadcast %cst_27 : f32 to vector<1x384xf32>
    %63 = arith.addf %61, %62 : vector<1x384xf32>
    %64 = vector.extract_strided_slice %63 {offsets = [0, 0], sizes = [1, 128], strides = [1, 1]} : vector<1x384xf32> to vector<1x128xf32>
    %65 = vector.extract_strided_slice %63 {offsets = [0, 128], sizes = [1, 128], strides = [1, 1]} : vector<1x384xf32> to vector<1x128xf32>
    %66 = vector.extract_strided_slice %63 {offsets = [0, 256], sizes = [1, 128], strides = [1, 1]} : vector<1x384xf32> to vector<1x128xf32>
    %67 = vector.extract_strided_slice %55 {offsets = [0, 384], sizes = [1, 128], strides = [1, 1]} : vector<1x512xf32> to vector<1x128xf32>
    %68 = math.tanh %67 : vector<1x128xf32>
    %69 = arith.mulf %65, %50 : vector<1x128xf32>
    %70 = arith.mulf %64, %68 : vector<1x128xf32>
    %71 = arith.addf %69, %70 : vector<1x128xf32>
    %72 = math.tanh %71 : vector<1x128xf32>
    %73 = arith.mulf %66, %72 : vector<1x128xf32>
    %cst_28 = arith.constant dense<0.000000e+00> : vector<1x512xf32>
    %74 = tpu.matmul %73, %7, %cst_28 {dimension_numbers = #tpu.dot_dimension_numbers<[1], [0], [0], [1], [0, 0, 1, 1], [], []>} : vector<1x128xf32>, vector<128x512xf32>, vector<1x512xf32> -> vector<1x512xf32>
    %c3 = arith.constant 3 : index
    %c0_29 = arith.constant 0 : index
    %75 = vector.load %arg8[%c3, %c0_29] : memref<24x512xf32, #tpu.memory_space<vmem>>, vector<1x512xf32>
    %76 = arith.addf %74, %75 : vector<1x512xf32>
    %77 = vector.extract_strided_slice %76 {offsets = [0, 0], sizes = [1, 384], strides = [1, 1]} : vector<1x512xf32> to vector<1x384xf32>
    %cst_30 = arith.constant 5.000000e-01 : f32
    %78 = vector.broadcast %cst_30 : f32 to vector<1x384xf32>
    %79 = arith.mulf %78, %77 : vector<1x384xf32>
    %80 = math.tanh %79 : vector<1x384xf32>
    %cst_31 = arith.constant 5.000000e-01 : f32
    %81 = vector.broadcast %cst_31 : f32 to vector<1x384xf32>
    %82 = arith.mulf %81, %80 : vector<1x384xf32>
    %cst_32 = arith.constant 5.000000e-01 : f32
    %83 = vector.broadcast %cst_32 : f32 to vector<1x384xf32>
    %84 = arith.addf %82, %83 : vector<1x384xf32>
    %85 = vector.extract_strided_slice %84 {offsets = [0, 0], sizes = [1, 128], strides = [1, 1]} : vector<1x384xf32> to vector<1x128xf32>
    %86 = vector.extract_strided_slice %84 {offsets = [0, 128], sizes = [1, 128], strides = [1, 1]} : vector<1x384xf32> to vector<1x128xf32>
    %87 = vector.extract_strided_slice %84 {offsets = [0, 256], sizes = [1, 128], strides = [1, 1]} : vector<1x384xf32> to vector<1x128xf32>
    %88 = vector.extract_strided_slice %76 {offsets = [0, 384], sizes = [1, 128], strides = [1, 1]} : vector<1x512xf32> to vector<1x128xf32>
    %89 = math.tanh %88 : vector<1x128xf32>
    %90 = arith.mulf %86, %71 : vector<1x128xf32>
    %91 = arith.mulf %85, %89 : vector<1x128xf32>
    %92 = arith.addf %90, %91 : vector<1x128xf32>
    %93 = math.tanh %92 : vector<1x128xf32>
    %94 = arith.mulf %87, %93 : vector<1x128xf32>
    %cst_33 = arith.constant dense<0.000000e+00> : vector<1x512xf32>
    %95 = tpu.matmul %94, %7, %cst_33 {dimension_numbers = #tpu.dot_dimension_numbers<[1], [0], [0], [1], [0, 0, 1, 1], [], []>} : vector<1x128xf32>, vector<128x512xf32>, vector<1x512xf32> -> vector<1x512xf32>
    %c4 = arith.constant 4 : index
    %c0_34 = arith.constant 0 : index
    %96 = vector.load %arg8[%c4, %c0_34] : memref<24x512xf32, #tpu.memory_space<vmem>>, vector<1x512xf32>
    %97 = arith.addf %95, %96 : vector<1x512xf32>
    %98 = vector.extract_strided_slice %97 {offsets = [0, 0], sizes = [1, 384], strides = [1, 1]} : vector<1x512xf32> to vector<1x384xf32>
    %cst_35 = arith.constant 5.000000e-01 : f32
    %99 = vector.broadcast %cst_35 : f32 to vector<1x384xf32>
    %100 = arith.mulf %99, %98 : vector<1x384xf32>
    %101 = math.tanh %100 : vector<1x384xf32>
    %cst_36 = arith.constant 5.000000e-01 : f32
    %102 = vector.broadcast %cst_36 : f32 to vector<1x384xf32>
    %103 = arith.mulf %102, %101 : vector<1x384xf32>
    %cst_37 = arith.constant 5.000000e-01 : f32
    %104 = vector.broadcast %cst_37 : f32 to vector<1x384xf32>
    %105 = arith.addf %103, %104 : vector<1x384xf32>
    %106 = vector.extract_strided_slice %105 {offsets = [0, 0], sizes = [1, 128], strides = [1, 1]} : vector<1x384xf32> to vector<1x128xf32>
    %107 = vector.extract_strided_slice %105 {offsets = [0, 128], sizes = [1, 128], strides = [1, 1]} : vector<1x384xf32> to vector<1x128xf32>
    %108 = vector.extract_strided_slice %105 {offsets = [0, 256], sizes = [1, 128], strides = [1, 1]} : vector<1x384xf32> to vector<1x128xf32>
    %109 = vector.extract_strided_slice %97 {offsets = [0, 384], sizes = [1, 128], strides = [1, 1]} : vector<1x512xf32> to vector<1x128xf32>
    %110 = math.tanh %109 : vector<1x128xf32>
    %111 = arith.mulf %107, %92 : vector<1x128xf32>
    %112 = arith.mulf %106, %110 : vector<1x128xf32>
    %113 = arith.addf %111, %112 : vector<1x128xf32>
    %114 = math.tanh %113 : vector<1x128xf32>
    %115 = arith.mulf %108, %114 : vector<1x128xf32>
    %cst_38 = arith.constant dense<0.000000e+00> : vector<1x512xf32>
    %116 = tpu.matmul %115, %7, %cst_38 {dimension_numbers = #tpu.dot_dimension_numbers<[1], [0], [0], [1], [0, 0, 1, 1], [], []>} : vector<1x128xf32>, vector<128x512xf32>, vector<1x512xf32> -> vector<1x512xf32>
    %c5 = arith.constant 5 : index
    %c0_39 = arith.constant 0 : index
    %117 = vector.load %arg8[%c5, %c0_39] : memref<24x512xf32, #tpu.memory_space<vmem>>, vector<1x512xf32>
    %118 = arith.addf %116, %117 : vector<1x512xf32>
    %119 = vector.extract_strided_slice %118 {offsets = [0, 0], sizes = [1, 384], strides = [1, 1]} : vector<1x512xf32> to vector<1x384xf32>
    %cst_40 = arith.constant 5.000000e-01 : f32
    %120 = vector.broadcast %cst_40 : f32 to vector<1x384xf32>
    %121 = arith.mulf %120, %119 : vector<1x384xf32>
    %122 = math.tanh %121 : vector<1x384xf32>
    %cst_41 = arith.constant 5.000000e-01 : f32
    %123 = vector.broadcast %cst_41 : f32 to vector<1x384xf32>
    %124 = arith.mulf %123, %122 : vector<1x384xf32>
    %cst_42 = arith.constant 5.000000e-01 : f32
    %125 = vector.broadcast %cst_42 : f32 to vector<1x384xf32>
    %126 = arith.addf %124, %125 : vector<1x384xf32>
    %127 = vector.extract_strided_slice %126 {offsets = [0, 0], sizes = [1, 128], strides = [1, 1]} : vector<1x384xf32> to vector<1x128xf32>
    %128 = vector.extract_strided_slice %126 {offsets = [0, 128], sizes = [1, 128], strides = [1, 1]} : vector<1x384xf32> to vector<1x128xf32>
    %129 = vector.extract_strided_slice %126 {offsets = [0, 256], sizes = [1, 128], strides = [1, 1]} : vector<1x384xf32> to vector<1x128xf32>
    %130 = vector.extract_strided_slice %118 {offsets = [0, 384], sizes = [1, 128], strides = [1, 1]} : vector<1x512xf32> to vector<1x128xf32>
    %131 = math.tanh %130 : vector<1x128xf32>
    %132 = arith.mulf %128, %113 : vector<1x128xf32>
    %133 = arith.mulf %127, %131 : vector<1x128xf32>
    %134 = arith.addf %132, %133 : vector<1x128xf32>
    %135 = math.tanh %134 : vector<1x128xf32>
    %136 = arith.mulf %129, %135 : vector<1x128xf32>
    %cst_43 = arith.constant dense<0.000000e+00> : vector<1x512xf32>
    %137 = tpu.matmul %136, %7, %cst_43 {dimension_numbers = #tpu.dot_dimension_numbers<[1], [0], [0], [1], [0, 0, 1, 1], [], []>} : vector<1x128xf32>, vector<128x512xf32>, vector<1x512xf32> -> vector<1x512xf32>
    %c6 = arith.constant 6 : index
    %c0_44 = arith.constant 0 : index
    %138 = vector.load %arg8[%c6, %c0_44] : memref<24x512xf32, #tpu.memory_space<vmem>>, vector<1x512xf32>
    %139 = arith.addf %137, %138 : vector<1x512xf32>
    %140 = vector.extract_strided_slice %139 {offsets = [0, 0], sizes = [1, 384], strides = [1, 1]} : vector<1x512xf32> to vector<1x384xf32>
    %cst_45 = arith.constant 5.000000e-01 : f32
    %141 = vector.broadcast %cst_45 : f32 to vector<1x384xf32>
    %142 = arith.mulf %141, %140 : vector<1x384xf32>
    %143 = math.tanh %142 : vector<1x384xf32>
    %cst_46 = arith.constant 5.000000e-01 : f32
    %144 = vector.broadcast %cst_46 : f32 to vector<1x384xf32>
    %145 = arith.mulf %144, %143 : vector<1x384xf32>
    %cst_47 = arith.constant 5.000000e-01 : f32
    %146 = vector.broadcast %cst_47 : f32 to vector<1x384xf32>
    %147 = arith.addf %145, %146 : vector<1x384xf32>
    %148 = vector.extract_strided_slice %147 {offsets = [0, 0], sizes = [1, 128], strides = [1, 1]} : vector<1x384xf32> to vector<1x128xf32>
    %149 = vector.extract_strided_slice %147 {offsets = [0, 128], sizes = [1, 128], strides = [1, 1]} : vector<1x384xf32> to vector<1x128xf32>
    %150 = vector.extract_strided_slice %147 {offsets = [0, 256], sizes = [1, 128], strides = [1, 1]} : vector<1x384xf32> to vector<1x128xf32>
    %151 = vector.extract_strided_slice %139 {offsets = [0, 384], sizes = [1, 128], strides = [1, 1]} : vector<1x512xf32> to vector<1x128xf32>
    %152 = math.tanh %151 : vector<1x128xf32>
    %153 = arith.mulf %149, %134 : vector<1x128xf32>
    %154 = arith.mulf %148, %152 : vector<1x128xf32>
    %155 = arith.addf %153, %154 : vector<1x128xf32>
    %156 = math.tanh %155 : vector<1x128xf32>
    %157 = arith.mulf %150, %156 : vector<1x128xf32>
    %cst_48 = arith.constant dense<0.000000e+00> : vector<1x512xf32>
    %158 = tpu.matmul %157, %7, %cst_48 {dimension_numbers = #tpu.dot_dimension_numbers<[1], [0], [0], [1], [0, 0, 1, 1], [], []>} : vector<1x128xf32>, vector<128x512xf32>, vector<1x512xf32> -> vector<1x512xf32>
    %c7 = arith.constant 7 : index
    %c0_49 = arith.constant 0 : index
    %159 = vector.load %arg8[%c7, %c0_49] : memref<24x512xf32, #tpu.memory_space<vmem>>, vector<1x512xf32>
    %160 = arith.addf %158, %159 : vector<1x512xf32>
    %161 = vector.extract_strided_slice %160 {offsets = [0, 0], sizes = [1, 384], strides = [1, 1]} : vector<1x512xf32> to vector<1x384xf32>
    %cst_50 = arith.constant 5.000000e-01 : f32
    %162 = vector.broadcast %cst_50 : f32 to vector<1x384xf32>
    %163 = arith.mulf %162, %161 : vector<1x384xf32>
    %164 = math.tanh %163 : vector<1x384xf32>
    %cst_51 = arith.constant 5.000000e-01 : f32
    %165 = vector.broadcast %cst_51 : f32 to vector<1x384xf32>
    %166 = arith.mulf %165, %164 : vector<1x384xf32>
    %cst_52 = arith.constant 5.000000e-01 : f32
    %167 = vector.broadcast %cst_52 : f32 to vector<1x384xf32>
    %168 = arith.addf %166, %167 : vector<1x384xf32>
    %169 = vector.extract_strided_slice %168 {offsets = [0, 0], sizes = [1, 128], strides = [1, 1]} : vector<1x384xf32> to vector<1x128xf32>
    %170 = vector.extract_strided_slice %168 {offsets = [0, 128], sizes = [1, 128], strides = [1, 1]} : vector<1x384xf32> to vector<1x128xf32>
    %171 = vector.extract_strided_slice %168 {offsets = [0, 256], sizes = [1, 128], strides = [1, 1]} : vector<1x384xf32> to vector<1x128xf32>
    %172 = vector.extract_strided_slice %160 {offsets = [0, 384], sizes = [1, 128], strides = [1, 1]} : vector<1x512xf32> to vector<1x128xf32>
    %173 = math.tanh %172 : vector<1x128xf32>
    %174 = arith.mulf %170, %155 : vector<1x128xf32>
    %175 = arith.mulf %169, %173 : vector<1x128xf32>
    %176 = arith.addf %174, %175 : vector<1x128xf32>
    %177 = math.tanh %176 : vector<1x128xf32>
    %178 = arith.mulf %171, %177 : vector<1x128xf32>
    %179 = tpu.concatenate %31, %52, %73, %94, %115, %136, %157, %178 in 0 : vector<1x128xf32>, vector<1x128xf32>, vector<1x128xf32>, vector<1x128xf32>, vector<1x128xf32>, vector<1x128xf32>, vector<1x128xf32>, vector<1x128xf32> -> vector<8x128xf32>
    %c0_53 = arith.constant 0 : index
    %c0_54 = arith.constant 0 : index
    %180 = vector.load %arg9[%c0_53, %c0_54] : memref<24x128xf32, #tpu.memory_space<vmem>>, vector<8x128xf32>
    tpu.vector_store %arg9[%c0_53, %c0_54], %179 {strides = array<i32>} : memref<24x128xf32, #tpu.memory_space<vmem>>, vector<8x128xf32>,
    %cst_55 = arith.constant dense<0.000000e+00> : vector<1x512xf32>
    %181 = tpu.matmul %178, %7, %cst_55 {dimension_numbers = #tpu.dot_dimension_numbers<[1], [0], [0], [1], [0, 0, 1, 1], [], []>} : vector<1x128xf32>, vector<128x512xf32>, vector<1x512xf32> -> vector<1x512xf32>
    %c8 = arith.constant 8 : index
    %c0_56 = arith.constant 0 : index
    %182 = vector.load %arg8[%c8, %c0_56] : memref<24x512xf32, #tpu.memory_space<vmem>>, vector<1x512xf32>
    %183 = arith.addf %181, %182 : vector<1x512xf32>
    %184 = vector.extract_strided_slice %183 {offsets = [0, 0], sizes = [1, 384], strides = [1, 1]} : vector<1x512xf32> to vector<1x384xf32>
    %cst_57 = arith.constant 5.000000e-01 : f32
    %185 = vector.broadcast %cst_57 : f32 to vector<1x384xf32>
    %186 = arith.mulf %185, %184 : vector<1x384xf32>
    %187 = math.tanh %186 : vector<1x384xf32>
    %cst_58 = arith.constant 5.000000e-01 : f32
    %188 = vector.broadcast %cst_58 : f32 to vector<1x384xf32>
    %189 = arith.mulf %188, %187 : vector<1x384xf32>
    %cst_59 = arith.constant 5.000000e-01 : f32
    %190 = vector.broadcast %cst_59 : f32 to vector<1x384xf32>
    %191 = arith.addf %189, %190 : vector<1x384xf32>
    %192 = vector.extract_strided_slice %191 {offsets = [0, 0], sizes = [1, 128], strides = [1, 1]} : vector<1x384xf32> to vector<1x128xf32>
    %193 = vector.extract_strided_slice %191 {offsets = [0, 128], sizes = [1, 128], strides = [1, 1]} : vector<1x384xf32> to vector<1x128xf32>
    %194 = vector.extract_strided_slice %191 {offsets = [0, 256], sizes = [1, 128], strides = [1, 1]} : vector<1x384xf32> to vector<1x128xf32>
    %195 = vector.extract_strided_slice %183 {offsets = [0, 384], sizes = [1, 128], strides = [1, 1]} : vector<1x512xf32> to vector<1x128xf32>
    %196 = math.tanh %195 : vector<1x128xf32>
    %197 = arith.mulf %193, %176 : vector<1x128xf32>
    %198 = arith.mulf %192, %196 : vector<1x128xf32>
    %199 = arith.addf %197, %198 : vector<1x128xf32>
    %200 = math.tanh %199 : vector<1x128xf32>
    %201 = arith.mulf %194, %200 : vector<1x128xf32>
    %cst_60 = arith.constant dense<0.000000e+00> : vector<1x512xf32>
    %202 = tpu.matmul %201, %7, %cst_60 {dimension_numbers = #tpu.dot_dimension_numbers<[1], [0], [0], [1], [0, 0, 1, 1], [], []>} : vector<1x128xf32>, vector<128x512xf32>, vector<1x512xf32> -> vector<1x512xf32>
    %c9 = arith.constant 9 : index
    %c0_61 = arith.constant 0 : index
    %203 = vector.load %arg8[%c9, %c0_61] : memref<24x512xf32, #tpu.memory_space<vmem>>, vector<1x512xf32>
    %204 = arith.addf %202, %203 : vector<1x512xf32>
    %205 = vector.extract_strided_slice %204 {offsets = [0, 0], sizes = [1, 384], strides = [1, 1]} : vector<1x512xf32> to vector<1x384xf32>
    %cst_62 = arith.constant 5.000000e-01 : f32
    %206 = vector.broadcast %cst_62 : f32 to vector<1x384xf32>
    %207 = arith.mulf %206, %205 : vector<1x384xf32>
    %208 = math.tanh %207 : vector<1x384xf32>
    %cst_63 = arith.constant 5.000000e-01 : f32
    %209 = vector.broadcast %cst_63 : f32 to vector<1x384xf32>
    %210 = arith.mulf %209, %208 : vector<1x384xf32>
    %cst_64 = arith.constant 5.000000e-01 : f32
    %211 = vector.broadcast %cst_64 : f32 to vector<1x384xf32>
    %212 = arith.addf %210, %211 : vector<1x384xf32>
    %213 = vector.extract_strided_slice %212 {offsets = [0, 0], sizes = [1, 128], strides = [1, 1]} : vector<1x384xf32> to vector<1x128xf32>
    %214 = vector.extract_strided_slice %212 {offsets = [0, 128], sizes = [1, 128], strides = [1, 1]} : vector<1x384xf32> to vector<1x128xf32>
    %215 = vector.extract_strided_slice %212 {offsets = [0, 256], sizes = [1, 128], strides = [1, 1]} : vector<1x384xf32> to vector<1x128xf32>
    %216 = vector.extract_strided_slice %204 {offsets = [0, 384], sizes = [1, 128], strides = [1, 1]} : vector<1x512xf32> to vector<1x128xf32>
    %217 = math.tanh %216 : vector<1x128xf32>
    %218 = arith.mulf %214, %199 : vector<1x128xf32>
    %219 = arith.mulf %213, %217 : vector<1x128xf32>
    %220 = arith.addf %218, %219 : vector<1x128xf32>
    %221 = math.tanh %220 : vector<1x128xf32>
    %222 = arith.mulf %215, %221 : vector<1x128xf32>
    %cst_65 = arith.constant dense<0.000000e+00> : vector<1x512xf32>
    %223 = tpu.matmul %222, %7, %cst_65 {dimension_numbers = #tpu.dot_dimension_numbers<[1], [0], [0], [1], [0, 0, 1, 1], [], []>} : vector<1x128xf32>, vector<128x512xf32>, vector<1x512xf32> -> vector<1x512xf32>
    %c10 = arith.constant 10 : index
    %c0_66 = arith.constant 0 : index
    %224 = vector.load %arg8[%c10, %c0_66] : memref<24x512xf32, #tpu.memory_space<vmem>>, vector<1x512xf32>
    %225 = arith.addf %223, %224 : vector<1x512xf32>
    %226 = vector.extract_strided_slice %225 {offsets = [0, 0], sizes = [1, 384], strides = [1, 1]} : vector<1x512xf32> to vector<1x384xf32>
    %cst_67 = arith.constant 5.000000e-01 : f32
    %227 = vector.broadcast %cst_67 : f32 to vector<1x384xf32>
    %228 = arith.mulf %227, %226 : vector<1x384xf32>
    %229 = math.tanh %228 : vector<1x384xf32>
    %cst_68 = arith.constant 5.000000e-01 : f32
    %230 = vector.broadcast %cst_68 : f32 to vector<1x384xf32>
    %231 = arith.mulf %230, %229 : vector<1x384xf32>
    %cst_69 = arith.constant 5.000000e-01 : f32
    %232 = vector.broadcast %cst_69 : f32 to vector<1x384xf32>
    %233 = arith.addf %231, %232 : vector<1x384xf32>
    %234 = vector.extract_strided_slice %233 {offsets = [0, 0], sizes = [1, 128], strides = [1, 1]} : vector<1x384xf32> to vector<1x128xf32>
    %235 = vector.extract_strided_slice %233 {offsets = [0, 128], sizes = [1, 128], strides = [1, 1]} : vector<1x384xf32> to vector<1x128xf32>
    %236 = vector.extract_strided_slice %233 {offsets = [0, 256], sizes = [1, 128], strides = [1, 1]} : vector<1x384xf32> to vector<1x128xf32>
    %237 = vector.extract_strided_slice %225 {offsets = [0, 384], sizes = [1, 128], strides = [1, 1]} : vector<1x512xf32> to vector<1x128xf32>
    %238 = math.tanh %237 : vector<1x128xf32>
    %239 = arith.mulf %235, %220 : vector<1x128xf32>
    %240 = arith.mulf %234, %238 : vector<1x128xf32>
    %241 = arith.addf %239, %240 : vector<1x128xf32>
    %242 = math.tanh %241 : vector<1x128xf32>
    %243 = arith.mulf %236, %242 : vector<1x128xf32>
    %cst_70 = arith.constant dense<0.000000e+00> : vector<1x512xf32>
    %244 = tpu.matmul %243, %7, %cst_70 {dimension_numbers = #tpu.dot_dimension_numbers<[1], [0], [0], [1], [0, 0, 1, 1], [], []>} : vector<1x128xf32>, vector<128x512xf32>, vector<1x512xf32> -> vector<1x512xf32>
    %c11 = arith.constant 11 : index
    %c0_71 = arith.constant 0 : index
    %245 = vector.load %arg8[%c11, %c0_71] : memref<24x512xf32, #tpu.memory_space<vmem>>, vector<1x512xf32>
    %246 = arith.addf %244, %245 : vector<1x512xf32>
    %247 = vector.extract_strided_slice %246 {offsets = [0, 0], sizes = [1, 384], strides = [1, 1]} : vector<1x512xf32> to vector<1x384xf32>
    %cst_72 = arith.constant 5.000000e-01 : f32
    %248 = vector.broadcast %cst_72 : f32 to vector<1x384xf32>
    %249 = arith.mulf %248, %247 : vector<1x384xf32>
    %250 = math.tanh %249 : vector<1x384xf32>
    %cst_73 = arith.constant 5.000000e-01 : f32
    %251 = vector.broadcast %cst_73 : f32 to vector<1x384xf32>
    %252 = arith.mulf %251, %250 : vector<1x384xf32>
    %cst_74 = arith.constant 5.000000e-01 : f32
    %253 = vector.broadcast %cst_74 : f32 to vector<1x384xf32>
    %254 = arith.addf %252, %253 : vector<1x384xf32>
    %255 = vector.extract_strided_slice %254 {offsets = [0, 0], sizes = [1, 128], strides = [1, 1]} : vector<1x384xf32> to vector<1x128xf32>
    %256 = vector.extract_strided_slice %254 {offsets = [0, 128], sizes = [1, 128], strides = [1, 1]} : vector<1x384xf32> to vector<1x128xf32>
    %257 = vector.extract_strided_slice %254 {offsets = [0, 256], sizes = [1, 128], strides = [1, 1]} : vector<1x384xf32> to vector<1x128xf32>
    %258 = vector.extract_strided_slice %246 {offsets = [0, 384], sizes = [1, 128], strides = [1, 1]} : vector<1x512xf32> to vector<1x128xf32>
    %259 = math.tanh %258 : vector<1x128xf32>
    %260 = arith.mulf %256, %241 : vector<1x128xf32>
    %261 = arith.mulf %255, %259 : vector<1x128xf32>
    %262 = arith.addf %260, %261 : vector<1x128xf32>
    %263 = math.tanh %262 : vector<1x128xf32>
    %264 = arith.mulf %257, %263 : vector<1x128xf32>
    %cst_75 = arith.constant dense<0.000000e+00> : vector<1x512xf32>
    %265 = tpu.matmul %264, %7, %cst_75 {dimension_numbers = #tpu.dot_dimension_numbers<[1], [0], [0], [1], [0, 0, 1, 1], [], []>} : vector<1x128xf32>, vector<128x512xf32>, vector<1x512xf32> -> vector<1x512xf32>
    %c12 = arith.constant 12 : index
    %c0_76 = arith.constant 0 : index
    %266 = vector.load %arg8[%c12, %c0_76] : memref<24x512xf32, #tpu.memory_space<vmem>>, vector<1x512xf32>
    %267 = arith.addf %265, %266 : vector<1x512xf32>
    %268 = vector.extract_strided_slice %267 {offsets = [0, 0], sizes = [1, 384], strides = [1, 1]} : vector<1x512xf32> to vector<1x384xf32>
    %cst_77 = arith.constant 5.000000e-01 : f32
    %269 = vector.broadcast %cst_77 : f32 to vector<1x384xf32>
    %270 = arith.mulf %269, %268 : vector<1x384xf32>
    %271 = math.tanh %270 : vector<1x384xf32>
    %cst_78 = arith.constant 5.000000e-01 : f32
    %272 = vector.broadcast %cst_78 : f32 to vector<1x384xf32>
    %273 = arith.mulf %272, %271 : vector<1x384xf32>
    %cst_79 = arith.constant 5.000000e-01 : f32
    %274 = vector.broadcast %cst_79 : f32 to vector<1x384xf32>
    %275 = arith.addf %273, %274 : vector<1x384xf32>
    %276 = vector.extract_strided_slice %275 {offsets = [0, 0], sizes = [1, 128], strides = [1, 1]} : vector<1x384xf32> to vector<1x128xf32>
    %277 = vector.extract_strided_slice %275 {offsets = [0, 128], sizes = [1, 128], strides = [1, 1]} : vector<1x384xf32> to vector<1x128xf32>
    %278 = vector.extract_strided_slice %275 {offsets = [0, 256], sizes = [1, 128], strides = [1, 1]} : vector<1x384xf32> to vector<1x128xf32>
    %279 = vector.extract_strided_slice %267 {offsets = [0, 384], sizes = [1, 128], strides = [1, 1]} : vector<1x512xf32> to vector<1x128xf32>
    %280 = math.tanh %279 : vector<1x128xf32>
    %281 = arith.mulf %277, %262 : vector<1x128xf32>
    %282 = arith.mulf %276, %280 : vector<1x128xf32>
    %283 = arith.addf %281, %282 : vector<1x128xf32>
    %284 = math.tanh %283 : vector<1x128xf32>
    %285 = arith.mulf %278, %284 : vector<1x128xf32>
    %cst_80 = arith.constant dense<0.000000e+00> : vector<1x512xf32>
    %286 = tpu.matmul %285, %7, %cst_80 {dimension_numbers = #tpu.dot_dimension_numbers<[1], [0], [0], [1], [0, 0, 1, 1], [], []>} : vector<1x128xf32>, vector<128x512xf32>, vector<1x512xf32> -> vector<1x512xf32>
    %c13 = arith.constant 13 : index
    %c0_81 = arith.constant 0 : index
    %287 = vector.load %arg8[%c13, %c0_81] : memref<24x512xf32, #tpu.memory_space<vmem>>, vector<1x512xf32>
    %288 = arith.addf %286, %287 : vector<1x512xf32>
    %289 = vector.extract_strided_slice %288 {offsets = [0, 0], sizes = [1, 384], strides = [1, 1]} : vector<1x512xf32> to vector<1x384xf32>
    %cst_82 = arith.constant 5.000000e-01 : f32
    %290 = vector.broadcast %cst_82 : f32 to vector<1x384xf32>
    %291 = arith.mulf %290, %289 : vector<1x384xf32>
    %292 = math.tanh %291 : vector<1x384xf32>
    %cst_83 = arith.constant 5.000000e-01 : f32
    %293 = vector.broadcast %cst_83 : f32 to vector<1x384xf32>
    %294 = arith.mulf %293, %292 : vector<1x384xf32>
    %cst_84 = arith.constant 5.000000e-01 : f32
    %295 = vector.broadcast %cst_84 : f32 to vector<1x384xf32>
    %296 = arith.addf %294, %295 : vector<1x384xf32>
    %297 = vector.extract_strided_slice %296 {offsets = [0, 0], sizes = [1, 128], strides = [1, 1]} : vector<1x384xf32> to vector<1x128xf32>
    %298 = vector.extract_strided_slice %296 {offsets = [0, 128], sizes = [1, 128], strides = [1, 1]} : vector<1x384xf32> to vector<1x128xf32>
    %299 = vector.extract_strided_slice %296 {offsets = [0, 256], sizes = [1, 128], strides = [1, 1]} : vector<1x384xf32> to vector<1x128xf32>
    %300 = vector.extract_strided_slice %288 {offsets = [0, 384], sizes = [1, 128], strides = [1, 1]} : vector<1x512xf32> to vector<1x128xf32>
    %301 = math.tanh %300 : vector<1x128xf32>
    %302 = arith.mulf %298, %283 : vector<1x128xf32>
    %303 = arith.mulf %297, %301 : vector<1x128xf32>
    %304 = arith.addf %302, %303 : vector<1x128xf32>
    %305 = math.tanh %304 : vector<1x128xf32>
    %306 = arith.mulf %299, %305 : vector<1x128xf32>
    %cst_85 = arith.constant dense<0.000000e+00> : vector<1x512xf32>
    %307 = tpu.matmul %306, %7, %cst_85 {dimension_numbers = #tpu.dot_dimension_numbers<[1], [0], [0], [1], [0, 0, 1, 1], [], []>} : vector<1x128xf32>, vector<128x512xf32>, vector<1x512xf32> -> vector<1x512xf32>
    %c14 = arith.constant 14 : index
    %c0_86 = arith.constant 0 : index
    %308 = vector.load %arg8[%c14, %c0_86] : memref<24x512xf32, #tpu.memory_space<vmem>>, vector<1x512xf32>
    %309 = arith.addf %307, %308 : vector<1x512xf32>
    %310 = vector.extract_strided_slice %309 {offsets = [0, 0], sizes = [1, 384], strides = [1, 1]} : vector<1x512xf32> to vector<1x384xf32>
    %cst_87 = arith.constant 5.000000e-01 : f32
    %311 = vector.broadcast %cst_87 : f32 to vector<1x384xf32>
    %312 = arith.mulf %311, %310 : vector<1x384xf32>
    %313 = math.tanh %312 : vector<1x384xf32>
    %cst_88 = arith.constant 5.000000e-01 : f32
    %314 = vector.broadcast %cst_88 : f32 to vector<1x384xf32>
    %315 = arith.mulf %314, %313 : vector<1x384xf32>
    %cst_89 = arith.constant 5.000000e-01 : f32
    %316 = vector.broadcast %cst_89 : f32 to vector<1x384xf32>
    %317 = arith.addf %315, %316 : vector<1x384xf32>
    %318 = vector.extract_strided_slice %317 {offsets = [0, 0], sizes = [1, 128], strides = [1, 1]} : vector<1x384xf32> to vector<1x128xf32>
    %319 = vector.extract_strided_slice %317 {offsets = [0, 128], sizes = [1, 128], strides = [1, 1]} : vector<1x384xf32> to vector<1x128xf32>
    %320 = vector.extract_strided_slice %317 {offsets = [0, 256], sizes = [1, 128], strides = [1, 1]} : vector<1x384xf32> to vector<1x128xf32>
    %321 = vector.extract_strided_slice %309 {offsets = [0, 384], sizes = [1, 128], strides = [1, 1]} : vector<1x512xf32> to vector<1x128xf32>
    %322 = math.tanh %321 : vector<1x128xf32>
    %323 = arith.mulf %319, %304 : vector<1x128xf32>
    %324 = arith.mulf %318, %322 : vector<1x128xf32>
    %325 = arith.addf %323, %324 : vector<1x128xf32>
    %326 = math.tanh %325 : vector<1x128xf32>
    %327 = arith.mulf %320, %326 : vector<1x128xf32>
    %cst_90 = arith.constant dense<0.000000e+00> : vector<1x512xf32>
    %328 = tpu.matmul %327, %7, %cst_90 {dimension_numbers = #tpu.dot_dimension_numbers<[1], [0], [0], [1], [0, 0, 1, 1], [], []>} : vector<1x128xf32>, vector<128x512xf32>, vector<1x512xf32> -> vector<1x512xf32>
    %c15 = arith.constant 15 : index
    %c0_91 = arith.constant 0 : index
    %329 = vector.load %arg8[%c15, %c0_91] : memref<24x512xf32, #tpu.memory_space<vmem>>, vector<1x512xf32>
    %330 = arith.addf %328, %329 : vector<1x512xf32>
    %331 = vector.extract_strided_slice %330 {offsets = [0, 0], sizes = [1, 384], strides = [1, 1]} : vector<1x512xf32> to vector<1x384xf32>
    %cst_92 = arith.constant 5.000000e-01 : f32
    %332 = vector.broadcast %cst_92 : f32 to vector<1x384xf32>
    %333 = arith.mulf %332, %331 : vector<1x384xf32>
    %334 = math.tanh %333 : vector<1x384xf32>
    %cst_93 = arith.constant 5.000000e-01 : f32
    %335 = vector.broadcast %cst_93 : f32 to vector<1x384xf32>
    %336 = arith.mulf %335, %334 : vector<1x384xf32>
    %cst_94 = arith.constant 5.000000e-01 : f32
    %337 = vector.broadcast %cst_94 : f32 to vector<1x384xf32>
    %338 = arith.addf %336, %337 : vector<1x384xf32>
    %339 = vector.extract_strided_slice %338 {offsets = [0, 0], sizes = [1, 128], strides = [1, 1]} : vector<1x384xf32> to vector<1x128xf32>
    %340 = vector.extract_strided_slice %338 {offsets = [0, 128], sizes = [1, 128], strides = [1, 1]} : vector<1x384xf32> to vector<1x128xf32>
    %341 = vector.extract_strided_slice %338 {offsets = [0, 256], sizes = [1, 128], strides = [1, 1]} : vector<1x384xf32> to vector<1x128xf32>
    %342 = vector.extract_strided_slice %330 {offsets = [0, 384], sizes = [1, 128], strides = [1, 1]} : vector<1x512xf32> to vector<1x128xf32>
    %343 = math.tanh %342 : vector<1x128xf32>
    %344 = arith.mulf %340, %325 : vector<1x128xf32>
    %345 = arith.mulf %339, %343 : vector<1x128xf32>
    %346 = arith.addf %344, %345 : vector<1x128xf32>
    %347 = math.tanh %346 : vector<1x128xf32>
    %348 = arith.mulf %341, %347 : vector<1x128xf32>
    %349 = tpu.concatenate %201, %222, %243, %264, %285, %306, %327, %348 in 0 : vector<1x128xf32>, vector<1x128xf32>, vector<1x128xf32>, vector<1x128xf32>, vector<1x128xf32>, vector<1x128xf32>, vector<1x128xf32>, vector<1x128xf32> -> vector<8x128xf32>
    %c8_95 = arith.constant 8 : index
    %c0_96 = arith.constant 0 : index
    %350 = vector.load %arg9[%c8_95, %c0_96] : memref<24x128xf32, #tpu.memory_space<vmem>>, vector<8x128xf32>
    tpu.vector_store %arg9[%c8_95, %c0_96], %349 {strides = array<i32>} : memref<24x128xf32, #tpu.memory_space<vmem>>, vector<8x128xf32>,
    %cst_97 = arith.constant dense<0.000000e+00> : vector<1x512xf32>
    %351 = tpu.matmul %348, %7, %cst_97 {dimension_numbers = #tpu.dot_dimension_numbers<[1], [0], [0], [1], [0, 0, 1, 1], [], []>} : vector<1x128xf32>, vector<128x512xf32>, vector<1x512xf32> -> vector<1x512xf32>
    %c16 = arith.constant 16 : index
    %c0_98 = arith.constant 0 : index
    %352 = vector.load %arg8[%c16, %c0_98] : memref<24x512xf32, #tpu.memory_space<vmem>>, vector<1x512xf32>
    %353 = arith.addf %351, %352 : vector<1x512xf32>
    %354 = vector.extract_strided_slice %353 {offsets = [0, 0], sizes = [1, 384], strides = [1, 1]} : vector<1x512xf32> to vector<1x384xf32>
    %cst_99 = arith.constant 5.000000e-01 : f32
    %355 = vector.broadcast %cst_99 : f32 to vector<1x384xf32>
    %356 = arith.mulf %355, %354 : vector<1x384xf32>
    %357 = math.tanh %356 : vector<1x384xf32>
    %cst_100 = arith.constant 5.000000e-01 : f32
    %358 = vector.broadcast %cst_100 : f32 to vector<1x384xf32>
    %359 = arith.mulf %358, %357 : vector<1x384xf32>
    %cst_101 = arith.constant 5.000000e-01 : f32
    %360 = vector.broadcast %cst_101 : f32 to vector<1x384xf32>
    %361 = arith.addf %359, %360 : vector<1x384xf32>
    %362 = vector.extract_strided_slice %361 {offsets = [0, 0], sizes = [1, 128], strides = [1, 1]} : vector<1x384xf32> to vector<1x128xf32>
    %363 = vector.extract_strided_slice %361 {offsets = [0, 128], sizes = [1, 128], strides = [1, 1]} : vector<1x384xf32> to vector<1x128xf32>
    %364 = vector.extract_strided_slice %361 {offsets = [0, 256], sizes = [1, 128], strides = [1, 1]} : vector<1x384xf32> to vector<1x128xf32>
    %365 = vector.extract_strided_slice %353 {offsets = [0, 384], sizes = [1, 128], strides = [1, 1]} : vector<1x512xf32> to vector<1x128xf32>
    %366 = math.tanh %365 : vector<1x128xf32>
    %367 = arith.mulf %363, %346 : vector<1x128xf32>
    %368 = arith.mulf %362, %366 : vector<1x128xf32>
    %369 = arith.addf %367, %368 : vector<1x128xf32>
    %370 = math.tanh %369 : vector<1x128xf32>
    %371 = arith.mulf %364, %370 : vector<1x128xf32>
    %372 = tpu.concatenate %371, %10, %10, %10, %10, %10, %10, %10 in 0 : vector<1x128xf32>, vector<1x128xf32>, vector<1x128xf32>, vector<1x128xf32>, vector<1x128xf32>, vector<1x128xf32>, vector<1x128xf32>, vector<1x128xf32> -> vector<8x128xf32>
    %c16_102 = arith.constant 16 : index
    %c0_103 = arith.constant 0 : index
    %373 = vector.load %arg9[%c16_102, %c0_103] : memref<24x128xf32, #tpu.memory_space<vmem>>, vector<8x128xf32>
    tpu.vector_store %arg9[%c16_102, %c0_103], %372 {strides = array<i32>} : memref<24x128xf32, #tpu.memory_space<vmem>>, vector<8x128xf32>,
    %c0_104 = arith.constant 0 : index
    %c0_105 = arith.constant 0 : index
    %374 = vector.load %arg9[%c0_104, %c0_105] : memref<24x128xf32, #tpu.memory_space<vmem>>, vector<24x128xf32>
    %c0_106 = arith.constant 0 : index
    %c0_107 = arith.constant 0 : index
    %375 = vector.load %arg5[%c0_106, %c0_107] : memref<128x128xf32, #tpu.memory_space<vmem>>, vector<128x128xf32>
    %cst_108 = arith.constant dense<0.000000e+00> : vector<24x128xf32>
    %376 = tpu.matmul %374, %375, %cst_108 {dimension_numbers = #tpu.dot_dimension_numbers<[1], [0], [0], [1], [0, 0, 1, 1], [], []>} : vector<24x128xf32>, vector<128x128xf32>, vector<24x128xf32> -> vector<24x128xf32>
    %c0_109 = arith.constant 0 : index
    %c0_110 = arith.constant 0 : index
    %377 = vector.load %arg6[%c0_109, %c0_110] : memref<1x128xf32, #tpu.memory_space<vmem>>, vector<1x128xf32>
    %378 = vector.broadcast %377 : vector<1x128xf32> to vector<24x128xf32>
    %379 = arith.addf %376, %378 : vector<24x128xf32>
    %c0_111 = arith.constant 0 : index
    %c0_112 = arith.constant 0 : index
    %380 = vector.load %arg7[%c0_111, %c0_112] : memref<24x128xf32, #tpu.memory_space<vmem>>, vector<24x128xf32>
    tpu.vector_store %arg7[%c0_111, %c0_112], %379 {strides = array<i32>} : memref<24x128xf32, #tpu.memory_space<vmem>>, vector<24x128xf32>,
    return
  }
  func.func @transform_0(%arg0: i32) -> (i32, i32) {
    %c0_i32 = arith.constant 0 : i32
    %c0_i32_0 = arith.constant 0 : i32
    %c0_i32_1 = arith.constant 0 : i32
    return %c0_i32, %c0_i32_0 : i32, i32
  }
  func.func @transform_1(%arg0: i32) -> (i32, i32) {
    %c0_i32 = arith.constant 0 : i32
    %c0_i32_0 = arith.constant 0 : i32
    %c0_i32_1 = arith.constant 0 : i32
    return %c0_i32, %c0_i32_0 : i32, i32
  }
  func.func @transform_2(%arg0: i32) -> (i32, i32) {
    %c0_i32 = arith.constant 0 : i32
    %c0_i32_0 = arith.constant 0 : i32
    %c0_i32_1 = arith.constant 0 : i32
    return %c0_i32, %c0_i32_0 : i32, i32
  }
  func.func @transform_3(%arg0: i32) -> (i32, i32) {
    %c0_i32 = arith.constant 0 : i32
    %c0_i32_0 = arith.constant 0 : i32
    %c0_i32_1 = arith.constant 0 : i32
    return %c0_i32, %c0_i32_0 : i32, i32
  }
  func.func @transform_4(%arg0: i32) -> (i32, i32) {
    %c0_i32 = arith.constant 0 : i32
    %c0_i32_0 = arith.constant 0 : i32
    %c0_i32_1 = arith.constant 0 : i32
    return %c0_i32, %c0_i32_0 : i32, i32
  }
  func.func @transform_5(%arg0: i32) -> (i32, i32) {
    %c0_i32 = arith.constant 0 : i32
    %c0_i32_0 = arith.constant 0 : i32
    %c0_i32_1 = arith.constant 0 : i32
    return %c0_i32, %c0_i32_0 : i32, i32
  }
  func.func @transform_6(%arg0: i32) -> (i32, i32) {
    %c0_i32 = arith.constant 0 : i32
    %c0_i32_0 = arith.constant 0 : i32
    %c0_i32_1 = arith.constant 0 : i32
    return %c0_i32, %c0_i32_0 : i32, i32
  }
}

</mosaic_0001>

<bundles_post_ra>
// kernel: tpu_custom_call.1
= control target key start
LH: loop header
LB: loop body
LE: loop exit
PB: predicated region body
PF: predicated region fallthrough
CT: control target
= control target key end

     0   :  { %11 = vsyncpa [#allocation5], 0  ;;  %s6230_s0 = inlined_call_operand.hbm [shape: f32[24,64], index: 0, kind: input, shape index: {}]   ;;  %s6231_s1 = inlined_call_operand.hbm [shape: f32[64,512], index: 1, kind: input, shape index: {}]   ;;  %s6232_s2 = inlined_call_operand.hbm [shape: f32[128,512], index: 2, kind: input, shape index: {}]   ;;  %s6233_s3 = inlined_call_operand.vmem [shape: f32[1,512], index: 3, kind: input, shape index: {}]   ;;  %s6234_s4 = inlined_call_operand.hbm [shape: f32[128,128], index: 4, kind: input, shape index: {}]   ;;  %s6235_s5 = inlined_call_operand.vmem [shape: f32[1,128], index: 5, kind: input, shape index: {}]   ;;  %s6236_s6 = inlined_call_operand.hbm [shape: f32[24,128], index: 6, kind: output, shape index: {}]  }
   0x1   :  { %12 = vsyncpa [#allocation8], 0 }
   0x2   :  { %13 = vsyncpa [#allocation11], 0 }
   0x3   :  { %14 = vsyncpa [#allocation6], 0  ;;  %s4248_s21 = smov [#allocation7]  }
   0x4   :  { %s32_s22 = sshll.u32 %s4248_s21, 4  ;;  %s33_s22 = int_to_ptr.vmem [resolvable:$true] %s32_s22 }
   0x5   :  { %s4148_s23 = scalar_lea.vmem %s33_s22, 4096  ;;  %p4153_p1 = scmp.lt.s32.totalorder %s33_s22, %s33_s22 }
   0x6   :  { %p4149_p0 = scmp.ne.s32.totalorder %s33_s22, %s4148_s23  ;;  %p4154_p2 = scmp.lt.s32.totalorder %s4148_s23, %s4148_s23 }
   0x8   :  { %p4155_p3 = por %p4154_p2, %p4153_p1 }
   0xa   :  { %p4156_p4 = pnand %p4155_p3, %p4149_p0 }
   0xc   :  { %4159 = shalt.err (!%p4156_p4)
}
   0xd   :  { %s4249_s24 = smov 512   ;;  %s4250_s25 = smov 32  }
   0xe   :  { %38 = dma.hbm_to_vmem [thread:$0]  %s6231_s1, 4096, %s33_s22, [#allocation8], %s4249_s24, %s4249_s24, %s4250_s25  }
   0xf   :  { %s4251_s28 = smov [#allocation4]  }
  0x10   :  { %s20_s29 = sshll.u32 %s4251_s28, 4  ;;  %s21_s29 = int_to_ptr.vmem [resolvable:$true] %s20_s29 }
  0x11   :  { %s4168_s30 = scalar_lea.vmem %s21_s29, 384  ;;  %p4173_p6 = scmp.lt.s32.totalorder %s21_s29, %s21_s29 }
  0x12   :  { %p4169_p5 = scmp.ne.s32.totalorder %s21_s29, %s4168_s30  ;;  %p4174_p7 = scmp.lt.s32.totalorder %s4168_s30, %s4168_s30 }
  0x14   :  { %p4175_p8 = por %p4174_p7, %p4173_p6 }
  0x16   :  { %p4176_p9 = pnand %p4175_p8, %p4169_p5 }
  0x18   :  { %4179 = shalt.err (!%p4176_p9)
}
  0x19   :  { %s4252_s7 = smov 128   ;;  %s4253_s8 = smov 8  }
  0x1a   :  { %26 = dma.hbm_to_vmem [thread:$0]  %s6230_s0, 384, %s21_s29, [#allocation5], %s4252_s7, %s4252_s7, %s4253_s8  }
  0x1b   :  { %s4254_s1 = smov [#allocation9]   ;;  %s4255_s12 = smov [#allocation10]  }
  0x1c   :  { %s44_s11 = sshll.u32 %s4254_s1, 4  ;;  %s58_s13 = sshll.u32 %s4255_s12, 4  ;;  %s45_s11 = int_to_ptr.vmem [resolvable:$true] %s44_s11  ;;  %s59_s13 = int_to_ptr.vmem [resolvable:$true] %s58_s13 }
  0x1d   :  { %s4188_s14 = scalar_lea.vmem %s45_s11, 8192  ;;  %p4193_p11 = scmp.lt.s32.totalorder %s45_s11, %s45_s11 }
  0x1e   :  { %p4189_p10 = scmp.ne.s32.totalorder %s45_s11, %s4188_s14  ;;  %p4194_p12 = scmp.lt.s32.totalorder %s4188_s14, %s4188_s14 }
  0x20   :  { %p4195_p13 = por %p4194_p12, %p4193_p11 }
  0x22   :  { %p4196_p0 = pnand %p4195_p13, %p4189_p10 }
  0x24   :  { %4199 = shalt.err (!%p4196_p0)
}
  0x25   :  { %50 = dma.hbm_to_vmem [thread:$0]  %s6232_s2, 8192, %s45_s11, [#allocation8], %s4249_s24, %s4249_s24, %s4250_s25  }
  0x26   :  { %s4208_s0 = scalar_lea.vmem %s59_s13, 2048  ;;  %p4213_p2 = scmp.lt.s32.totalorder %s59_s13, %s59_s13 }
  0x27   :  { %p4209_p1 = scmp.ne.s32.totalorder %s59_s13, %s4208_s0  ;;  %p4214_p3 = scmp.lt.s32.totalorder %s4208_s0, %s4208_s0 }
  0x29   :  { %p4215_p4 = por %p4214_p3, %p4213_p2 }
  0x2b   :  { %p4216_p5 = pnand %p4215_p4, %p4209_p1 }
  0x2d   :  { %4219 = shalt.err (!%p4216_p5)
}
  0x2e   :  { %64 = dma.hbm_to_vmem [thread:$0]  %s6234_s4, 2048, %s59_s13, [#allocation11], %s4252_s7, %s4252_s7, %s4253_s8  }
  0x2f   :  { %4240 = dma.done.wait [#allocation5], 384  }
  0x30   :  { %4241 = vsyncadd [#allocation5], 4294966912 }
  0x31   :  { %4242 = dma.done.wait [#allocation8], 12288  }
  0x32   :  { %4243 = vsyncadd [#allocation8], 4294955008 }
  0x33   :  { %4244 = dma.done.wait [#allocation11], 2048  }
  0x34   :  { %4245 = vsyncadd [#allocation11], 4294965248  ;;  %v6237_v0 = vmov 0.0   ;;  %v111_v1 = vld [vmem:[#allocation7 + $0xe8] sm:$0xff]  ;;  %v110_v2 = vld [vmem:[#allocation7 + $0xe0] sm:$0xff]  ;;  %vm136_vm0 = vcmask 523264  }
  0x35   :  { %210 = vmatprep.mubr.f32.mxu1 %v6237_v0  ;;  %474 = vmatprep.mubr.f32.mxu0 %v6237_v0  ;;  %v107_v3 = vld [vmem:[#allocation7 + $0xc8] sm:$0xff]  ;;  %v106_v4 = vld [vmem:[#allocation7 + $0xc0] sm:$0xff]  ;;  %v113_v30 = vld [vmem:[#allocation7 + $0xf8] sm:$0xff]  ;;  %vm1872_vm1 = vcmask 1040384   ;;  %vm1874_vm2 = vcmask 1041408   ;;  %vm1876_vm3 = vcmask 1042432  }
  0x36   :  { %162 = vmatprep.subr.mxu1 %v111_v1  ;;  %v103_v5 = vld [vmem:[#allocation7 + $0xa8] sm:$0xff]  ;;  %v102_v6 = vld [vmem:[#allocation7 + $0xa0] sm:$0xff]  ;;  %v112_v31 = vld [vmem:[#allocation7 + $0xf0] sm:$0xff]  ;;  %vm1878_vm4 = vcmask 1043456   ;;  %vm1880_vm5 = vcmask 1044480   ;;  %vm1882_vm6 = vcmask 1045504  }
  0x37   :  { %163 = vmatpush1.msra.mxu1 %v110_v2  ;;  %v99_v7 = vld [vmem:[#allocation7 + $0x88] sm:$0xff]  ;;  %v98_v9 = vld [vmem:[#allocation7 + $0x80] sm:$0xff]  ;;  %v109_v32 = vld [vmem:[#allocation7 + $0xd8] sm:$0xff]  ;;  %vm1884_vm7 = vcmask 1046528   ;;  %vm4257_vm8 = vmmov 0  }
  0x38   :  { %164 = vmatprep.subr.mxu1 %v107_v3  ;;  %v4320_v8 = vld [vmem:[#allocation9 + $0x1e8] sm:$0xff]  ;;  %v4323_v10 = vld [vmem:[#allocation9 + $0x1e0] sm:$0xff]  ;;  %v108_v34 = vld [vmem:[#allocation7 + $0xd0] sm:$0xff] }
  0x39   :  { %165 = vmatpush1.msra.mxu1 %v106_v4  ;;  %6425 = vst [vmem:[#allocation17_spill] sm:$0xff] %v4320_v8  ;;  %410 = vmatprep.subr.mxu0 %v4320_v8  ;;  %v4325_v11 = vld [vmem:[#allocation9 + $0x1c8] sm:$0xff]  ;;  %v4328_v13 = vld [vmem:[#allocation9 + $0x1c0] sm:$0xff]  ;;  %v105_v36 = vld [vmem:[#allocation7 + $0xb8] sm:$0xff] }
  0x3a   :  { %166 = vmatprep.subr.mxu1 %v103_v5  ;;  %v95_v12 = vld [vmem:[#allocation7 + $0x68] sm:$0xff]  ;;  %411 = vmatpush1.msra.mxu0 %v4323_v10  ;;  %v94_v14 = vld [vmem:[#allocation7 + $0x60] sm:$0xff]  ;;  %v4365_v37 = vld [vmem:[#allocation4 + $0x8] sm:$0xff] }
  0x3b   :  { %167 = vmatpush1.msra.mxu1 %v102_v6  ;;  %412 = vmatprep.subr.mxu0 %v4325_v11  ;;  %v4331_v15 = vld [vmem:[#allocation9 + $0x1a8] sm:$0xff]  ;;  %v4334_v17 = vld [vmem:[#allocation9 + $0x1a0] sm:$0xff]  ;;  %v104_v38 = vld [vmem:[#allocation7 + $0xb0] sm:$0xff] }
  0x3c   :  { %168 = vmatprep.subr.mxu1 %v99_v7  ;;  %v91_v16 = vld [vmem:[#allocation7 + $0x48] sm:$0xff]  ;;  %413 = vmatpush1.msra.mxu0 %v4328_v13  ;;  %v90_v19 = vld [vmem:[#allocation7 + $0x40] sm:$0xff]  ;;  %v101_v39 = vld [vmem:[#allocation7 + $0x98] sm:$0xff] }
  0x3d   :  { %169 = vmatpush1.msra.mxu1 %v98_v9  ;;  %v4336_v18 = vld [vmem:[#allocation9 + $0x188] sm:$0xff]  ;;  %414 = vmatprep.subr.mxu0 %v4331_v15  ;;  %v4339_v20 = vld [vmem:[#allocation9 + $0x180] sm:$0xff]  ;;  %v100_v41 = vld [vmem:[#allocation7 + $0x90] sm:$0xff] }
  0x3e   :  { %170 = vmatprep.subr.mxu1 %v95_v12  ;;  %v87_v21 = vld [vmem:[#allocation7 + $0x28] sm:$0xff]  ;;  %415 = vmatpush1.msra.mxu0 %v4334_v17  ;;  %v86_v23 = vld [vmem:[#allocation7 + $0x20] sm:$0xff]  ;;  %v97_v43 = vld [vmem:[#allocation7 + $0x78] sm:$0xff] }
  0x3f   :  { %171 = vmatpush1.msra.mxu1 %v94_v14  ;;  %v4342_v22 = vld [vmem:[#allocation9 + $0x168] sm:$0xff]  ;;  %416 = vmatprep.subr.mxu0 %v4336_v18  ;;  %v4345_v24 = vld [vmem:[#allocation9 + $0x160] sm:$0xff]  ;;  %v4376_v44 = vld [vmem:[#allocation4 + $0x10] sm:$0xff] }
  0x40   :  { %172 = vmatprep.subr.mxu1 %v91_v16  ;;  %v83_v25 = vld [vmem:[#allocation7 + $0x8] sm:$0xff]  ;;  %417 = vmatpush1.msra.mxu0 %v4339_v20  ;;  %v82_v27 = vld [vmem:[#allocation7] sm:$0xff]  ;;  %v96_v45 = vld [vmem:[#allocation7 + $0x70] sm:$0xff] }
  0x41   :  { %173 = vmatpush1.msra.mxu1 %v90_v19  ;;  %v4348_v26 = vld [vmem:[#allocation9 + $0x148] sm:$0xff]  ;;  %418 = vmatprep.subr.mxu0 %v4342_v22  ;;  %v4351_v28 = vld [vmem:[#allocation9 + $0x140] sm:$0xff]  ;;  %v93_v47 = vld [vmem:[#allocation7 + $0x58] sm:$0xff] }
  0x42   :  { %174 = vmatprep.subr.mxu1 %v87_v21  ;;  %v4353_v29 = vld [vmem:[#allocation4] sm:$0xff]  ;;  %419 = vmatpush1.msra.mxu0 %v4345_v24  ;;  %v4362_v35 = vld [vmem:[#allocation9 + $0x120] sm:$0xff]  ;;  %v92_v49 = vld [vmem:[#allocation7 + $0x50] sm:$0xff] }
  0x43   :  { %175 = vmatpush1.msra.mxu1 %v86_v23  ;;  %420 = vmatprep.subr.mxu0 %v4348_v26  ;;  %v4358_v33 = vld [vmem:[#allocation9 + $0x128] sm:$0xff]  ;;  %6426 = vst [vmem:[#allocation18_spill] sm:$0xff] %v4362_v35  ;;  %v4373_v42 = vld [vmem:[#allocation9 + $0x100] sm:$0xff]  ;;  %v89_v51 = vld [vmem:[#allocation7 + $0x38] sm:$0xff] }
  0x44   :  { %176 = vmatprep.subr.mxu1 %v83_v25  ;;  %421 = vmatpush1.msra.mxu0 %v4351_v28  ;;  %v4369_v40 = vld [vmem:[#allocation9 + $0x108] sm:$0xff]  ;;  %v4382_v48 = vld [vmem:[#allocation9 + $0xe0] sm:$0xff]  ;;  %v88_v52 = vld [vmem:[#allocation7 + $0x30] sm:$0xff] }
  0x45   :  { %177 = vmatpush1.msra.mxu1 %v82_v27  ;;  %422 = vmatprep.subr.mxu0 %v4358_v33  ;;  %v4379_v46 = vld [vmem:[#allocation9 + $0xe8] sm:$0xff]  ;;  %v4390_v53 = vld [vmem:[#allocation9 + $0xc0] sm:$0xff]  ;;  %v85_v54 = vld [vmem:[#allocation7 + $0x18] sm:$0xff] }
  0x46   :  { %3699 = vmatmul.mubr.msk.f32.vlgmr.msra.gmra.mxu1 %vm136_vm0, %v4353_v29  ;;  %245 = vmatprep.subr.mxu1 %v113_v30  ;;  %v4386_v50 = vld [vmem:[#allocation9 + $0xc8] sm:$0xff]  ;;  %v84_v56 = vld [vmem:[#allocation7 + $0x10] sm:$0xff]  ;;  %v4396_v57 = vld [vmem:[#allocation9 + $0xa0] sm:$0xff] }
  0x47   :  { %246 = vmatpush1.msra.mxu1 %v112_v31  ;;  %216 = vmatprep.mubr.f32.mxu1 %v6237_v0  ;;  %v4393_v55 = vld [vmem:[#allocation9 + $0xa8] sm:$0xff]  ;;  %v4399_v58 = vld [vmem:[#allocation9 + $0x1f8] sm:$0xff]  ;;  %v4402_v59 = vld [vmem:[#allocation9 + $0x1f0] sm:$0xff] }
  0x48   :  { %247 = vmatprep.subr.mxu1 %v109_v32  ;;  %423 = vmatpush1.msra.mxu0 %v4362_v35  ;;  %6427 = vst [vmem:[#allocation19_spill] sm:$0xff] %v4399_v58  ;;  %v4404_v60 = vld [vmem:[#allocation9 + $0x88] sm:$0xff]  ;;  %v4407_v61 = vld [vmem:[#allocation9 + $0x1d8] sm:$0xff]  ;;  %v4412_v62 = vld [vmem:[#allocation9 + $0x80] sm:$0xff] }
  0x49   :  { %248 = vmatpush1.msra.mxu1 %v108_v34  ;;  %424 = vmatprep.subr.mxu0 %v4369_v40  ;;  %6428 = vst [vmem:[#allocation20_spill] sm:$0xff] %v4404_v60  ;;  %6429 = vst [vmem:[#allocation21_spill] sm:$0xff] %v4412_v62  ;;  %v4414_v63 = vld [vmem:[#allocation9 + $0x1d0] sm:$0xff]  ;;  %v4418_v1 = vld [vmem:[#allocation9 + $0x68] sm:$0xff] }
  0x4a   :  { %249 = vmatprep.subr.mxu1 %v105_v36  ;;  %3700 = vmatmul.mubr.msk.f32.gmra.mxu1 %vm136_vm0, %v4365_v37  ;;  %6430 = vst [vmem:[#allocation22_spill] sm:$0xff] %v4418_v1  ;;  %v4422_v2 = vld [vmem:[#allocation9 + $0x1b8] sm:$0xff]  ;;  %v4424_v3 = vld [vmem:[#allocation9 + $0x60] sm:$0xff]  ;;  %v4428_v4 = vld [vmem:[#allocation9 + $0x1b0] sm:$0xff] }
  0x4b   :  { %250 = vmatpush1.msra.mxu1 %v104_v38  ;;  %222 = vmatprep.mubr.f32.mxu1 %v6237_v0  ;;  %6431 = vst [vmem:[#allocation23_spill] sm:$0xff] %v4424_v3  ;;  %v4430_v5 = vld [vmem:[#allocation9 + $0x48] sm:$0xff]  ;;  %v4435_v6 = vld [vmem:[#allocation9 + $0x198] sm:$0xff]  ;;  %v4439_v7 = vld [vmem:[#allocation9 + $0x40] sm:$0xff] }
  0x4c   :  { %251 = vmatprep.subr.mxu1 %v101_v39  ;;  %425 = vmatpush1.msra.mxu0 %v4373_v42  ;;  %6432 = vst [vmem:[#allocation24_spill] sm:$0xff] %v4430_v5  ;;  %6433 = vst [vmem:[#allocation25_spill] sm:$0xff] %v4439_v7  ;;  %v4441_v9 = vld [vmem:[#allocation9 + $0x190] sm:$0xff]  ;;  %v4445_v12 = vld [vmem:[#allocation9 + $0x28] sm:$0xff] }
  0x4d   :  { %252 = vmatpush1.msra.mxu1 %v100_v41  ;;  %426 = vmatprep.subr.mxu0 %v4379_v46  ;;  %6434 = vst [vmem:[#allocation26_spill] sm:$0xff] %v4445_v12  ;;  %v4449_v14 = vld [vmem:[#allocation9 + $0x178] sm:$0xff]  ;;  %v4451_v16 = vld [vmem:[#allocation9 + $0x20] sm:$0xff]  ;;  %v4455_v19 = vld [vmem:[#allocation9 + $0x170] sm:$0xff] }
  0x4e   :  { %253 = vmatprep.subr.mxu1 %v97_v43  ;;  %3701 = vmatmul.mubr.msk.f32.gmra.mxu1 %vm136_vm0, %v4376_v44  ;;  %6435 = vst [vmem:[#allocation27_spill] sm:$0xff] %v4451_v16  ;;  %v4457_v21 = vld [vmem:[#allocation9 + $0x8] sm:$0xff]  ;;  %v4462_v23 = vld [vmem:[#allocation9 + $0x158] sm:$0xff]  ;;  %v4464_v25 = vld [vmem:[#allocation9] sm:$0xff] }
  0x4f   :  { %254 = vmatpush1.msra.mxu1 %v96_v45  ;;  %427 = vmatpush1.msra.mxu0 %v4382_v48  ;;  %6436 = vst [vmem:[#allocation28_spill] sm:$0xff] %v4457_v21  ;;  %6437 = vst [vmem:[#allocation29_spill] sm:$0xff] %v4464_v25  ;;  %v4468_v27 = vld [vmem:[#allocation9 + $0x150] sm:$0xff]  ;;  %v4480_v31 = vld [vmem:[#allocation9 + $0x118] sm:$0xff] }
  0x50   :  { %255 = vmatprep.subr.mxu1 %v93_v47  ;;  %428 = vmatprep.subr.mxu0 %v4386_v50  ;;  %v4476_v30 = vld [vmem:[#allocation9 + $0x130] sm:$0xff]  ;;  %v4487_v34 = vld [vmem:[#allocation9 + $0xf8] sm:$0xff] }
  0x51   :  { %256 = vmatpush1.msra.mxu1 %v92_v49  ;;  %293 = vmatprep.mubr.f32.mxu1 %v6237_v0  ;;  %v4483_v32 = vld [vmem:[#allocation9 + $0x110] sm:$0xff]  ;;  %v4503_v39 = vld [vmem:[#allocation9 + $0xb8] sm:$0xff] }
  0x52   :  { %257 = vmatprep.subr.mxu1 %v89_v51  ;;  %429 = vmatpush1.msra.mxu0 %v4390_v53  ;;  %v4491_v36 = vld [vmem:[#allocation9 + $0xf0] sm:$0xff]  ;;  %v4511_v43 = vld [vmem:[#allocation9 + $0x98] sm:$0xff] }
  0x53   :  { %258 = vmatpush1.msra.mxu1 %v88_v52  ;;  %430 = vmatprep.subr.mxu0 %v4393_v55  ;;  %v4499_v38 = vld [vmem:[#allocation9 + $0xd0] sm:$0xff]  ;;  %6438 = vst [vmem:[#allocation30_spill] sm:$0xff] %v4511_v43  ;;  %v4519_v45 = vld [vmem:[#allocation9 + $0x78] sm:$0xff] }
  0x54   :  { %259 = vmatprep.subr.mxu1 %v85_v54  ;;  %431 = vmatpush1.msra.mxu0 %v4396_v57  ;;  %v4507_v41 = vld [vmem:[#allocation9 + $0xb0] sm:$0xff]  ;;  %6440 = vst [vmem:[#allocation32_spill] sm:$0xff] %v4519_v45  ;;  %v4527_v49 = vld [vmem:[#allocation9 + $0x58] sm:$0xff] }
  0x55   :  { %260 = vmatpush1.msra.mxu1 %v84_v56  ;;  %432 = vmatprep.subr.mxu0 %v4404_v60  ;;  %v4523_v47 = vld [vmem:[#allocation9 + $0x70] sm:$0xff]  ;;  %6442 = vst [vmem:[#allocation34_spill] sm:$0xff] %v4527_v49  ;;  %v4535_v52 = vld [vmem:[#allocation9 + $0x38] sm:$0xff] }
  0x56   :  { %3702 = vmatmul.mubr.msk.f32.vlgmr.msra.gmra.mxu1 %vm136_vm0, %v4353_v29  ;;  %481 = vmatprep.subr.mxu1 %v4399_v58  ;;  %v4472_v29 = vld [vmem:[#allocation9 + $0x138] sm:$0xff]  ;;  %6441 = vst [vmem:[#allocation33_spill] sm:$0xff] %v4523_v47  ;;  %v4531_v51 = vld [vmem:[#allocation9 + $0x50] sm:$0xff]  ;;  %6444 = vst [vmem:[#allocation36_spill] sm:$0xff] %v4535_v52 }
  0x57   :  { %482 = vmatpush1.msra.mxu1 %v4402_v59  ;;  %299 = vmatprep.mubr.f32.mxu1 %v6237_v0  ;;  %6443 = vst [vmem:[#allocation35_spill] sm:$0xff] %v4531_v51  ;;  %v4539_v54 = vld [vmem:[#allocation9 + $0x30] sm:$0xff]  ;;  %v4543_v56 = vld [vmem:[#allocation9 + $0x18] sm:$0xff] }
  0x58   :  { %483 = vmatprep.subr.mxu1 %v4407_v61  ;;  %433 = vmatpush1.msra.mxu0 %v4412_v62  ;;  %6445 = vst [vmem:[#allocation37_spill] sm:$0xff] %v4539_v54  ;;  %6446 = vst [vmem:[#allocation38_spill] sm:$0xff] %v4543_v56 }
  0x59   :  { %484 = vmatpush1.msra.mxu1 %v4414_v63  ;;  %434 = vmatprep.subr.mxu0 %v4418_v1 }
  0x5a   :  { %3703 = vmatmul.mubr.msk.f32.gmra.mxu1 %vm136_vm0, %v4365_v37  ;;  %485 = vmatprep.subr.mxu1 %v4422_v2  ;;  %v4495_v37 = vld [vmem:[#allocation9 + $0xd8] sm:$0xff] }
  0x5b   :  { %435 = vmatpush1.msra.mxu0 %v4424_v3  ;;  %486 = vmatpush1.msra.mxu1 %v4428_v4 }
  0x5c   :  { %436 = vmatprep.subr.mxu0 %v4430_v5  ;;  %487 = vmatprep.subr.mxu1 %v4435_v6 }
  0x5d   :  { %305 = vmatprep.mubr.f32.mxu1 %v6237_v0  ;;  %437 = vmatpush1.msra.mxu0 %v4439_v7 }
  0x5e   :  { %488 = vmatpush1.msra.mxu1 %v4441_v9  ;;  %438 = vmatprep.subr.mxu0 %v4445_v12 }
  0x5f   :  { %3704 = vmatmul.mubr.msk.f32.gmra.mxu1 %vm136_vm0, %v4376_v44  ;;  %489 = vmatprep.subr.mxu1 %v4449_v14  ;;  %v4515_v44 = vld [vmem:[#allocation9 + $0x90] sm:$0xff] }
  0x60   :  { %439 = vmatpush1.msra.mxu0 %v4451_v16  ;;  %490 = vmatpush1.msra.mxu1 %v4455_v19  ;;  %6439 = vst [vmem:[#allocation31_spill] sm:$0xff] %v4515_v44 }
  0x61   :  { %440 = vmatprep.subr.mxu0 %v4457_v21  ;;  %491 = vmatprep.subr.mxu1 %v4462_v23 }
  0x62   :  { %441 = vmatpush1.msra.mxu0 %v4464_v25  ;;  %492 = vmatpush1.msra.mxu1 %v4468_v27 }
  0x63   :  { %475 = vmatmul.mubr.f32.vlgmr.msra.gmra.mxu0 %v6237_v0  ;;  %493 = vmatprep.subr.mxu1 %v4472_v29 }
  0x64   :  { %545 = vmatprep.mubr.f32.mxu1 %v6237_v0  ;;  %494 = vmatpush1.msra.mxu1 %v4476_v30  ;;  %v4547_v0 = vld [vmem:[#allocation9 + $0x10] sm:$0xff] }
  0x65   :  { %593 = vmatprep.subr.mxu0 %v4320_v8  ;;  %495 = vmatprep.subr.mxu1 %v4480_v31  ;;  %6447 = vst [vmem:[#allocation39_spill] sm:$0xff] %v4547_v0 }
  0x66   :  { %594 = vmatpush1.msra.mxu0 %v4323_v10  ;;  %496 = vmatpush1.msra.mxu1 %v4483_v32 }
  0x67   :  { %595 = vmatprep.subr.mxu0 %v4325_v11  ;;  %497 = vmatprep.subr.mxu1 %v4487_v34 }
  0x68   :  { %596 = vmatpush1.msra.mxu0 %v4328_v13  ;;  %498 = vmatpush1.msra.mxu1 %v4491_v36 }
  0x69   :  { %597 = vmatprep.subr.mxu0 %v4331_v15  ;;  %499 = vmatprep.subr.mxu1 %v4495_v37 }
  0x6a   :  { %598 = vmatpush1.msra.mxu0 %v4334_v17  ;;  %500 = vmatpush1.msra.mxu1 %v4499_v38 }
  0x6b   :  { %599 = vmatprep.subr.mxu0 %v4336_v18  ;;  %501 = vmatprep.subr.mxu1 %v4503_v39 }
  0x6c   :  { %600 = vmatpush1.msra.mxu0 %v4339_v20  ;;  %502 = vmatpush1.msra.mxu1 %v4507_v41 }
  0x6d   :  { %601 = vmatprep.subr.mxu0 %v4342_v22  ;;  %503 = vmatprep.subr.mxu1 %v4511_v43 }
  0x6e   :  { %602 = vmatpush1.msra.mxu0 %v4345_v24  ;;  %504 = vmatpush1.msra.mxu1 %v4515_v44 }
  0x6f   :  { %603 = vmatprep.subr.mxu0 %v4348_v26  ;;  %505 = vmatprep.subr.mxu1 %v4519_v45 }
  0x70   :  { %604 = vmatpush1.msra.mxu0 %v4351_v28  ;;  %506 = vmatpush1.msra.mxu1 %v4523_v47 }
  0x71   :  { %605 = vmatprep.subr.mxu0 %v4358_v33  ;;  %507 = vmatprep.subr.mxu1 %v4527_v49 }
  0x72   :  { %606 = vmatpush1.msra.mxu0 %v4362_v35  ;;  %508 = vmatpush1.msra.mxu1 %v4531_v51  ;;  %v6448_v35 = vmov 0.0  }
  0x73   :  { %607 = vmatprep.subr.mxu0 %v4369_v40  ;;  %509 = vmatprep.subr.mxu1 %v4535_v52 }
  0x74   :  { %608 = vmatpush1.msra.mxu0 %v4373_v42  ;;  %510 = vmatpush1.msra.mxu1 %v4539_v54 }
  0x75   :  { %609 = vmatprep.subr.mxu0 %v4379_v46  ;;  %511 = vmatprep.subr.mxu1 %v4543_v56 }
  0x76   :  { %610 = vmatpush1.msra.mxu0 %v4382_v48  ;;  %512 = vmatpush1.msra.mxu1 %v4547_v0 }
  0x77   :  { %611 = vmatprep.subr.mxu0 %v4386_v50  ;;  %546 = vmatmul.mubr.f32.vlgmr.msra.gmra.mxu1 %v6448_v35 }
  0x78   :  { %664 = vmatprep.subr.mxu1 %v4399_v58  ;;  %612 = vmatpush1.msra.mxu0 %v4390_v53 }
  0x79   :  { %665 = vmatpush1.msra.mxu1 %v4402_v59  ;;  %613 = vmatprep.subr.mxu0 %v4393_v55 }
  0x7a   :  { %666 = vmatprep.subr.mxu1 %v4407_v61  ;;  %614 = vmatpush1.msra.mxu0 %v4396_v57 }
  0x7b   :  { %667 = vmatpush1.msra.mxu1 %v4414_v63  ;;  %615 = vmatprep.subr.mxu0 %v4404_v60 }
  0x7c   :  { %668 = vmatprep.subr.mxu1 %v4422_v2  ;;  %616 = vmatpush1.msra.mxu0 %v4412_v62 }
  0x7d   :  { %669 = vmatpush1.msra.mxu1 %v4428_v4  ;;  %617 = vmatprep.subr.mxu0 %v4418_v1 }
  0x7e   :  { %670 = vmatprep.subr.mxu1 %v4435_v6  ;;  %618 = vmatpush1.msra.mxu0 %v4424_v3 }
  0x7f   :  { %671 = vmatpush1.msra.mxu1 %v4441_v9  ;;  %619 = vmatprep.subr.mxu0 %v4430_v5 }
  0x80   :  { %672 = vmatprep.subr.mxu1 %v4449_v14  ;;  %620 = vmatpush1.msra.mxu0 %v4439_v7 }
  0x81   :  { %673 = vmatpush1.msra.mxu1 %v4455_v19  ;;  %621 = vmatprep.subr.mxu0 %v4445_v12 }
  0x82   :  { %674 = vmatprep.subr.mxu1 %v4462_v23  ;;  %622 = vmatpush1.msra.mxu0 %v4451_v16 }
  0x83   :  { %675 = vmatpush1.msra.mxu1 %v4468_v27  ;;  %623 = vmatprep.subr.mxu0 %v4457_v21  ;;  %v114_v21 = vld [vmem:[%s6233_s3] sm:$0xf] }
  0x84   :  { %676 = vmatprep.subr.mxu1 %v4472_v29  ;;  %624 = vmatpush1.msra.mxu0 %v4464_v25 }
  0x85   :  { %677 = vmatpush1.msra.mxu1 %v4476_v30  ;;  %657 = vmatprep.mubr.f32.mxu0 %v6448_v35 }
  0x86   :  { %678 = vmatprep.subr.mxu1 %v4480_v31  ;;  %728 = vmatprep.mubr.f32.mxu1 %v6448_v35 }
  0x87   :  { %679 = vmatpush1.msra.mxu1 %v4483_v32  ;;  %776 = vmatprep.subr.mxu0 %v4320_v8  ;;  %v116_v8 = vlaneseq }
  0x88   :  { %680 = vmatprep.subr.mxu1 %v4487_v34 }
  0x89   :  { %681 = vmatpush1.msra.mxu1 %v4491_v36  ;;  %v117_v35 = vshrl.u32 %v116_v8, 7 }
  0x8a   :  { %682 = vmatprep.subr.mxu1 %v4495_v37 }
  0x8b   :  { %683 = vmatpush1.msra.mxu1 %v4499_v38  ;;  %v4606_v25 = vsub.s32 0, %v117_v35  ;;  %v4611_v16 = vsub.s32 1, %v117_v35  ;;  %v4615_v3 = vsub.s32 2, %v117_v35 }
  0x8c   :  { %684 = vmatprep.subr.mxu1 %v4503_v39 }
  0x8d   :  { %685 = vmatpush1.msra.mxu1 %v4507_v41  ;;  %6449 = vst [vmem:[#allocation40_spill] sm:$0xff] %v4606_v25  ;;  %6450 = vst [vmem:[#allocation41_spill] sm:$0xff] %v4611_v16 }
  0x8e   :  { %686 = vmatprep.subr.mxu1 %v4511_v43 }
  0x8f   :  { %687 = vmatpush1.msra.mxu1 %v4515_v44  ;;  %v4617_v44 = vsub.s32 3, %v117_v35 }
  0x90   :  { %688 = vmatprep.subr.mxu1 %v4519_v45 }
  0x91   :  { %689 = vmatpush1.msra.mxu1 %v4523_v47 }
  0x92   :  { %690 = vmatprep.subr.mxu1 %v4527_v49 }
  0x93   :  { %691 = vmatpush1.msra.mxu1 %v4531_v51 }
  0x94   :  { %692 = vmatprep.subr.mxu1 %v4535_v52  ;;  %v119_v52 = vrot.slane %v114_v21, %v4606_v25 }
  0x95   :  { %693 = vmatpush1.msra.mxu1 %v4539_v54  ;;  %v123_v54 = vrot.slane %v114_v21, %v4611_v16 }
  0x96   :  { %694 = vmatprep.subr.mxu1 %v4543_v56 }
  0x97   :  { %695 = vmatpush1.msra.mxu1 %v4547_v0 }
  0x98   :  { %847 = vmatprep.subr.mxu1 %v4399_v58 }
 0x106   :  { %v212_v12 = vpop.f32.mrf.mxu1 }
 0x107   :  { %v213_v56 = vadd.f32 %v212_v12, %v119_v52  ;;  %v127_v12 = vrot.slane %v114_v21, %v4615_v3 }
 0x108   :  { %v214_v51 = vpop.f32.mrf.mxu1 }
 0x109   :  { %312 = vst [vmem:[#allocation2] sm:$0xff] %v213_v56  ;;  %v215_v0 = vadd.f32 %v214_v51, %v123_v54  ;;  %v131_v51 = vrot.slane %v114_v21, %v4617_v44 }
 0x10a   :  { %v218_v58 = vpop.f32.mrf.mxu1 }
 0x10b   :  { %313 = vst [vmem:[#allocation2 + $0x8] sm:$0xff] %v215_v0  ;;  %v219_v8 = vadd.f32 %v218_v58, %v119_v52 }
 0x10c   :  { %v220_v7 = vpop.f32.mrf.mxu1 }
 0x10d   :  { %316 = vst [vmem:[#allocation2 + $0x20] sm:$0xff] %v219_v8  ;;  %v221_v49 = vadd.f32 %v220_v7, %v123_v54 }
 0x10e   :  { %v224_v5 = vpop.f32.mrf.mxu1 }
 0x10f   :  { %317 = vst [vmem:[#allocation2 + $0x28] sm:$0xff] %v221_v49  ;;  %v225_v47 = vadd.f32 %v224_v5, %v119_v52 }
 0x110   :  { %v226_v45 = vpop.f32.mrf.mxu1 }
 0x111   :  { %320 = vst [vmem:[#allocation2 + $0x40] sm:$0xff] %v225_v47  ;;  %v227_v1 = vadd.f32 %v226_v45, %v123_v54 }
 0x113   :  { %321 = vst [vmem:[#allocation2 + $0x48] sm:$0xff] %v227_v1 }
 0x116   :  { %v295_v0 = vpop.f32.mrf.mxu1 }
 0x117   :  { %v296_v58 = vadd.f32 %v295_v0, %v127_v12 }
 0x118   :  { %v297_v56 = vpop.f32.mrf.mxu1 }
 0x119   :  { %314 = vst [vmem:[#allocation2 + $0x10] sm:$0xff] %v296_v58  ;;  %v298_v7 = vadd.f32 %v297_v56, %v131_v51 }
 0x11a   :  { %v301_v8 = vpop.f32.mrf.mxu1 }
 0x11b   :  { %315 = vst [vmem:[#allocation2 + $0x18] sm:$0xff] %v298_v7  ;;  %v302_v5 = vadd.f32 %v301_v8, %v127_v12 }
 0x11c   :  { %v303_v49 = vpop.f32.mrf.mxu1 }
 0x11d   :  { %318 = vst [vmem:[#allocation2 + $0x30] sm:$0xff] %v302_v5  ;;  %v304_v52 = vadd.f32 %v303_v49, %v131_v51 }
 0x11f   :  { %319 = vst [vmem:[#allocation2 + $0x38] sm:$0xff] %v304_v52  ;;  %v307_v45 = vpop.f32.mrf.mxu1 }
 0x120   :  { %v308_v35 = vadd.f32 %v307_v45, %v127_v12 }
 0x121   :  { %v309_v47 = vpop.f32.mrf.mxu1 }
 0x122   :  { %322 = vst [vmem:[#allocation2 + $0x50] sm:$0xff] %v308_v35  ;;  %v310_v1 = vadd.f32 %v309_v47, %v131_v51  ;;  %v388_v54 = vld [vmem:[#allocation2] ss:$8 sm:$0xf] }
 0x123   :  { %v476_v21 = vpop.f32.mrf.mxu0  ;;  %v397_v0 = vrot.slane %v388_v54, %v4611_v16  ;;  %v393_v58 = vrot.slane %v388_v54, %v4606_v25  ;;  %v405_v12 = vrot.slane %v388_v54, %v4617_v44  ;;  %v401_v51 = vrot.slane %v388_v54, %v4615_v3 }
 0x124   :  { %323 = vst [vmem:[#allocation2 + $0x58] sm:$0xff] %v310_v1 }
 0x125   :  { %v478_v62 = vpop.f32.mrf.mxu0  ;;  %v477_v7 = vadd.f32 %v476_v21, %v393_v58 }
 0x126   :  { %v479_v56 = vadd.f32 %v478_v62, %v397_v0 }
 0x127   :  { %v552_v43 = vmul.f32 0.5, %v477_v7 }
 0x128   :  { %v553_v8 = vmul.f32 0.5, %v479_v56 }
 0x12a   :  { %3778 = vtanh.f32 %v553_v8 }
 0x12b   :  { %3780 = vtanh.f32 %v552_v43 }
 0x137   :  { %v547_v5 = vpop.f32.mrf.mxu1  ;;  %v3779_v35 = vpop.eup %3778 }
 0x138   :  { %v548_v45 = vadd.f32 %v547_v5, %v401_v51  ;;  %v3781_v47 = vpop.eup %3780  ;;  %v559_v1 = vmul.f32 0.5, %v3779_v35  ;;  %v6456_v51 = vld [vmem:[#allocation22_spill] sm:$0xff]  ;;  %v6458_v35 = vld [vmem:[#allocation23_spill] sm:$0xff] }
 0x139   :  { %v549_v49 = vpop.f32.mrf.mxu1  ;;  %v558_v25 = vmul.f32 0.5, %v3781_v47  ;;  %v6459_v47 = vld [vmem:[#allocation33_spill] sm:$0xff] }
 0x13a   :  { %v550_v52 = vadd.f32 %v549_v49, %v405_v12  ;;  %v554_v16 = vmul.f32 0.5, %v548_v45  ;;  %v562_v62 = vadd.f32 0.5, %v559_v1  ;;  %v6454_v49 = vld [vmem:[#allocation21_spill] sm:$0xff]  ;;  %v6457_v45 = vld [vmem:[#allocation32_spill] sm:$0xff] }
 0x13b   :  { %v561_v21 = vadd.f32 0.5, %v558_v25  ;;  %v6453_v25 = vld [vmem:[#allocation30_spill] sm:$0xff]  ;;  %v6460_v1 = vld [vmem:[#allocation24_spill] sm:$0xff] }
 0x13c   :  { %3782 = vtanh.f32 %v550_v52  ;;  %v565_v58 = vmul.f32 0.0, %v562_v62  ;;  %v6455_v52 = vld [vmem:[#allocation31_spill] sm:$0xff]  ;;  %v6461_v62 = vld [vmem:[#allocation34_spill] sm:$0xff] }
 0x13d   :  { %3784 = vtanh.f32 %v554_v16  ;;  %v6452_v16 = vld [vmem:[#allocation18_spill] sm:$0xff] }
 0x149   :  { %v3783_v0 = vpop.eup %3782 }
 0x14a   :  { %v566_v43 = vmul.f32 %v3783_v0, %v561_v21  ;;  %v3785_v7 = vpop.eup %3784  ;;  %v6462_v21 = vld [vmem:[#allocation25_spill] sm:$0xff]  ;;  %v6463_v0 = vld [vmem:[#allocation35_spill] sm:$0xff] }
 0x14b   :  { %v560_v8 = vmul.f32 0.5, %v3785_v7  ;;  %v6466_v7 = vld [vmem:[#allocation27_spill] sm:$0xff] }
 0x14c   :  { %v4625_v56 = vadd.f32 %v566_v43, %v565_v58  ;;  %v6464_v58 = vld [vmem:[#allocation26_spill] sm:$0xff]  ;;  %v6465_v43 = vld [vmem:[#allocation36_spill] sm:$0xff] }
 0x14d   :  { %v563_v54 = vadd.f32 0.5, %v560_v8  ;;  %v6467_v8 = vld [vmem:[#allocation37_spill] sm:$0xff] }
 0x14e   :  { %3786 = vtanh.f32 %v4625_v56 }
 0x15b   :  { %v3787_v12 = vpop.eup %3786 }
 0x15c   :  { %v4628_v5 = vmul.f32 %v3787_v12, %v563_v54  ;;  %v6468_v54 = vld [vmem:[#allocation28_spill] sm:$0xff]  ;;  %v6469_v12 = vld [vmem:[#allocation38_spill] sm:$0xff] }
 0x15e   :  { %6451 = vst [vmem:[#allocation42_spill] sm:$0xff] %v4628_v5  ;;  %658 = vmatmul.mubr.f32.vlgmr.msra.gmra.mxu0 %v4628_v5  ;;  %729 = vmatmul.mubr.f32.vlgmr.msra.gmra.mxu1 %v4628_v5  ;;  %v6470_v5 = vld [vmem:[#allocation29_spill] sm:$0xff] }
 0x15f   :  { %777 = vmatpush1.msra.mxu0 %v4323_v10  ;;  %848 = vmatpush1.msra.mxu1 %v4402_v59 }
 0x160   :  { %778 = vmatprep.subr.mxu0 %v4325_v11  ;;  %849 = vmatprep.subr.mxu1 %v4407_v61 }
 0x161   :  { %779 = vmatpush1.msra.mxu0 %v4328_v13  ;;  %850 = vmatpush1.msra.mxu1 %v4414_v63 }
 0x162   :  { %780 = vmatprep.subr.mxu0 %v4331_v15  ;;  %851 = vmatprep.subr.mxu1 %v4422_v2 }
 0x163   :  { %781 = vmatpush1.msra.mxu0 %v4334_v17  ;;  %852 = vmatpush1.msra.mxu1 %v4428_v4 }
 0x164   :  { %782 = vmatprep.subr.mxu0 %v4336_v18  ;;  %853 = vmatprep.subr.mxu1 %v4435_v6 }
 0x165   :  { %783 = vmatpush1.msra.mxu0 %v4339_v20  ;;  %854 = vmatpush1.msra.mxu1 %v4441_v9 }
 0x166   :  { %784 = vmatprep.subr.mxu0 %v4342_v22  ;;  %855 = vmatprep.subr.mxu1 %v4449_v14 }
 0x167   :  { %785 = vmatpush1.msra.mxu0 %v4345_v24  ;;  %856 = vmatpush1.msra.mxu1 %v4455_v19 }
 0x168   :  { %786 = vmatprep.subr.mxu0 %v4348_v26  ;;  %857 = vmatprep.subr.mxu1 %v4462_v23 }
 0x169   :  { %787 = vmatpush1.msra.mxu0 %v4351_v28  ;;  %858 = vmatpush1.msra.mxu1 %v4468_v27 }
 0x16a   :  { %788 = vmatprep.subr.mxu0 %v4358_v33  ;;  %859 = vmatprep.subr.mxu1 %v4472_v29 }
 0x16b   :  { %789 = vmatpush1.msra.mxu0 %v6452_v16  ;;  %860 = vmatpush1.msra.mxu1 %v4476_v30 }
 0x16c   :  { %790 = vmatprep.subr.mxu0 %v4369_v40  ;;  %861 = vmatprep.subr.mxu1 %v4480_v31 }
 0x16d   :  { %791 = vmatpush1.msra.mxu0 %v4373_v42  ;;  %862 = vmatpush1.msra.mxu1 %v4483_v32 }
 0x16e   :  { %792 = vmatprep.subr.mxu0 %v4379_v46  ;;  %863 = vmatprep.subr.mxu1 %v4487_v34 }
 0x16f   :  { %793 = vmatpush1.msra.mxu0 %v4382_v48  ;;  %864 = vmatpush1.msra.mxu1 %v4491_v36 }
 0x170   :  { %794 = vmatprep.subr.mxu0 %v4386_v50  ;;  %865 = vmatprep.subr.mxu1 %v4495_v37 }
 0x171   :  { %795 = vmatpush1.msra.mxu0 %v4390_v53  ;;  %866 = vmatpush1.msra.mxu1 %v4499_v38 }
 0x172   :  { %796 = vmatprep.subr.mxu0 %v4393_v55  ;;  %867 = vmatprep.subr.mxu1 %v4503_v39 }
 0x173   :  { %797 = vmatpush1.msra.mxu0 %v4396_v57  ;;  %868 = vmatpush1.msra.mxu1 %v4507_v41 }
 0x174   :  { %798 = vmatprep.subr.mxu0 %v4404_v60  ;;  %869 = vmatprep.subr.mxu1 %v6453_v25 }
 0x175   :  { %799 = vmatpush1.msra.mxu0 %v6454_v49  ;;  %870 = vmatpush1.msra.mxu1 %v6455_v52 }
 0x176   :  { %800 = vmatprep.subr.mxu0 %v6456_v51  ;;  %871 = vmatprep.subr.mxu1 %v6457_v45 }
 0x177   :  { %801 = vmatpush1.msra.mxu0 %v6458_v35  ;;  %872 = vmatpush1.msra.mxu1 %v6459_v47  ;;  %v6476_v35 = vld [vmem:[#allocation41_spill] sm:$0xff] }
 0x178   :  { %802 = vmatprep.subr.mxu0 %v6460_v1  ;;  %873 = vmatprep.subr.mxu1 %v6461_v62  ;;  %v6471_v1 = vmov 0.0   ;;  %v6472_v62 = vld [vmem:[#allocation39_spill] sm:$0xff] }
 0x179   :  { %803 = vmatpush1.msra.mxu0 %v6462_v21  ;;  %874 = vmatpush1.msra.mxu1 %v6463_v0  ;;  %v6473_v0 = vld [vmem:[#allocation17_spill] sm:$0xff] }
 0x17a   :  { %804 = vmatprep.subr.mxu0 %v6464_v58  ;;  %875 = vmatprep.subr.mxu1 %v6465_v43  ;;  %v6474_v58 = vld [vmem:[#allocation19_spill] sm:$0xff] }
 0x17b   :  { %805 = vmatpush1.msra.mxu0 %v6466_v7  ;;  %876 = vmatpush1.msra.mxu1 %v6467_v8  ;;  %v571_v43 = vld [vmem:[#allocation2 + $0x1] ss:$8 sm:$0xf] }
 0x17c   :  { %806 = vmatprep.subr.mxu0 %v6468_v54  ;;  %877 = vmatprep.subr.mxu1 %v6469_v12  ;;  %v6475_v7 = vld [vmem:[#allocation40_spill] sm:$0xff]  ;;  %v580_v12 = vrot.slane %v571_v43, %v6476_v35 }
 0x17d   :  { %807 = vmatpush1.msra.mxu0 %v6470_v5  ;;  %840 = vmatprep.mubr.f32.mxu0 %v6471_v1  ;;  %v576_v21 = vrot.slane %v571_v43, %v6475_v7 }
 0x17e   :  { %878 = vmatpush1.msra.mxu1 %v6472_v62  ;;  %911 = vmatprep.mubr.f32.mxu1 %v6471_v1  ;;  %v588_v1 = vrot.slane %v571_v43, %v4617_v44 }
 0x17f   :  { %959 = vmatprep.subr.mxu0 %v6473_v0  ;;  %1030 = vmatprep.subr.mxu1 %v6474_v58  ;;  %v584_v58 = vrot.slane %v571_v43, %v4615_v3  ;;  %v754_v43 = vld [vmem:[#allocation2 + $0x2] ss:$8 sm:$0xf] }
 0x21e   :  { %v659_v8 = vpop.f32.mrf.mxu0  ;;  %v730_v47 = vpop.f32.mrf.mxu1 }
 0x21f   :  { %v660_v54 = vadd.f32 %v659_v8, %v576_v21  ;;  %v731_v49 = vadd.f32 %v730_v47, %v584_v58  ;;  %v6499_v58 = vld [vmem:[#allocation19_spill] sm:$0xff] }
 0x220   :  { %v661_v45 = vpop.f32.mrf.mxu0  ;;  %v732_v52 = vpop.f32.mrf.mxu1 }
 0x221   :  { %v735_v5 = vmul.f32 0.5, %v660_v54  ;;  %v662_v51 = vadd.f32 %v661_v45, %v580_v12  ;;  %v733_v0 = vadd.f32 %v732_v52, %v588_v1  ;;  %v737_v7 = vmul.f32 0.5, %v731_v49 }
 0x223   :  { %3788 = vtanh.f32 %v735_v5  ;;  %v736_v62 = vmul.f32 0.5, %v662_v51 }
 0x225   :  { %3790 = vtanh.f32 %v736_v62 }
 0x226   :  { %3792 = vtanh.f32 %v733_v0 }
 0x227   :  { %3794 = vtanh.f32 %v737_v7  ;;  %v6500_v7 = vld [vmem:[#allocation40_spill] sm:$0xff] }
 0x228   :  { %v759_v0 = vrot.slane %v754_v43, %v6500_v7 }
 0x230   :  { %v3789_v25 = vpop.eup %3788 }
 0x231   :  { %v741_v60 = vmul.f32 0.5, %v3789_v25  ;;  %v6497_v25 = vld [vmem:[#allocation39_spill] sm:$0xff] }
 0x232   :  { %v3791_v21 = vpop.eup %3790 }
 0x233   :  { %v744_v8 = vadd.f32 0.5, %v741_v60  ;;  %v742_v35 = vmul.f32 0.5, %v3791_v21  ;;  %v3793_v45 = vpop.eup %3792  ;;  %v6494_v60 = vld [vmem:[#allocation38_spill] sm:$0xff] }
 0x234   :  { %v3795_v52 = vpop.eup %3794 }
 0x235   :  { %v745_v54 = vadd.f32 0.5, %v742_v35  ;;  %v749_v51 = vmul.f32 %v3793_v45, %v744_v8  ;;  %v743_v1 = vmul.f32 0.5, %v3795_v52  ;;  %v4774_v35 = vld [vmem:[#allocation9 + $0x1e8] sm:$0xff]  ;;  %v6501_v45 = vld [vmem:[#allocation41_spill] sm:$0xff] }
 0x236   :  { %6498 = vst [vmem:[#allocation18_spill] sm:$0xff] %v4774_v35 }
 0x237   :  { %v748_v5 = vmul.f32 %v745_v54, %v4625_v56  ;;  %v746_v62 = vadd.f32 0.5, %v743_v1  ;;  %v6495_v56 = vld [vmem:[#allocation29_spill] sm:$0xff] }
 0x239   :  { %v4703_v12 = vadd.f32 %v749_v51, %v748_v5  ;;  %v763_v5 = vrot.slane %v754_v43, %v6501_v45 }
 0x23b   :  { %3796 = vtanh.f32 %v4703_v12 }
 0x248   :  { %v3797_v47 = vpop.eup %3796 }
 0x249   :  { %v4706_v49 = vmul.f32 %v3797_v47, %v746_v62 }
 0x24b   :  { %841 = vmatmul.mubr.f32.vlgmr.msra.gmra.mxu0 %v4706_v49  ;;  %912 = vmatmul.mubr.f32.vlgmr.msra.gmra.mxu1 %v4706_v49 }
 0x24c   :  { %960 = vmatpush1.msra.mxu0 %v4323_v10  ;;  %1031 = vmatpush1.msra.mxu1 %v4402_v59  ;;  %v6477_v10 = vld [vmem:[#allocation20_spill] sm:$0xff] }
 0x24d   :  { %961 = vmatprep.subr.mxu0 %v4325_v11  ;;  %1032 = vmatprep.subr.mxu1 %v4407_v61  ;;  %v6478_v11 = vld [vmem:[#allocation30_spill] sm:$0xff] }
 0x24e   :  { %962 = vmatpush1.msra.mxu0 %v4328_v13  ;;  %1033 = vmatpush1.msra.mxu1 %v4414_v63  ;;  %v6479_v13 = vld [vmem:[#allocation21_spill] sm:$0xff] }
 0x24f   :  { %963 = vmatprep.subr.mxu0 %v4331_v15  ;;  %1034 = vmatprep.subr.mxu1 %v4422_v2  ;;  %v6480_v15 = vld [vmem:[#allocation31_spill] sm:$0xff] }
 0x250   :  { %964 = vmatpush1.msra.mxu0 %v4334_v17  ;;  %1035 = vmatpush1.msra.mxu1 %v4428_v4  ;;  %v6481_v17 = vld [vmem:[#allocation22_spill] sm:$0xff] }
 0x251   :  { %965 = vmatprep.subr.mxu0 %v4336_v18  ;;  %1036 = vmatprep.subr.mxu1 %v4435_v6  ;;  %v6482_v18 = vld [vmem:[#allocation32_spill] sm:$0xff] }
 0x252   :  { %966 = vmatpush1.msra.mxu0 %v4339_v20  ;;  %1037 = vmatpush1.msra.mxu1 %v4441_v9  ;;  %v6483_v20 = vld [vmem:[#allocation23_spill] sm:$0xff] }
 0x253   :  { %967 = vmatprep.subr.mxu0 %v4342_v22  ;;  %1038 = vmatprep.subr.mxu1 %v4449_v14  ;;  %v6484_v22 = vld [vmem:[#allocation33_spill] sm:$0xff] }
 0x254   :  { %968 = vmatpush1.msra.mxu0 %v4345_v24  ;;  %1039 = vmatpush1.msra.mxu1 %v4455_v19  ;;  %v6485_v24 = vld [vmem:[#allocation24_spill] sm:$0xff] }
 0x255   :  { %969 = vmatprep.subr.mxu0 %v4348_v26  ;;  %1040 = vmatprep.subr.mxu1 %v4462_v23  ;;  %v6486_v26 = vld [vmem:[#allocation34_spill] sm:$0xff] }
 0x256   :  { %970 = vmatpush1.msra.mxu0 %v4351_v28  ;;  %1041 = vmatpush1.msra.mxu1 %v4468_v27  ;;  %v6487_v28 = vld [vmem:[#allocation25_spill] sm:$0xff] }
 0x257   :  { %971 = vmatprep.subr.mxu0 %v4358_v33  ;;  %1042 = vmatprep.subr.mxu1 %v4472_v29  ;;  %v6488_v33 = vld [vmem:[#allocation35_spill] sm:$0xff] }
 0x258   :  { %972 = vmatpush1.msra.mxu0 %v6452_v16  ;;  %1043 = vmatpush1.msra.mxu1 %v4476_v30  ;;  %v6496_v16 = vmov 0.0  }
 0x259   :  { %973 = vmatprep.subr.mxu0 %v4369_v40  ;;  %1044 = vmatprep.subr.mxu1 %v4480_v31  ;;  %v6489_v40 = vld [vmem:[#allocation26_spill] sm:$0xff] }
 0x25a   :  { %974 = vmatpush1.msra.mxu0 %v4373_v42  ;;  %1045 = vmatpush1.msra.mxu1 %v4483_v32  ;;  %v6490_v42 = vld [vmem:[#allocation36_spill] sm:$0xff] }
 0x25b   :  { %975 = vmatprep.subr.mxu0 %v4379_v46  ;;  %1046 = vmatprep.subr.mxu1 %v4487_v34  ;;  %v6491_v46 = vld [vmem:[#allocation27_spill] sm:$0xff] }
 0x25c   :  { %976 = vmatpush1.msra.mxu0 %v4382_v48  ;;  %1047 = vmatpush1.msra.mxu1 %v4491_v36  ;;  %v6492_v48 = vld [vmem:[#allocation37_spill] sm:$0xff] }
 0x25d   :  { %977 = vmatprep.subr.mxu0 %v4386_v50  ;;  %1048 = vmatprep.subr.mxu1 %v4495_v37  ;;  %v6493_v50 = vld [vmem:[#allocation28_spill] sm:$0xff] }
 0x25e   :  { %978 = vmatpush1.msra.mxu0 %v4390_v53  ;;  %1049 = vmatpush1.msra.mxu1 %v4499_v38 }
 0x25f   :  { %979 = vmatprep.subr.mxu0 %v4393_v55  ;;  %1050 = vmatprep.subr.mxu1 %v4503_v39 }
 0x260   :  { %980 = vmatpush1.msra.mxu0 %v4396_v57  ;;  %1051 = vmatpush1.msra.mxu1 %v4507_v41 }
 0x261   :  { %981 = vmatprep.subr.mxu0 %v6477_v10  ;;  %1052 = vmatprep.subr.mxu1 %v6478_v11 }
 0x262   :  { %982 = vmatpush1.msra.mxu0 %v6479_v13  ;;  %1053 = vmatpush1.msra.mxu1 %v6480_v15 }
 0x263   :  { %983 = vmatprep.subr.mxu0 %v6481_v17  ;;  %1054 = vmatprep.subr.mxu1 %v6482_v18 }
 0x264   :  { %984 = vmatpush1.msra.mxu0 %v6483_v20  ;;  %1055 = vmatpush1.msra.mxu1 %v6484_v22 }
 0x265   :  { %985 = vmatprep.subr.mxu0 %v6485_v24  ;;  %1056 = vmatprep.subr.mxu1 %v6486_v26 }
 0x266   :  { %986 = vmatpush1.msra.mxu0 %v6487_v28  ;;  %1057 = vmatpush1.msra.mxu1 %v6488_v33 }
 0x267   :  { %987 = vmatprep.subr.mxu0 %v6489_v40  ;;  %1058 = vmatprep.subr.mxu1 %v6490_v42 }
 0x268   :  { %988 = vmatpush1.msra.mxu0 %v6491_v46  ;;  %1059 = vmatpush1.msra.mxu1 %v6492_v48 }
 0x269   :  { %989 = vmatprep.subr.mxu0 %v6493_v50  ;;  %1060 = vmatprep.subr.mxu1 %v6494_v60 }
 0x26a   :  { %990 = vmatpush1.msra.mxu0 %v6495_v56  ;;  %1023 = vmatprep.mubr.f32.mxu0 %v6496_v16 }
 0x26b   :  { %1061 = vmatpush1.msra.mxu1 %v6497_v25  ;;  %1094 = vmatprep.mubr.f32.mxu1 %v6496_v16  ;;  %v771_v25 = vrot.slane %v754_v43, %v4617_v44 }
 0x26c   :  { %1142 = vmatprep.subr.mxu0 %v4774_v35  ;;  %1213 = vmatprep.subr.mxu1 %v6499_v58  ;;  %v767_v58 = vrot.slane %v754_v43, %v4615_v3 }
 0x30b   :  { %v842_v21 = vpop.f32.mrf.mxu0  ;;  %v913_v8 = vpop.f32.mrf.mxu1 }
 0x30c   :  { %v843_v54 = vadd.f32 %v842_v21, %v759_v0  ;;  %v914_v16 = vadd.f32 %v913_v8, %v767_v58  ;;  %v4804_v58 = vld [vmem:[#allocation9 + $0x1a8] sm:$0xff] }
 0x30d   :  { %v844_v51 = vpop.f32.mrf.mxu0  ;;  %v915_v62 = vpop.f32.mrf.mxu1 }
 0x30e   :  { %v918_v52 = vmul.f32 0.5, %v843_v54  ;;  %v845_v1 = vadd.f32 %v844_v51, %v763_v5  ;;  %v916_v35 = vadd.f32 %v915_v62, %v771_v25  ;;  %v920_v7 = vmul.f32 0.5, %v914_v16  ;;  %v4793_v62 = vld [vmem:[#allocation9 + $0x1c8] sm:$0xff] }
 0x30f   :  { %v1852_v16 = vrot.slane %v4706_v49, 7 }
 0x310   :  { %3798 = vtanh.f32 %v918_v52  ;;  %v919_v47 = vmul.f32 0.5, %v845_v1 }
 0x312   :  { %3800 = vtanh.f32 %v919_v47  ;;  %v4800_v47 = vld [vmem:[#allocation9 + $0x1c0] sm:$0xff] }
 0x313   :  { %3802 = vtanh.f32 %v916_v35 }
 0x314   :  { %3804 = vtanh.f32 %v920_v7  ;;  %v6502_v7 = vld [vmem:[#allocation42_spill] sm:$0xff] }
 0x31d   :  { %v3799_v56 = vpop.eup %3798 }
 0x31e   :  { %v924_v60 = vmul.f32 0.5, %v3799_v56 }
 0x31f   :  { %v3801_v0 = vpop.eup %3800 }
 0x320   :  { %v927_v21 = vadd.f32 0.5, %v924_v60  ;;  %v925_v45 = vmul.f32 0.5, %v3801_v0  ;;  %v3803_v5 = vpop.eup %3802  ;;  %v4816_v0 = vld [vmem:[#allocation9 + $0x180] sm:$0xff] }
 0x321   :  { %v3805_v25 = vpop.eup %3804 }
 0x322   :  { %v928_v54 = vadd.f32 0.5, %v925_v45  ;;  %v932_v52 = vmul.f32 %v3803_v5, %v927_v21  ;;  %v926_v43 = vmul.f32 0.5, %v3805_v25  ;;  %v4789_v45 = vld [vmem:[#allocation9 + $0x1e0] sm:$0xff] }
 0x324   :  { %v931_v51 = vmul.f32 %v928_v54, %v4703_v12  ;;  %v929_v35 = vadd.f32 0.5, %v926_v43  ;;  %v1873_v12 = vsel %vm1872_vm1, %v6502_v7, %v1852_v16  ;;  %v4905_v7 = vld [vmem:[#allocation9 + $0x1f0] sm:$0xff] }
 0x326   :  { %v4783_v1 = vadd.f32 %v932_v52, %v931_v51 }
 0x328   :  { %3806 = vtanh.f32 %v4783_v1 }
 0x335   :  { %v3807_v8 = vpop.eup %3806 }
 0x336   :  { %v935_v56 = vmul.f32 %v3807_v8, %v929_v35 }
 0x338   :  { %1024 = vmatmul.mubr.f32.vlgmr.msra.gmra.mxu0 %v935_v56  ;;  %v1855_v60 = vrot.slane %v935_v56, 6  ;;  %1095 = vmatmul.mubr.f32.vlgmr.msra.gmra.mxu1 %v935_v56 }
 0x339   :  { %1143 = vmatpush1.msra.mxu0 %v4789_v45  ;;  %1214 = vmatpush1.msra.mxu1 %v4402_v59  ;;  %v4808_v59 = vld [vmem:[#allocation9 + $0x1a0] sm:$0xff] }
 0x33a   :  { %1144 = vmatprep.subr.mxu0 %v4793_v62  ;;  %1215 = vmatprep.subr.mxu1 %v4407_v61  ;;  %v4798_v49 = vsel %vm1874_vm2, %v1873_v12, %v1855_v60  ;;  %v4812_v61 = vld [vmem:[#allocation9 + $0x188] sm:$0xff] }
 0x33b   :  { %1145 = vmatpush1.msra.mxu0 %v4800_v47  ;;  %1216 = vmatpush1.msra.mxu1 %v4414_v63  ;;  %v4820_v63 = vld [vmem:[#allocation9 + $0x168] sm:$0xff] }
 0x33c   :  { %1146 = vmatprep.subr.mxu0 %v4804_v58  ;;  %1217 = vmatprep.subr.mxu1 %v4422_v2  ;;  %v4824_v2 = vld [vmem:[#allocation9 + $0x160] sm:$0xff] }
 0x33d   :  { %1147 = vmatpush1.msra.mxu0 %v4808_v59  ;;  %1218 = vmatpush1.msra.mxu1 %v4428_v4  ;;  %v4828_v4 = vld [vmem:[#allocation9 + $0x148] sm:$0xff] }
 0x33e   :  { %1148 = vmatprep.subr.mxu0 %v4812_v61  ;;  %1219 = vmatprep.subr.mxu1 %v4435_v6  ;;  %v4832_v6 = vld [vmem:[#allocation9 + $0x140] sm:$0xff] }
 0x33f   :  { %1149 = vmatpush1.msra.mxu0 %v4816_v0  ;;  %1220 = vmatpush1.msra.mxu1 %v4441_v9  ;;  %v4836_v9 = vld [vmem:[#allocation9 + $0x128] sm:$0xff] }
 0x340   :  { %1150 = vmatprep.subr.mxu0 %v4820_v63  ;;  %1221 = vmatprep.subr.mxu1 %v4449_v14  ;;  %v4840_v14 = vld [vmem:[#allocation9 + $0x120] sm:$0xff] }
 0x341   :  { %1151 = vmatpush1.msra.mxu0 %v4824_v2  ;;  %1222 = vmatpush1.msra.mxu1 %v4455_v19  ;;  %v4844_v19 = vld [vmem:[#allocation9 + $0x108] sm:$0xff] }
 0x342   :  { %1152 = vmatprep.subr.mxu0 %v4828_v4  ;;  %1223 = vmatprep.subr.mxu1 %v4462_v23  ;;  %v4848_v23 = vld [vmem:[#allocation9 + $0x100] sm:$0xff] }
 0x343   :  { %1153 = vmatpush1.msra.mxu0 %v4832_v6  ;;  %1224 = vmatpush1.msra.mxu1 %v4468_v27  ;;  %v4852_v27 = vld [vmem:[#allocation9 + $0xe8] sm:$0xff] }
 0x344   :  { %1154 = vmatprep.subr.mxu0 %v4836_v9  ;;  %1225 = vmatprep.subr.mxu1 %v4472_v29  ;;  %v4856_v29 = vld [vmem:[#allocation9 + $0xe0] sm:$0xff] }
 0x345   :  { %1155 = vmatpush1.msra.mxu0 %v4840_v14  ;;  %1226 = vmatpush1.msra.mxu1 %v4476_v30  ;;  %v4860_v30 = vld [vmem:[#allocation9 + $0xc8] sm:$0xff] }
 0x346   :  { %1156 = vmatprep.subr.mxu0 %v4844_v19  ;;  %1227 = vmatprep.subr.mxu1 %v4480_v31  ;;  %v6506_v31 = vld [vmem:[#allocation39_spill] sm:$0xff] }
 0x347   :  { %1157 = vmatpush1.msra.mxu0 %v4848_v23  ;;  %1228 = vmatpush1.msra.mxu1 %v4483_v32  ;;  %v6507_v32 = vld [vmem:[#allocation18_spill] sm:$0xff] }
 0x348   :  { %1158 = vmatprep.subr.mxu0 %v4852_v27  ;;  %1229 = vmatprep.subr.mxu1 %v4487_v34  ;;  %v4893_v34 = vld [vmem:[#allocation9 + $0x1f8] sm:$0xff] }
 0x349   :  { %1159 = vmatpush1.msra.mxu0 %v4856_v29  ;;  %1230 = vmatpush1.msra.mxu1 %v4491_v36  ;;  %6508 = vst [vmem:[#allocation17_spill] sm:$0xff] %v4893_v34  ;;  %v937_v36 = vld [vmem:[#allocation2 + $0x3] ss:$8 sm:$0xf] }
 0x34a   :  { %1160 = vmatprep.subr.mxu0 %v4860_v30  ;;  %1231 = vmatprep.subr.mxu1 %v4495_v37  ;;  %v6509_v37 = vld [vmem:[#allocation40_spill] sm:$0xff] }
 0x34b   :  { %1161 = vmatpush1.msra.mxu0 %v4390_v53  ;;  %1232 = vmatpush1.msra.mxu1 %v4499_v38  ;;  %v6503_v53 = vld [vmem:[#allocation38_spill] sm:$0xff]  ;;  %v942_v38 = vrot.slane %v937_v36, %v6509_v37 }
 0x34c   :  { %1162 = vmatprep.subr.mxu0 %v4393_v55  ;;  %1233 = vmatprep.subr.mxu1 %v4503_v39  ;;  %v6504_v55 = vld [vmem:[#allocation29_spill] sm:$0xff] }
 0x34d   :  { %1163 = vmatpush1.msra.mxu0 %v4396_v57  ;;  %1234 = vmatpush1.msra.mxu1 %v4507_v41  ;;  %v6505_v57 = vmov 0.0  }
 0x34e   :  { %1164 = vmatprep.subr.mxu0 %v6477_v10  ;;  %1235 = vmatprep.subr.mxu1 %v6478_v11  ;;  %v6510_v11 = vld [vmem:[#allocation41_spill] sm:$0xff] }
 0x34f   :  { %1165 = vmatpush1.msra.mxu0 %v6479_v13  ;;  %1236 = vmatpush1.msra.mxu1 %v6480_v15  ;;  %v946_v13 = vrot.slane %v937_v36, %v6510_v11 }
 0x350   :  { %1166 = vmatprep.subr.mxu0 %v6481_v17  ;;  %1237 = vmatprep.subr.mxu1 %v6482_v18 }
 0x351   :  { %1167 = vmatpush1.msra.mxu0 %v6483_v20  ;;  %1238 = vmatpush1.msra.mxu1 %v6484_v22 }
 0x352   :  { %1168 = vmatprep.subr.mxu0 %v6485_v24  ;;  %1239 = vmatprep.subr.mxu1 %v6486_v26  ;;  %v954_v24 = vrot.slane %v937_v36, %v4617_v44 }
 0x353   :  { %1169 = vmatpush1.msra.mxu0 %v6487_v28  ;;  %1240 = vmatpush1.msra.mxu1 %v6488_v33  ;;  %v950_v28 = vrot.slane %v937_v36, %v4615_v3  ;;  %v4933_v36 = vld [vmem:[#allocation9 + $0x190] sm:$0xff] }
 0x354   :  { %1170 = vmatprep.subr.mxu0 %v6489_v40  ;;  %1241 = vmatprep.subr.mxu1 %v6490_v42 }
 0x355   :  { %1171 = vmatpush1.msra.mxu0 %v6491_v46  ;;  %1242 = vmatpush1.msra.mxu1 %v6492_v48 }
 0x356   :  { %1172 = vmatprep.subr.mxu0 %v6493_v50  ;;  %1243 = vmatprep.subr.mxu1 %v6503_v53  ;;  %v4917_v53 = vld [vmem:[#allocation9 + $0x1d0] sm:$0xff] }
 0x357   :  { %1173 = vmatpush1.msra.mxu0 %v6504_v55  ;;  %1206 = vmatprep.mubr.f32.mxu0 %v6505_v57  ;;  %v4921_v55 = vld [vmem:[#allocation9 + $0x1b8] sm:$0xff] }
 0x358   :  { %1244 = vmatpush1.msra.mxu1 %v6506_v31  ;;  %1277 = vmatprep.mubr.f32.mxu1 %v6505_v57  ;;  %v4925_v31 = vld [vmem:[#allocation9 + $0x1b0] sm:$0xff] }
 0x359   :  { %1325 = vmatprep.subr.mxu0 %v6507_v32  ;;  %1396 = vmatprep.subr.mxu1 %v4893_v34 }
 0x3f8   :  { %v1025_v39 = vpop.f32.mrf.mxu0  ;;  %v1096_v41 = vpop.f32.mrf.mxu1 }
 0x3f9   :  { %v1026_v10 = vadd.f32 %v1025_v39, %v942_v38  ;;  %v1097_v33 = vadd.f32 %v1096_v41, %v950_v28  ;;  %v4937_v38 = vld [vmem:[#allocation9 + $0x178] sm:$0xff]  ;;  %v4941_v39 = vld [vmem:[#allocation9 + $0x170] sm:$0xff] }
 0x3fa   :  { %v1027_v15 = vpop.f32.mrf.mxu0  ;;  %v1098_v20 = vpop.f32.mrf.mxu1  ;;  %v4945_v41 = vld [vmem:[#allocation9 + $0x158] sm:$0xff]  ;;  %v4983_v28 = vld [vmem:[#allocation9 + $0xd0] sm:$0xff] }
 0x3fb   :  { %v1101_v17 = vmul.f32 0.5, %v1026_v10  ;;  %v1028_v18 = vadd.f32 %v1027_v15, %v946_v13  ;;  %v1099_v26 = vadd.f32 %v1098_v20, %v954_v24  ;;  %v1103_v40 = vmul.f32 0.5, %v1097_v33  ;;  %v4949_v10 = vld [vmem:[#allocation9 + $0x150] sm:$0xff]  ;;  %v4953_v13 = vld [vmem:[#allocation9 + $0x138] sm:$0xff]  ;;  %v4986_v33 = vld [vmem:[#allocation9 + $0xa8] sm:$0xff] }
 0x3fc   :  { %v4957_v15 = vld [vmem:[#allocation9 + $0x130] sm:$0xff]  ;;  %v4969_v20 = vld [vmem:[#allocation9 + $0xf8] sm:$0xff] }
 0x3fd   :  { %3808 = vtanh.f32 %v1101_v17  ;;  %v1102_v22 = vmul.f32 0.5, %v1028_v18  ;;  %v4961_v17 = vld [vmem:[#allocation9 + $0x118] sm:$0xff]  ;;  %v4965_v18 = vld [vmem:[#allocation9 + $0x110] sm:$0xff] }
 0x3fe   :  { %v4977_v24 = vld [vmem:[#allocation9 + $0xd8] sm:$0xff] }
 0x3ff   :  { %3810 = vtanh.f32 %v1102_v22  ;;  %v4973_v22 = vld [vmem:[#allocation9 + $0xf0] sm:$0xff] }
 0x400   :  { %3812 = vtanh.f32 %v1099_v26  ;;  %v4980_v26 = vld [vmem:[#allocation9 + $0xc0] sm:$0xff] }
 0x401   :  { %3814 = vtanh.f32 %v1103_v40  ;;  %v4989_v40 = vld [vmem:[#allocation9 + $0xb8] sm:$0xff] }
 0x40a   :  { %v3809_v42 = vpop.eup %3808 }
 0x40b   :  { %v1107_v46 = vmul.f32 0.5, %v3809_v42  ;;  %v4992_v42 = vld [vmem:[#allocation9 + $0xa0] sm:$0xff] }
 0x40c   :  { %v3811_v48 = vpop.eup %3810 }
 0x40d   :  { %v1110_v50 = vadd.f32 0.5, %v1107_v46  ;;  %v1108_v21 = vmul.f32 0.5, %v3811_v48  ;;  %v3813_v5 = vpop.eup %3812  ;;  %v4995_v46 = vld [vmem:[#allocation9 + $0xb0] sm:$0xff]  ;;  %v4998_v48 = vld [vmem:[#allocation9 + $0x88] sm:$0xff] }
 0x40e   :  { %v3815_v43 = vpop.eup %3814  ;;  %6511 = vst [vmem:[#allocation20_spill] sm:$0xff] %v4995_v46  ;;  %6512 = vst [vmem:[#allocation30_spill] sm:$0xff] %v4998_v48 }
 0x40f   :  { %v1111_v54 = vadd.f32 0.5, %v1108_v21  ;;  %v1115_v52 = vmul.f32 %v3813_v5, %v1110_v50  ;;  %v1109_v35 = vmul.f32 0.5, %v3815_v43  ;;  %v5001_v50 = vld [vmem:[#allocation9 + $0x98] sm:$0xff]  ;;  %v5004_v21 = vld [vmem:[#allocation9 + $0x80] sm:$0xff]  ;;  %v5010_v5 = vld [vmem:[#allocation9 + $0x68] sm:$0xff] }
 0x410   :  { %6513 = vst [vmem:[#allocation21_spill] sm:$0xff] %v5001_v50  ;;  %6514 = vst [vmem:[#allocation31_spill] sm:$0xff] %v5004_v21  ;;  %v5019_v43 = vld [vmem:[#allocation9 + $0x70] sm:$0xff] }
 0x411   :  { %v1114_v51 = vmul.f32 %v1111_v54, %v4783_v1  ;;  %v1112_v8 = vadd.f32 0.5, %v1109_v35  ;;  %v4909_v1 = vld [vmem:[#allocation9 + $0x1d8] sm:$0xff]  ;;  %v5007_v54 = vld [vmem:[#allocation9 + $0x90] sm:$0xff]  ;;  %6516 = vst [vmem:[#allocation32_spill] sm:$0xff] %v5010_v5  ;;  %6519 = vst [vmem:[#allocation24_spill] sm:$0xff] %v5019_v43 }
 0x412   :  { %6515 = vst [vmem:[#allocation22_spill] sm:$0xff] %v5007_v54  ;;  %v5022_v35 = vld [vmem:[#allocation9 + $0x48] sm:$0xff] }
 0x413   :  { %v4901_v25 = vadd.f32 %v1115_v52, %v1114_v51  ;;  %v5013_v51 = vld [vmem:[#allocation9 + $0x78] sm:$0xff]  ;;  %v5016_v52 = vld [vmem:[#allocation9 + $0x60] sm:$0xff]  ;;  %6520 = vst [vmem:[#allocation34_spill] sm:$0xff] %v5022_v35 }
 0x414   :  { %6517 = vst [vmem:[#allocation23_spill] sm:$0xff] %v5013_v51  ;;  %6518 = vst [vmem:[#allocation33_spill] sm:$0xff] %v5016_v52 }
 0x415   :  { %3816 = vtanh.f32 %v4901_v25 }
 0x422   :  { %v3817_v16 = vpop.eup %3816 }
 0x423   :  { %v1118_v56 = vmul.f32 %v3817_v16, %v1112_v8  ;;  %v5025_v8 = vld [vmem:[#allocation9 + $0x58] sm:$0xff]  ;;  %v5028_v16 = vld [vmem:[#allocation9 + $0x40] sm:$0xff] }
 0x424   :  { %6521 = vst [vmem:[#allocation25_spill] sm:$0xff] %v5025_v8  ;;  %6522 = vst [vmem:[#allocation35_spill] sm:$0xff] %v5028_v16 }
 0x425   :  { %1207 = vmatmul.mubr.f32.vlgmr.msra.gmra.mxu0 %v1118_v56  ;;  %v1858_v60 = vrot.slane %v1118_v56, 5  ;;  %1278 = vmatmul.mubr.f32.vlgmr.msra.gmra.mxu1 %v1118_v56  ;;  %v5031_v56 = vld [vmem:[#allocation9 + $0x50] sm:$0xff] }
 0x426   :  { %1326 = vmatpush1.msra.mxu0 %v4789_v45  ;;  %1397 = vmatpush1.msra.mxu1 %v4905_v7  ;;  %6523 = vst [vmem:[#allocation26_spill] sm:$0xff] %v5031_v56 }
 0x427   :  { %1327 = vmatprep.subr.mxu0 %v4793_v62  ;;  %1398 = vmatprep.subr.mxu1 %v4909_v1  ;;  %v4914_v12 = vsel %vm1876_vm3, %v4798_v49, %v1858_v60  ;;  %v4929_v49 = vld [vmem:[#allocation9 + $0x198] sm:$0xff]  ;;  %v5034_v60 = vld [vmem:[#allocation9 + $0x28] sm:$0xff] }
 0x428   :  { %1328 = vmatpush1.msra.mxu0 %v4800_v47  ;;  %1399 = vmatpush1.msra.mxu1 %v4917_v53  ;;  %6524 = vst [vmem:[#allocation36_spill] sm:$0xff] %v5034_v60 }
 0x429   :  { %1329 = vmatprep.subr.mxu0 %v4804_v58  ;;  %1400 = vmatprep.subr.mxu1 %v4921_v55 }
 0x42a   :  { %1330 = vmatpush1.msra.mxu0 %v4808_v59  ;;  %1401 = vmatpush1.msra.mxu1 %v4925_v31 }
 0x42b   :  { %1331 = vmatprep.subr.mxu0 %v4812_v61  ;;  %1402 = vmatprep.subr.mxu1 %v4929_v49 }
 0x42c   :  { %1332 = vmatpush1.msra.mxu0 %v4816_v0  ;;  %1403 = vmatpush1.msra.mxu1 %v4933_v36 }
 0x42d   :  { %1333 = vmatprep.subr.mxu0 %v4820_v63  ;;  %1404 = vmatprep.subr.mxu1 %v4937_v38 }
 0x42e   :  { %1334 = vmatpush1.msra.mxu0 %v4824_v2  ;;  %1405 = vmatpush1.msra.mxu1 %v4941_v39 }
 0x42f   :  { %1335 = vmatprep.subr.mxu0 %v4828_v4  ;;  %1406 = vmatprep.subr.mxu1 %v4945_v41 }
 0x430   :  { %1336 = vmatpush1.msra.mxu0 %v4832_v6  ;;  %1407 = vmatpush1.msra.mxu1 %v4949_v10 }
 0x431   :  { %1337 = vmatprep.subr.mxu0 %v4836_v9  ;;  %1408 = vmatprep.subr.mxu1 %v4953_v13 }
 0x432   :  { %1338 = vmatpush1.msra.mxu0 %v4840_v14  ;;  %1409 = vmatpush1.msra.mxu1 %v4957_v15 }
 0x433   :  { %1339 = vmatprep.subr.mxu0 %v4844_v19  ;;  %1410 = vmatprep.subr.mxu1 %v4961_v17 }
 0x434   :  { %1340 = vmatpush1.msra.mxu0 %v4848_v23  ;;  %1411 = vmatpush1.msra.mxu1 %v4965_v18 }
 0x435   :  { %1341 = vmatprep.subr.mxu0 %v4852_v27  ;;  %1412 = vmatprep.subr.mxu1 %v4969_v20 }
 0x436   :  { %1342 = vmatpush1.msra.mxu0 %v4856_v29  ;;  %1413 = vmatpush1.msra.mxu1 %v4973_v22 }
 0x437   :  { %1343 = vmatprep.subr.mxu0 %v4860_v30  ;;  %1414 = vmatprep.subr.mxu1 %v4977_v24 }
 0x438   :  { %1344 = vmatpush1.msra.mxu0 %v4980_v26  ;;  %1415 = vmatpush1.msra.mxu1 %v4983_v28 }
 0x439   :  { %1345 = vmatprep.subr.mxu0 %v4986_v33  ;;  %1416 = vmatprep.subr.mxu1 %v4989_v40 }
 0x43a   :  { %1346 = vmatpush1.msra.mxu0 %v4992_v42  ;;  %1417 = vmatpush1.msra.mxu1 %v4995_v46 }
 0x43b   :  { %1347 = vmatprep.subr.mxu0 %v4998_v48  ;;  %1418 = vmatprep.subr.mxu1 %v5001_v50 }
 0x43c   :  { %1348 = vmatpush1.msra.mxu0 %v5004_v21  ;;  %1419 = vmatpush1.msra.mxu1 %v5007_v54 }
 0x43d   :  { %1349 = vmatprep.subr.mxu0 %v5010_v5  ;;  %1420 = vmatprep.subr.mxu1 %v5013_v51 }
 0x43e   :  { %1350 = vmatpush1.msra.mxu0 %v5016_v52  ;;  %1421 = vmatpush1.msra.mxu1 %v5019_v43  ;;  %v5037_v43 = vld [vmem:[#allocation9 + $0x38] sm:$0xff] }
 0x43f   :  { %1351 = vmatprep.subr.mxu0 %v5022_v35  ;;  %1422 = vmatprep.subr.mxu1 %v5025_v8  ;;  %6525 = vst [vmem:[#allocation27_spill] sm:$0xff] %v5037_v43  ;;  %v5040_v35 = vld [vmem:[#allocation9 + $0x20] sm:$0xff]  ;;  %v5043_v8 = vld [vmem:[#allocation9 + $0x30] sm:$0xff] }
 0x440   :  { %1352 = vmatpush1.msra.mxu0 %v5028_v16  ;;  %1423 = vmatpush1.msra.mxu1 %v5031_v56  ;;  %6526 = vst [vmem:[#allocation37_spill] sm:$0xff] %v5040_v35  ;;  %6527 = vst [vmem:[#allocation28_spill] sm:$0xff] %v5043_v8  ;;  %v5046_v16 = vld [vmem:[#allocation9 + $0x8] sm:$0xff]  ;;  %v5049_v56 = vld [vmem:[#allocation9 + $0x18] sm:$0xff] }
 0x441   :  { %1353 = vmatprep.subr.mxu0 %v5034_v60  ;;  %1424 = vmatprep.subr.mxu1 %v5037_v43  ;;  %6528 = vst [vmem:[#allocation19_spill] sm:$0xff] %v5046_v16  ;;  %6529 = vst [vmem:[#allocation42_spill] sm:$0xff] %v5049_v56  ;;  %v5052_v60 = vld [vmem:[#allocation9] sm:$0xff]  ;;  %v5056_v43 = vld [vmem:[#allocation9 + $0x10] sm:$0xff] }
 0x442   :  { %1354 = vmatpush1.msra.mxu0 %v5040_v35  ;;  %1425 = vmatpush1.msra.mxu1 %v5043_v8  ;;  %6530 = vst [vmem:[#allocation38_spill] sm:$0xff] %v5052_v60  ;;  %6531 = vst [vmem:[#allocation29_spill] sm:$0xff] %v5056_v43 }
 0x443   :  { %1355 = vmatprep.subr.mxu0 %v5046_v16  ;;  %1426 = vmatprep.subr.mxu1 %v5049_v56  ;;  %v1120_v16 = vld [vmem:[#allocation2 + $0x4] ss:$8 sm:$0xf] }
 0x444   :  { %1356 = vmatpush1.msra.mxu0 %v5052_v60  ;;  %1389 = vmatprep.mubr.f32.mxu0 %v6505_v57  ;;  %v1125_v8 = vrot.slane %v1120_v16, %v6509_v37  ;;  %v1129_v60 = vrot.slane %v1120_v16, %v6510_v11 }
 0x445   :  { %1427 = vmatpush1.msra.mxu1 %v5056_v43  ;;  %1460 = vmatprep.mubr.f32.mxu1 %v6505_v57  ;;  %v1137_v57 = vrot.slane %v1120_v16, %v4617_v44 }
 0x446   :  { %1508 = vmatprep.subr.mxu0 %v6507_v32  ;;  %1579 = vmatprep.subr.mxu1 %v4893_v34  ;;  %v1133_v34 = vrot.slane %v1120_v16, %v4615_v3  ;;  %v6538_v16 = vld [vmem:[#allocation23_spill] sm:$0xff] }
 0x4e5   :  { %v1208_v56 = vpop.f32.mrf.mxu0  ;;  %v1279_v35 = vpop.f32.mrf.mxu1 }
 0x4e6   :  { %v1209_v52 = vadd.f32 %v1208_v56, %v1125_v8  ;;  %v1280_v50 = vadd.f32 %v1279_v35, %v1133_v34  ;;  %v6537_v35 = vld [vmem:[#allocation32_spill] sm:$0xff] }
 0x4e7   :  { %v1210_v51 = vpop.f32.mrf.mxu0  ;;  %v1281_v21 = vpop.f32.mrf.mxu1 }
 0x4e8   :  { %v1284_v5 = vmul.f32 0.5, %v1209_v52  ;;  %v1211_v54 = vadd.f32 %v1210_v51, %v1129_v60  ;;  %v1282_v32 = vadd.f32 %v1281_v21, %v1137_v57  ;;  %v1286_v37 = vmul.f32 0.5, %v1280_v50 }
 0x4ea   :  { %3818 = vtanh.f32 %v1284_v5  ;;  %v1285_v43 = vmul.f32 0.5, %v1211_v54 }
 0x4ec   :  { %3820 = vtanh.f32 %v1285_v43  ;;  %v6536_v43 = vld [vmem:[#allocation22_spill] sm:$0xff] }
 0x4ed   :  { %3822 = vtanh.f32 %v1282_v32 }
 0x4ee   :  { %3824 = vtanh.f32 %v1286_v37 }
 0x4f7   :  { %v3819_v48 = vpop.eup %3818 }
 0x4f8   :  { %v1290_v46 = vmul.f32 0.5, %v3819_v48 }
 0x4f9   :  { %v3821_v8 = vpop.eup %3820 }
 0x4fa   :  { %v1293_v56 = vadd.f32 0.5, %v1290_v46  ;;  %v1291_v11 = vmul.f32 0.5, %v3821_v8  ;;  %v3823_v51 = vpop.eup %3822  ;;  %v6535_v46 = vld [vmem:[#allocation31_spill] sm:$0xff]  ;;  %v6539_v8 = vld [vmem:[#allocation33_spill] sm:$0xff] }
 0x4fb   :  { %v3825_v57 = vpop.eup %3824 }
 0x4fc   :  { %v1294_v52 = vadd.f32 0.5, %v1291_v11  ;;  %v1298_v54 = vmul.f32 %v3823_v51, %v1293_v56  ;;  %v1292_v21 = vmul.f32 0.5, %v3825_v57  ;;  %v6532_v11 = vld [vmem:[#allocation20_spill] sm:$0xff]  ;;  %v6542_v51 = vld [vmem:[#allocation25_spill] sm:$0xff] }
 0x4fd   :  { %v6540_v56 = vld [vmem:[#allocation24_spill] sm:$0xff] }
 0x4fe   :  { %v1297_v5 = vmul.f32 %v1294_v52, %v4901_v25  ;;  %v1295_v32 = vadd.f32 0.5, %v1292_v21  ;;  %v6533_v25 = vld [vmem:[#allocation30_spill] sm:$0xff]  ;;  %v6545_v57 = vld [vmem:[#allocation36_spill] sm:$0xff]  ;;  %v6546_v21 = vld [vmem:[#allocation27_spill] sm:$0xff] }
 0x4ff   :  { %v6541_v52 = vld [vmem:[#allocation34_spill] sm:$0xff] }
 0x500   :  { %v5067_v60 = vadd.f32 %v1298_v54, %v1297_v5  ;;  %v6543_v5 = vld [vmem:[#allocation35_spill] sm:$0xff]  ;;  %v6544_v54 = vld [vmem:[#allocation26_spill] sm:$0xff] }
 0x502   :  { %3826 = vtanh.f32 %v5067_v60 }
 0x50f   :  { %v3827_v34 = vpop.eup %3826 }
 0x510   :  { %v1301_v50 = vmul.f32 %v3827_v34, %v1295_v32  ;;  %v6547_v32 = vld [vmem:[#allocation37_spill] sm:$0xff]  ;;  %v6548_v34 = vld [vmem:[#allocation28_spill] sm:$0xff] }
 0x512   :  { %1390 = vmatmul.mubr.f32.vlgmr.msra.gmra.mxu0 %v1301_v50  ;;  %v1861_v48 = vrot.slane %v1301_v50, 4  ;;  %1461 = vmatmul.mubr.f32.vlgmr.msra.gmra.mxu1 %v1301_v50  ;;  %v6549_v50 = vld [vmem:[#allocation19_spill] sm:$0xff] }
 0x513   :  { %1509 = vmatpush1.msra.mxu0 %v4789_v45  ;;  %1580 = vmatpush1.msra.mxu1 %v4905_v7 }
 0x514   :  { %1510 = vmatprep.subr.mxu0 %v4793_v62  ;;  %1581 = vmatprep.subr.mxu1 %v4909_v1  ;;  %v5076_v37 = vsel %vm1878_vm4, %v4914_v12, %v1861_v48  ;;  %v6534_v12 = vld [vmem:[#allocation21_spill] sm:$0xff]  ;;  %v6550_v48 = vld [vmem:[#allocation42_spill] sm:$0xff] }
 0x515   :  { %1511 = vmatpush1.msra.mxu0 %v4800_v47  ;;  %1582 = vmatpush1.msra.mxu1 %v4917_v53 }
 0x516   :  { %1512 = vmatprep.subr.mxu0 %v4804_v58  ;;  %1583 = vmatprep.subr.mxu1 %v4921_v55 }
 0x517   :  { %1513 = vmatpush1.msra.mxu0 %v4808_v59  ;;  %1584 = vmatpush1.msra.mxu1 %v4925_v31 }
 0x518   :  { %1514 = vmatprep.subr.mxu0 %v4812_v61  ;;  %1585 = vmatprep.subr.mxu1 %v4929_v49 }
 0x519   :  { %1515 = vmatpush1.msra.mxu0 %v4816_v0  ;;  %1586 = vmatpush1.msra.mxu1 %v4933_v36 }
 0x51a   :  { %1516 = vmatprep.subr.mxu0 %v4820_v63  ;;  %1587 = vmatprep.subr.mxu1 %v4937_v38 }
 0x51b   :  { %1517 = vmatpush1.msra.mxu0 %v4824_v2  ;;  %1588 = vmatpush1.msra.mxu1 %v4941_v39 }
 0x51c   :  { %1518 = vmatprep.subr.mxu0 %v4828_v4  ;;  %1589 = vmatprep.subr.mxu1 %v4945_v41 }
 0x51d   :  { %1519 = vmatpush1.msra.mxu0 %v4832_v6  ;;  %1590 = vmatpush1.msra.mxu1 %v4949_v10 }
 0x51e   :  { %1520 = vmatprep.subr.mxu0 %v4836_v9  ;;  %1591 = vmatprep.subr.mxu1 %v4953_v13 }
 0x51f   :  { %1521 = vmatpush1.msra.mxu0 %v4840_v14  ;;  %1592 = vmatpush1.msra.mxu1 %v4957_v15 }
 0x520   :  { %1522 = vmatprep.subr.mxu0 %v4844_v19  ;;  %1593 = vmatprep.subr.mxu1 %v4961_v17 }
 0x521   :  { %1523 = vmatpush1.msra.mxu0 %v4848_v23  ;;  %1594 = vmatpush1.msra.mxu1 %v4965_v18 }
 0x522   :  { %1524 = vmatprep.subr.mxu0 %v4852_v27  ;;  %1595 = vmatprep.subr.mxu1 %v4969_v20 }
 0x523   :  { %1525 = vmatpush1.msra.mxu0 %v4856_v29  ;;  %1596 = vmatpush1.msra.mxu1 %v4973_v22 }
 0x524   :  { %1526 = vmatprep.subr.mxu0 %v4860_v30  ;;  %1597 = vmatprep.subr.mxu1 %v4977_v24 }
 0x525   :  { %1527 = vmatpush1.msra.mxu0 %v4980_v26  ;;  %1598 = vmatpush1.msra.mxu1 %v4983_v28 }
 0x526   :  { %1528 = vmatprep.subr.mxu0 %v4986_v33  ;;  %1599 = vmatprep.subr.mxu1 %v4989_v40 }
 0x527   :  { %1529 = vmatpush1.msra.mxu0 %v4992_v42  ;;  %1600 = vmatpush1.msra.mxu1 %v6532_v11 }
 0x528   :  { %1530 = vmatprep.subr.mxu0 %v6533_v25  ;;  %1601 = vmatprep.subr.mxu1 %v6534_v12 }
 0x529   :  { %1531 = vmatpush1.msra.mxu0 %v6535_v46  ;;  %1602 = vmatpush1.msra.mxu1 %v6536_v43 }
 0x52a   :  { %1532 = vmatprep.subr.mxu0 %v6537_v35  ;;  %1603 = vmatprep.subr.mxu1 %v6538_v16  ;;  %v6557_v16 = vld [vmem:[#allocation41_spill] sm:$0xff] }
 0x52b   :  { %1533 = vmatpush1.msra.mxu0 %v6539_v8  ;;  %1604 = vmatpush1.msra.mxu1 %v6540_v56  ;;  %v6551_v56 = vld [vmem:[#allocation38_spill] sm:$0xff] }
 0x52c   :  { %1534 = vmatprep.subr.mxu0 %v6541_v52  ;;  %1605 = vmatprep.subr.mxu1 %v6542_v51  ;;  %v6552_v52 = vmov 0.0   ;;  %v6553_v51 = vld [vmem:[#allocation29_spill] sm:$0xff] }
 0x52d   :  { %1535 = vmatpush1.msra.mxu0 %v6543_v5  ;;  %1606 = vmatpush1.msra.mxu1 %v6544_v54  ;;  %v6554_v54 = vld [vmem:[#allocation18_spill] sm:$0xff] }
 0x52e   :  { %1536 = vmatprep.subr.mxu0 %v6545_v57  ;;  %1607 = vmatprep.subr.mxu1 %v6546_v21  ;;  %v6555_v57 = vld [vmem:[#allocation17_spill] sm:$0xff] }
 0x52f   :  { %1537 = vmatpush1.msra.mxu0 %v6547_v32  ;;  %1608 = vmatpush1.msra.mxu1 %v6548_v34  ;;  %v1303_v21 = vld [vmem:[#allocation2 + $0x5] ss:$8 sm:$0xf] }
 0x530   :  { %1538 = vmatprep.subr.mxu0 %v6549_v50  ;;  %1609 = vmatprep.subr.mxu1 %v6550_v48  ;;  %v6556_v32 = vld [vmem:[#allocation40_spill] sm:$0xff]  ;;  %v1312_v48 = vrot.slane %v1303_v21, %v6557_v16 }
 0x531   :  { %1539 = vmatpush1.msra.mxu0 %v6551_v56  ;;  %1572 = vmatprep.mubr.f32.mxu0 %v6552_v52  ;;  %v1308_v5 = vrot.slane %v1303_v21, %v6556_v32 }
 0x532   :  { %1610 = vmatpush1.msra.mxu1 %v6553_v51  ;;  %1643 = vmatprep.mubr.f32.mxu1 %v6552_v52  ;;  %v1320_v52 = vrot.slane %v1303_v21, %v4617_v44 }
 0x533   :  { %1691 = vmatprep.subr.mxu0 %v6554_v54  ;;  %1762 = vmatprep.subr.mxu1 %v6555_v57  ;;  %v1316_v57 = vrot.slane %v1303_v21, %v4615_v3  ;;  %v6563_v21 = vld [vmem:[#allocation32_spill] sm:$0xff] }
 0x5d2   :  { %v1391_v34 = vpop.f32.mrf.mxu0  ;;  %v1462_v8 = vpop.f32.mrf.mxu1 }
 0x5d3   :  { %v1392_v50 = vadd.f32 %v1391_v34, %v1308_v5  ;;  %v1463_v12 = vadd.f32 %v1462_v8, %v1316_v57  ;;  %v6562_v57 = vld [vmem:[#allocation22_spill] sm:$0xff] }
 0x5d4   :  { %v1393_v35 = vpop.f32.mrf.mxu0  ;;  %v1464_v46 = vpop.f32.mrf.mxu1 }
 0x5d5   :  { %v1467_v56 = vmul.f32 0.5, %v1392_v50  ;;  %v1394_v43 = vadd.f32 %v1393_v35, %v1312_v48  ;;  %v1465_v54 = vadd.f32 %v1464_v46, %v1320_v52  ;;  %v1469_v32 = vmul.f32 0.5, %v1463_v12 }
 0x5d7   :  { %3828 = vtanh.f32 %v1467_v56  ;;  %v1468_v51 = vmul.f32 0.5, %v1394_v43 }
 0x5d9   :  { %3830 = vtanh.f32 %v1468_v51 }
 0x5da   :  { %3832 = vtanh.f32 %v1465_v54  ;;  %v6561_v54 = vld [vmem:[#allocation31_spill] sm:$0xff] }
 0x5db   :  { %3834 = vtanh.f32 %v1469_v32  ;;  %v6564_v32 = vld [vmem:[#allocation23_spill] sm:$0xff] }
 0x5e4   :  { %v3829_v25 = vpop.eup %3828 }
 0x5e5   :  { %v1473_v11 = vmul.f32 0.5, %v3829_v25 }
 0x5e6   :  { %v3831_v5 = vpop.eup %3830 }
 0x5e7   :  { %v1476_v34 = vadd.f32 0.5, %v1473_v11  ;;  %v1474_v16 = vmul.f32 0.5, %v3831_v5  ;;  %v3833_v35 = vpop.eup %3832  ;;  %v6559_v11 = vld [vmem:[#allocation30_spill] sm:$0xff]  ;;  %v6565_v5 = vld [vmem:[#allocation33_spill] sm:$0xff] }
 0x5e8   :  { %v3835_v46 = vpop.eup %3834 }
 0x5e9   :  { %v1477_v50 = vadd.f32 0.5, %v1474_v16  ;;  %v1481_v43 = vmul.f32 %v3833_v35, %v1476_v34  ;;  %v1475_v52 = vmul.f32 0.5, %v3835_v46  ;;  %v6560_v16 = vld [vmem:[#allocation21_spill] sm:$0xff]  ;;  %v6566_v34 = vld [vmem:[#allocation24_spill] sm:$0xff] }
 0x5ea   :  { %v6568_v35 = vld [vmem:[#allocation25_spill] sm:$0xff]  ;;  %v6571_v46 = vld [vmem:[#allocation36_spill] sm:$0xff] }
 0x5eb   :  { %v1480_v56 = vmul.f32 %v1477_v50, %v5067_v60  ;;  %v1478_v51 = vadd.f32 0.5, %v1475_v52  ;;  %v6567_v50 = vld [vmem:[#allocation34_spill] sm:$0xff]  ;;  %v6572_v52 = vld [vmem:[#allocation27_spill] sm:$0xff] }
 0x5ed   :  { %v5145_v48 = vadd.f32 %v1481_v43, %v1480_v56  ;;  %v6569_v56 = vld [vmem:[#allocation35_spill] sm:$0xff]  ;;  %v6570_v43 = vld [vmem:[#allocation26_spill] sm:$0xff] }
 0x5ef   :  { %3836 = vtanh.f32 %v5145_v48 }
 0x5fc   :  { %v3837_v8 = vpop.eup %3836 }
 0x5fd   :  { %v1484_v12 = vmul.f32 %v3837_v8, %v1478_v51  ;;  %v6573_v51 = vld [vmem:[#allocation37_spill] sm:$0xff]  ;;  %v6574_v8 = vld [vmem:[#allocation28_spill] sm:$0xff] }
 0x5ff   :  { %1573 = vmatmul.mubr.f32.vlgmr.msra.gmra.mxu0 %v1484_v12  ;;  %v1864_v25 = vrot.slane %v1484_v12, 3  ;;  %1644 = vmatmul.mubr.f32.vlgmr.msra.gmra.mxu1 %v1484_v12  ;;  %v6575_v12 = vld [vmem:[#allocation19_spill] sm:$0xff] }
 0x600   :  { %1692 = vmatpush1.msra.mxu0 %v4789_v45  ;;  %1763 = vmatpush1.msra.mxu1 %v4905_v7 }
 0x601   :  { %1693 = vmatprep.subr.mxu0 %v4793_v62  ;;  %1764 = vmatprep.subr.mxu1 %v4909_v1  ;;  %v5154_v60 = vsel %vm1880_vm5, %v5076_v37, %v1864_v25  ;;  %v6558_v37 = vld [vmem:[#allocation20_spill] sm:$0xff]  ;;  %v6576_v25 = vld [vmem:[#allocation42_spill] sm:$0xff] }
 0x602   :  { %1694 = vmatpush1.msra.mxu0 %v4800_v47  ;;  %1765 = vmatpush1.msra.mxu1 %v4917_v53 }
 0x603   :  { %1695 = vmatprep.subr.mxu0 %v4804_v58  ;;  %1766 = vmatprep.subr.mxu1 %v4921_v55 }
 0x604   :  { %1696 = vmatpush1.msra.mxu0 %v4808_v59  ;;  %1767 = vmatpush1.msra.mxu1 %v4925_v31 }
 0x605   :  { %1697 = vmatprep.subr.mxu0 %v4812_v61  ;;  %1768 = vmatprep.subr.mxu1 %v4929_v49 }
 0x606   :  { %1698 = vmatpush1.msra.mxu0 %v4816_v0  ;;  %1769 = vmatpush1.msra.mxu1 %v4933_v36 }
 0x607   :  { %1699 = vmatprep.subr.mxu0 %v4820_v63  ;;  %1770 = vmatprep.subr.mxu1 %v4937_v38 }
 0x608   :  { %1700 = vmatpush1.msra.mxu0 %v4824_v2  ;;  %1771 = vmatpush1.msra.mxu1 %v4941_v39 }
 0x609   :  { %1701 = vmatprep.subr.mxu0 %v4828_v4  ;;  %1772 = vmatprep.subr.mxu1 %v4945_v41 }
 0x60a   :  { %1702 = vmatpush1.msra.mxu0 %v4832_v6  ;;  %1773 = vmatpush1.msra.mxu1 %v4949_v10 }
 0x60b   :  { %1703 = vmatprep.subr.mxu0 %v4836_v9  ;;  %1774 = vmatprep.subr.mxu1 %v4953_v13 }
 0x60c   :  { %1704 = vmatpush1.msra.mxu0 %v4840_v14  ;;  %1775 = vmatpush1.msra.mxu1 %v4957_v15 }
 0x60d   :  { %1705 = vmatprep.subr.mxu0 %v4844_v19  ;;  %1776 = vmatprep.subr.mxu1 %v4961_v17 }
 0x60e   :  { %1706 = vmatpush1.msra.mxu0 %v4848_v23  ;;  %1777 = vmatpush1.msra.mxu1 %v4965_v18 }
 0x60f   :  { %1707 = vmatprep.subr.mxu0 %v4852_v27  ;;  %1778 = vmatprep.subr.mxu1 %v4969_v20 }
 0x610   :  { %1708 = vmatpush1.msra.mxu0 %v4856_v29  ;;  %1779 = vmatpush1.msra.mxu1 %v4973_v22 }
 0x611   :  { %1709 = vmatprep.subr.mxu0 %v4860_v30  ;;  %1780 = vmatprep.subr.mxu1 %v4977_v24 }
 0x612   :  { %1710 = vmatpush1.msra.mxu0 %v4980_v26  ;;  %1781 = vmatpush1.msra.mxu1 %v4983_v28 }
 0x613   :  { %1711 = vmatprep.subr.mxu0 %v4986_v33  ;;  %1782 = vmatprep.subr.mxu1 %v4989_v40 }
 0x614   :  { %1712 = vmatpush1.msra.mxu0 %v4992_v42  ;;  %1783 = vmatpush1.msra.mxu1 %v6558_v37 }
 0x615   :  { %1713 = vmatprep.subr.mxu0 %v6559_v11  ;;  %1784 = vmatprep.subr.mxu1 %v6560_v16 }
 0x616   :  { %1714 = vmatpush1.msra.mxu0 %v6561_v54  ;;  %1785 = vmatpush1.msra.mxu1 %v6562_v57 }
 0x617   :  { %1715 = vmatprep.subr.mxu0 %v6563_v21  ;;  %1786 = vmatprep.subr.mxu1 %v6564_v32  ;;  %v6583_v32 = vld [vmem:[#allocation41_spill] sm:$0xff] }
 0x618   :  { %1716 = vmatpush1.msra.mxu0 %v6565_v5  ;;  %1787 = vmatpush1.msra.mxu1 %v6566_v34  ;;  %v6577_v34 = vld [vmem:[#allocation38_spill] sm:$0xff] }
 0x619   :  { %1717 = vmatprep.subr.mxu0 %v6567_v50  ;;  %1788 = vmatprep.subr.mxu1 %v6568_v35  ;;  %v6578_v50 = vmov 0.0   ;;  %v6579_v35 = vld [vmem:[#allocation29_spill] sm:$0xff] }
 0x61a   :  { %1718 = vmatpush1.msra.mxu0 %v6569_v56  ;;  %1789 = vmatpush1.msra.mxu1 %v6570_v43  ;;  %v6580_v43 = vld [vmem:[#allocation18_spill] sm:$0xff] }
 0x61b   :  { %1719 = vmatprep.subr.mxu0 %v6571_v46  ;;  %1790 = vmatprep.subr.mxu1 %v6572_v52  ;;  %v6581_v46 = vld [vmem:[#allocation17_spill] sm:$0xff] }
 0x61c   :  { %1720 = vmatpush1.msra.mxu0 %v6573_v51  ;;  %1791 = vmatpush1.msra.mxu1 %v6574_v8  ;;  %v1486_v52 = vld [vmem:[#allocation2 + $0x6] ss:$8 sm:$0xf] }
 0x61d   :  { %1721 = vmatprep.subr.mxu0 %v6575_v12  ;;  %1792 = vmatprep.subr.mxu1 %v6576_v25  ;;  %v6582_v51 = vld [vmem:[#allocation40_spill] sm:$0xff]  ;;  %v1495_v25 = vrot.slane %v1486_v52, %v6583_v32 }
 0x61e   :  { %1722 = vmatpush1.msra.mxu0 %v6577_v34  ;;  %1755 = vmatprep.mubr.f32.mxu0 %v6578_v50  ;;  %v1491_v56 = vrot.slane %v1486_v52, %v6582_v51 }
 0x61f   :  { %1793 = vmatpush1.msra.mxu1 %v6579_v35  ;;  %1826 = vmatprep.mubr.f32.mxu1 %v6578_v50  ;;  %v1503_v50 = vrot.slane %v1486_v52, %v4617_v44 }
 0x620   :  { %1910 = vmatprep.subr.mxu0 %v6580_v43  ;;  %1981 = vmatprep.subr.mxu1 %v6581_v46  ;;  %v1499_v46 = vrot.slane %v1486_v52, %v4615_v3  ;;  %v5294_v52 = vld [vmem:[#allocation9 + $0x1e8] sm:$0xff] }
 0x621   :  { %6606 = vst [vmem:[#allocation39_spill] sm:$0xff] %v5294_v52 }
 0x6bf   :  { %v1574_v8 = vpop.f32.mrf.mxu0  ;;  %v1645_v5 = vpop.f32.mrf.mxu1 }
 0x6c0   :  { %v1575_v12 = vadd.f32 %v1574_v8, %v1491_v56  ;;  %v1646_v16 = vadd.f32 %v1645_v5, %v1499_v46  ;;  %v6605_v46 = vld [vmem:[#allocation29_spill] sm:$0xff] }
 0x6c1   :  { %v1576_v21 = vpop.f32.mrf.mxu0  ;;  %v1647_v54 = vpop.f32.mrf.mxu1 }
 0x6c2   :  { %v1650_v34 = vmul.f32 0.5, %v1575_v12  ;;  %v1577_v57 = vadd.f32 %v1576_v21, %v1495_v25  ;;  %v1648_v43 = vadd.f32 %v1647_v54, %v1503_v50  ;;  %v1652_v51 = vmul.f32 0.5, %v1646_v16 }
 0x6c4   :  { %3838 = vtanh.f32 %v1650_v34  ;;  %v1651_v35 = vmul.f32 0.5, %v1577_v57 }
 0x6c6   :  { %3840 = vtanh.f32 %v1651_v35 }
 0x6c7   :  { %3842 = vtanh.f32 %v1648_v43  ;;  %v1669_v43 = vld [vmem:[#allocation2 + $0x7] ss:$8 sm:$0xf] }
 0x6c8   :  { %3844 = vtanh.f32 %v1652_v51  ;;  %v6607_v51 = vld [vmem:[#allocation17_spill] sm:$0xff] }
 0x6d1   :  { %v3839_v11 = vpop.eup %3838 }
 0x6d2   :  { %v1656_v37 = vmul.f32 0.5, %v3839_v11  ;;  %v6603_v11 = vld [vmem:[#allocation38_spill] sm:$0xff] }
 0x6d3   :  { %v3841_v56 = vpop.eup %3840 }
 0x6d4   :  { %v1659_v8 = vadd.f32 0.5, %v1656_v37  ;;  %v1657_v32 = vmul.f32 0.5, %v3841_v56  ;;  %v3843_v21 = vpop.eup %3842  ;;  %v6608_v56 = vld [vmem:[#allocation40_spill] sm:$0xff] }
 0x6d5   :  { %v3845_v54 = vpop.eup %3844 }
 0x6d6   :  { %v1660_v12 = vadd.f32 0.5, %v1657_v32  ;;  %v1664_v57 = vmul.f32 %v3843_v21, %v1659_v8  ;;  %v1658_v50 = vmul.f32 0.5, %v3845_v54  ;;  %v6604_v32 = vmov 0.0  }
 0x6d7   :  { %v1674_v8 = vrot.slane %v1669_v43, %v6608_v56 }
 0x6d8   :  { %v1663_v34 = vmul.f32 %v1660_v12, %v5145_v48  ;;  %v1661_v35 = vadd.f32 0.5, %v1658_v50 }
 0x6da   :  { %v5223_v25 = vadd.f32 %v1664_v57, %v1663_v34  ;;  %v6609_v57 = vld [vmem:[#allocation41_spill] sm:$0xff] }
 0x6db   :  { %v1678_v54 = vrot.slane %v1669_v43, %v6609_v57 }
 0x6dc   :  { %3846 = vtanh.f32 %v5223_v25 }
 0x6e9   :  { %v3847_v5 = vpop.eup %3846 }
 0x6ea   :  { %v1667_v16 = vmul.f32 %v3847_v5, %v1661_v35 }
 0x6ec   :  { %1756 = vmatmul.mubr.f32.vlgmr.msra.gmra.mxu0 %v1667_v16  ;;  %1827 = vmatmul.mubr.f32.vlgmr.msra.gmra.mxu1 %v1667_v16  ;;  %v1867_v37 = vrot.slane %v1667_v16, 2 }
 0x6ed   :  { %1911 = vmatpush1.msra.mxu0 %v4789_v45  ;;  %1982 = vmatpush1.msra.mxu1 %v4905_v7  ;;  %v6584_v45 = vld [vmem:[#allocation20_spill] sm:$0xff] }
 0x6ee   :  { %1912 = vmatprep.subr.mxu0 %v4793_v62  ;;  %1983 = vmatprep.subr.mxu1 %v4909_v1  ;;  %v5232_v48 = vsel %vm1882_vm6, %v5154_v60, %v1867_v37  ;;  %v6585_v62 = vld [vmem:[#allocation30_spill] sm:$0xff] }
 0x6ef   :  { %1913 = vmatpush1.msra.mxu0 %v4800_v47  ;;  %1984 = vmatpush1.msra.mxu1 %v4917_v53  ;;  %v6586_v47 = vld [vmem:[#allocation21_spill] sm:$0xff]  ;;  %v6602_v60 = vld [vmem:[#allocation42_spill] sm:$0xff] }
 0x6f0   :  { %1914 = vmatprep.subr.mxu0 %v4804_v58  ;;  %1985 = vmatprep.subr.mxu1 %v4921_v55  ;;  %v6587_v58 = vld [vmem:[#allocation31_spill] sm:$0xff] }
 0x6f1   :  { %1915 = vmatpush1.msra.mxu0 %v4808_v59  ;;  %1986 = vmatpush1.msra.mxu1 %v4925_v31  ;;  %v6588_v59 = vld [vmem:[#allocation22_spill] sm:$0xff] }
 0x6f2   :  { %1916 = vmatprep.subr.mxu0 %v4812_v61  ;;  %1987 = vmatprep.subr.mxu1 %v4929_v49  ;;  %v6589_v61 = vld [vmem:[#allocation32_spill] sm:$0xff] }
 0x6f3   :  { %1917 = vmatpush1.msra.mxu0 %v4816_v0  ;;  %1988 = vmatpush1.msra.mxu1 %v4933_v36  ;;  %v6590_v0 = vld [vmem:[#allocation23_spill] sm:$0xff] }
 0x6f4   :  { %1918 = vmatprep.subr.mxu0 %v4820_v63  ;;  %1989 = vmatprep.subr.mxu1 %v4937_v38  ;;  %v6591_v63 = vld [vmem:[#allocation33_spill] sm:$0xff] }
 0x6f5   :  { %1919 = vmatpush1.msra.mxu0 %v4824_v2  ;;  %1990 = vmatpush1.msra.mxu1 %v4941_v39  ;;  %v6592_v2 = vld [vmem:[#allocation24_spill] sm:$0xff] }
 0x6f6   :  { %1920 = vmatprep.subr.mxu0 %v4828_v4  ;;  %1991 = vmatprep.subr.mxu1 %v4945_v41  ;;  %v6593_v4 = vld [vmem:[#allocation34_spill] sm:$0xff] }
 0x6f7   :  { %1921 = vmatpush1.msra.mxu0 %v4832_v6  ;;  %1992 = vmatpush1.msra.mxu1 %v4949_v10  ;;  %v6594_v6 = vld [vmem:[#allocation25_spill] sm:$0xff] }
 0x6f8   :  { %1922 = vmatprep.subr.mxu0 %v4836_v9  ;;  %1993 = vmatprep.subr.mxu1 %v4953_v13  ;;  %v6595_v9 = vld [vmem:[#allocation35_spill] sm:$0xff] }
 0x6f9   :  { %1923 = vmatpush1.msra.mxu0 %v4840_v14  ;;  %1994 = vmatpush1.msra.mxu1 %v4957_v15  ;;  %v6596_v14 = vld [vmem:[#allocation26_spill] sm:$0xff] }
 0x6fa   :  { %1924 = vmatprep.subr.mxu0 %v4844_v19  ;;  %1995 = vmatprep.subr.mxu1 %v4961_v17  ;;  %v6597_v19 = vld [vmem:[#allocation36_spill] sm:$0xff] }
 0x6fb   :  { %1925 = vmatpush1.msra.mxu0 %v4848_v23  ;;  %1996 = vmatpush1.msra.mxu1 %v4965_v18  ;;  %v6598_v23 = vld [vmem:[#allocation27_spill] sm:$0xff] }
 0x6fc   :  { %1926 = vmatprep.subr.mxu0 %v4852_v27  ;;  %1997 = vmatprep.subr.mxu1 %v4969_v20  ;;  %v6599_v27 = vld [vmem:[#allocation37_spill] sm:$0xff] }
 0x6fd   :  { %1927 = vmatpush1.msra.mxu0 %v4856_v29  ;;  %1998 = vmatpush1.msra.mxu1 %v4973_v22  ;;  %v6600_v29 = vld [vmem:[#allocation28_spill] sm:$0xff] }
 0x6fe   :  { %1928 = vmatprep.subr.mxu0 %v4860_v30  ;;  %1999 = vmatprep.subr.mxu1 %v4977_v24  ;;  %v6601_v30 = vld [vmem:[#allocation19_spill] sm:$0xff] }
 0x6ff   :  { %1929 = vmatpush1.msra.mxu0 %v4980_v26  ;;  %2000 = vmatpush1.msra.mxu1 %v4983_v28 }
 0x700   :  { %1930 = vmatprep.subr.mxu0 %v4986_v33  ;;  %2001 = vmatprep.subr.mxu1 %v4989_v40 }
 0x701   :  { %1931 = vmatpush1.msra.mxu0 %v4992_v42  ;;  %2002 = vmatpush1.msra.mxu1 %v6584_v45 }
 0x702   :  { %1932 = vmatprep.subr.mxu0 %v6585_v62  ;;  %2003 = vmatprep.subr.mxu1 %v6586_v47 }
 0x703   :  { %1933 = vmatpush1.msra.mxu0 %v6587_v58  ;;  %2004 = vmatpush1.msra.mxu1 %v6588_v59 }
 0x704   :  { %1934 = vmatprep.subr.mxu0 %v6589_v61  ;;  %2005 = vmatprep.subr.mxu1 %v6590_v0 }
 0x705   :  { %1935 = vmatpush1.msra.mxu0 %v6591_v63  ;;  %2006 = vmatpush1.msra.mxu1 %v6592_v2 }
 0x706   :  { %1936 = vmatprep.subr.mxu0 %v6593_v4  ;;  %2007 = vmatprep.subr.mxu1 %v6594_v6 }
 0x707   :  { %1937 = vmatpush1.msra.mxu0 %v6595_v9  ;;  %2008 = vmatpush1.msra.mxu1 %v6596_v14 }
 0x708   :  { %1938 = vmatprep.subr.mxu0 %v6597_v19  ;;  %2009 = vmatprep.subr.mxu1 %v6598_v23 }
 0x709   :  { %1939 = vmatpush1.msra.mxu0 %v6599_v27  ;;  %2010 = vmatpush1.msra.mxu1 %v6600_v29 }
 0x70a   :  { %1940 = vmatprep.subr.mxu0 %v6601_v30  ;;  %2011 = vmatprep.subr.mxu1 %v6602_v60 }
 0x70b   :  { %1941 = vmatpush1.msra.mxu0 %v6603_v11  ;;  %1974 = vmatprep.mubr.f32.mxu0 %v6604_v32 }
 0x70c   :  { %2012 = vmatpush1.msra.mxu1 %v6605_v46  ;;  %2045 = vmatprep.mubr.f32.mxu1 %v6604_v32  ;;  %v1686_v46 = vrot.slane %v1669_v43, %v4617_v44 }
 0x70d   :  { %2093 = vmatprep.subr.mxu0 %v5294_v52  ;;  %2164 = vmatprep.subr.mxu1 %v6607_v51  ;;  %v1682_v51 = vrot.slane %v1669_v43, %v4615_v3 }
 0x7ac   :  { %v1757_v12 = vpop.f32.mrf.mxu0  ;;  %v1828_v21 = vpop.f32.mrf.mxu1 }
 0x7ad   :  { %v1758_v34 = vadd.f32 %v1757_v12, %v1674_v8  ;;  %v1829_v32 = vadd.f32 %v1828_v21, %v1682_v51 }
 0x7ae   :  { %v1759_v50 = vpop.f32.mrf.mxu0  ;;  %v1830_v16 = vpop.f32.mrf.mxu1 }
 0x7af   :  { %v1833_v35 = vmul.f32 0.5, %v1758_v34  ;;  %v1760_v5 = vadd.f32 %v1759_v50, %v1678_v54  ;;  %v1831_v52 = vadd.f32 %v1830_v16, %v1686_v46  ;;  %v1835_v56 = vmul.f32 0.5, %v1829_v32  ;;  %v5322_v16 = vld [vmem:[#allocation9 + $0x1a8] sm:$0xff] }
 0x7b1   :  { %3848 = vtanh.f32 %v1833_v35  ;;  %v1834_v37 = vmul.f32 0.5, %v1760_v5 }
 0x7b3   :  { %3850 = vtanh.f32 %v1834_v37 }
 0x7b4   :  { %3852 = vtanh.f32 %v1831_v52 }
 0x7b5   :  { %3854 = vtanh.f32 %v1835_v56 }
 0x7be   :  { %v3849_v11 = vpop.eup %3848 }
 0x7bf   :  { %v1839_v60 = vmul.f32 0.5, %v3849_v11  ;;  %v5306_v11 = vld [vmem:[#allocation9 + $0x1e0] sm:$0xff] }
 0x7c0   :  { %v3851_v8 = vpop.eup %3850 }
 0x7c1   :  { %v1842_v12 = vadd.f32 0.5, %v1839_v60  ;;  %v1840_v57 = vmul.f32 0.5, %v3851_v8  ;;  %v3853_v54 = vpop.eup %3852 }
 0x7c2   :  { %v3855_v46 = vpop.eup %3854 }
 0x7c3   :  { %v1843_v34 = vadd.f32 0.5, %v1840_v57  ;;  %v1847_v35 = vmul.f32 %v3853_v54, %v1842_v12  ;;  %v1841_v43 = vmul.f32 0.5, %v3855_v46  ;;  %v5318_v57 = vld [vmem:[#allocation9 + $0x1c0] sm:$0xff] }
 0x7c5   :  { %v1846_v50 = vmul.f32 %v1843_v34, %v5223_v25  ;;  %v1844_v52 = vadd.f32 0.5, %v1841_v43  ;;  %v5310_v25 = vld [vmem:[#allocation9 + $0x1c8] sm:$0xff] }
 0x7c7   :  { %v5303_v5 = vadd.f32 %v1847_v35, %v1846_v50 }
 0x7c9   :  { %3856 = vtanh.f32 %v5303_v5 }
 0x7d6   :  { %v3857_v21 = vpop.eup %3856 }
 0x7d7   :  { %v1850_v32 = vmul.f32 %v3857_v21, %v1844_v52  ;;  %v5427_v21 = vld [vmem:[#allocation9 + $0x1f0] sm:$0xff] }
 0x7d9   :  { %1975 = vmatmul.mubr.f32.vlgmr.msra.gmra.mxu0 %v1850_v32  ;;  %2046 = vmatmul.mubr.f32.vlgmr.msra.gmra.mxu1 %v1850_v32  ;;  %v1870_v60 = vrot.slane %v1850_v32, 1  ;;  %v5435_v32 = vld [vmem:[#allocation9 + $0x1d0] sm:$0xff] }
 0x7da   :  { %2094 = vmatpush1.msra.mxu0 %v5306_v11  ;;  %2165 = vmatpush1.msra.mxu1 %v4905_v7  ;;  %v5326_v7 = vld [vmem:[#allocation9 + $0x1a0] sm:$0xff] }
 0x7db   :  { %2095 = vmatprep.subr.mxu0 %v5310_v25  ;;  %2166 = vmatprep.subr.mxu1 %v4909_v1  ;;  %v5316_v56 = vsel %vm1884_vm7, %v5232_v48, %v1870_v60  ;;  %v5330_v1 = vld [vmem:[#allocation9 + $0x188] sm:$0xff]  ;;  %v5334_v48 = vld [vmem:[#allocation9 + $0x180] sm:$0xff]  ;;  %v5439_v60 = vld [vmem:[#allocation9 + $0x1b8] sm:$0xff] }
 0x7dc   :  { %6610 = vst [vmem:[#allocation18_spill] sm:$0xff] %v5316_v56  ;;  %2096 = vmatpush1.msra.mxu0 %v5318_v57  ;;  %2167 = vmatpush1.msra.mxu1 %v4917_v53  ;;  %v5338_v53 = vld [vmem:[#allocation9 + $0x168] sm:$0xff] }
 0x7dd   :  { %2097 = vmatprep.subr.mxu0 %v5322_v16  ;;  %2168 = vmatprep.subr.mxu1 %v4921_v55  ;;  %v5342_v55 = vld [vmem:[#allocation9 + $0x160] sm:$0xff]  ;;  %v5552_v56 = vld [vmem:[#allocation9 + $0x28] sm:$0xff] }
 0x7de   :  { %2098 = vmatpush1.msra.mxu0 %v5326_v7  ;;  %2169 = vmatpush1.msra.mxu1 %v4925_v31  ;;  %v5346_v31 = vld [vmem:[#allocation9 + $0x148] sm:$0xff]  ;;  %6633 = vst [vmem:[#allocation37_spill] sm:$0xff] %v5552_v56 }
 0x7df   :  { %2099 = vmatprep.subr.mxu0 %v5330_v1  ;;  %2170 = vmatprep.subr.mxu1 %v4929_v49  ;;  %v5350_v49 = vld [vmem:[#allocation9 + $0x140] sm:$0xff] }
 0x7e0   :  { %2100 = vmatpush1.msra.mxu0 %v5334_v48  ;;  %2171 = vmatpush1.msra.mxu1 %v4933_v36  ;;  %v5354_v36 = vld [vmem:[#allocation9 + $0x128] sm:$0xff] }
 0x7e1   :  { %2101 = vmatprep.subr.mxu0 %v5338_v53  ;;  %2172 = vmatprep.subr.mxu1 %v4937_v38  ;;  %v5358_v38 = vld [vmem:[#allocation9 + $0x120] sm:$0xff] }
 0x7e2   :  { %2102 = vmatpush1.msra.mxu0 %v5342_v55  ;;  %2173 = vmatpush1.msra.mxu1 %v4941_v39  ;;  %v5362_v39 = vld [vmem:[#allocation9 + $0x108] sm:$0xff] }
 0x7e3   :  { %2103 = vmatprep.subr.mxu0 %v5346_v31  ;;  %2174 = vmatprep.subr.mxu1 %v4945_v41  ;;  %v5366_v41 = vld [vmem:[#allocation9 + $0x100] sm:$0xff] }
 0x7e4   :  { %2104 = vmatpush1.msra.mxu0 %v5350_v49  ;;  %2175 = vmatpush1.msra.mxu1 %v4949_v10  ;;  %v5370_v10 = vld [vmem:[#allocation9 + $0xe8] sm:$0xff] }
 0x7e5   :  { %2105 = vmatprep.subr.mxu0 %v5354_v36  ;;  %2176 = vmatprep.subr.mxu1 %v4953_v13  ;;  %v5374_v13 = vld [vmem:[#allocation9 + $0xe0] sm:$0xff] }
 0x7e6   :  { %2106 = vmatpush1.msra.mxu0 %v5358_v38  ;;  %2177 = vmatpush1.msra.mxu1 %v4957_v15  ;;  %v5378_v15 = vld [vmem:[#allocation9 + $0xc8] sm:$0xff] }
 0x7e7   :  { %2107 = vmatprep.subr.mxu0 %v5362_v39  ;;  %2178 = vmatprep.subr.mxu1 %v4961_v17  ;;  %v6611_v17 = vld [vmem:[#allocation42_spill] sm:$0xff] }
 0x7e8   :  { %2108 = vmatpush1.msra.mxu0 %v5366_v41  ;;  %2179 = vmatpush1.msra.mxu1 %v4965_v18  ;;  %v6612_v18 = vld [vmem:[#allocation38_spill] sm:$0xff] }
 0x7e9   :  { %2109 = vmatprep.subr.mxu0 %v5370_v10  ;;  %2180 = vmatprep.subr.mxu1 %v4969_v20  ;;  %v6613_v20 = vmov 0.0  }
 0x7ea   :  { %2110 = vmatpush1.msra.mxu0 %v5374_v13  ;;  %2181 = vmatpush1.msra.mxu1 %v4973_v22  ;;  %v6614_v22 = vld [vmem:[#allocation29_spill] sm:$0xff] }
 0x7eb   :  { %2111 = vmatprep.subr.mxu0 %v5378_v15  ;;  %2182 = vmatprep.subr.mxu1 %v4977_v24  ;;  %v6615_v24 = vld [vmem:[#allocation39_spill] sm:$0xff] }
 0x7ec   :  { %2112 = vmatpush1.msra.mxu0 %v4980_v26  ;;  %2183 = vmatpush1.msra.mxu1 %v4983_v28  ;;  %v5411_v26 = vld [vmem:[#allocation9 + $0x1f8] sm:$0xff] }
 0x7ed   :  { %2113 = vmatprep.subr.mxu0 %v4986_v33  ;;  %2184 = vmatprep.subr.mxu1 %v4989_v40  ;;  %6616 = vst [vmem:[#allocation20_spill] sm:$0xff] %v5411_v26  ;;  %v1888_v28 = vld [vmem:[#allocation2 + $0x20] ss:$8 sm:$0xf] }
 0x7ee   :  { %2114 = vmatpush1.msra.mxu0 %v4992_v42  ;;  %2185 = vmatpush1.msra.mxu1 %v6584_v45  ;;  %v6617_v33 = vld [vmem:[#allocation40_spill] sm:$0xff] }
 0x7ef   :  { %2115 = vmatprep.subr.mxu0 %v6585_v62  ;;  %2186 = vmatprep.subr.mxu1 %v6586_v47  ;;  %v1893_v40 = vrot.slane %v1888_v28, %v6617_v33  ;;  %v6618_v47 = vld [vmem:[#allocation41_spill] sm:$0xff] }
 0x7f0   :  { %2116 = vmatpush1.msra.mxu0 %v6587_v58  ;;  %2187 = vmatpush1.msra.mxu1 %v6588_v59  ;;  %v1897_v58 = vrot.slane %v1888_v28, %v6618_v47 }
 0x7f1   :  { %2117 = vmatprep.subr.mxu0 %v6589_v61  ;;  %2188 = vmatprep.subr.mxu1 %v6590_v0 }
 0x7f2   :  { %2118 = vmatpush1.msra.mxu0 %v6591_v63  ;;  %2189 = vmatpush1.msra.mxu1 %v6592_v2 }
 0x7f3   :  { %2119 = vmatprep.subr.mxu0 %v6593_v4  ;;  %2190 = vmatprep.subr.mxu1 %v6594_v6  ;;  %v1905_v4 = vrot.slane %v1888_v28, %v4617_v44 }
 0x7f4   :  { %2120 = vmatpush1.msra.mxu0 %v6595_v9  ;;  %2191 = vmatpush1.msra.mxu1 %v6596_v14  ;;  %v1901_v9 = vrot.slane %v1888_v28, %v4615_v3  ;;  %v5455_v28 = vld [vmem:[#allocation9 + $0x178] sm:$0xff] }
 0x7f5   :  { %2121 = vmatprep.subr.mxu0 %v6597_v19  ;;  %2192 = vmatprep.subr.mxu1 %v6598_v23 }
 0x7f6   :  { %2122 = vmatpush1.msra.mxu0 %v6599_v27  ;;  %2193 = vmatpush1.msra.mxu1 %v6600_v29 }
 0x7f7   :  { %2123 = vmatprep.subr.mxu0 %v6601_v30  ;;  %2194 = vmatprep.subr.mxu1 %v6611_v17  ;;  %v5443_v17 = vld [vmem:[#allocation9 + $0x1b0] sm:$0xff] }
 0x7f8   :  { %2124 = vmatpush1.msra.mxu0 %v6612_v18  ;;  %2157 = vmatprep.mubr.f32.mxu0 %v6613_v20  ;;  %v5447_v18 = vld [vmem:[#allocation9 + $0x198] sm:$0xff] }
 0x7f9   :  { %2195 = vmatpush1.msra.mxu1 %v6614_v22  ;;  %2228 = vmatprep.mubr.f32.mxu1 %v6613_v20  ;;  %v5451_v22 = vld [vmem:[#allocation9 + $0x190] sm:$0xff] }
 0x7fa   :  { %2276 = vmatprep.subr.mxu0 %v6615_v24  ;;  %2347 = vmatprep.subr.mxu1 %v5411_v26 }
 0x899   :  { %v1976_v42 = vpop.f32.mrf.mxu0  ;;  %v2047_v45 = vpop.f32.mrf.mxu1 }
 0x89a   :  { %v1977_v62 = vadd.f32 %v1976_v42, %v1893_v40  ;;  %v2048_v14 = vadd.f32 %v2047_v45, %v1901_v9  ;;  %v5459_v40 = vld [vmem:[#allocation9 + $0x170] sm:$0xff]  ;;  %v5463_v42 = vld [vmem:[#allocation9 + $0x158] sm:$0xff]  ;;  %v5504_v9 = vld [vmem:[#allocation9 + $0xa8] sm:$0xff] }
 0x89b   :  { %v1978_v59 = vpop.f32.mrf.mxu0  ;;  %v2049_v63 = vpop.f32.mrf.mxu1  ;;  %v5467_v45 = vld [vmem:[#allocation9 + $0x150] sm:$0xff] }
 0x89c   :  { %v2052_v61 = vmul.f32 0.5, %v1977_v62  ;;  %v1979_v0 = vadd.f32 %v1978_v59, %v1897_v58  ;;  %v2050_v6 = vadd.f32 %v2049_v63, %v1905_v4  ;;  %v2054_v19 = vmul.f32 0.5, %v2048_v14  ;;  %v5471_v62 = vld [vmem:[#allocation9 + $0x138] sm:$0xff]  ;;  %v5475_v58 = vld [vmem:[#allocation9 + $0x130] sm:$0xff]  ;;  %v5498_v4 = vld [vmem:[#allocation9 + $0xc0] sm:$0xff] }
 0x89d   :  { %v5479_v59 = vld [vmem:[#allocation9 + $0x118] sm:$0xff]  ;;  %v5491_v63 = vld [vmem:[#allocation9 + $0xf0] sm:$0xff] }
 0x89e   :  { %3858 = vtanh.f32 %v2052_v61  ;;  %v2053_v2 = vmul.f32 0.5, %v1979_v0  ;;  %v5483_v61 = vld [vmem:[#allocation9 + $0x110] sm:$0xff]  ;;  %v5487_v0 = vld [vmem:[#allocation9 + $0xf8] sm:$0xff] }
 0x89f   :  { %v5507_v14 = vld [vmem:[#allocation9 + $0xb8] sm:$0xff] }
 0x8a0   :  { %3860 = vtanh.f32 %v2053_v2  ;;  %v5495_v2 = vld [vmem:[#allocation9 + $0xd8] sm:$0xff] }
 0x8a1   :  { %3862 = vtanh.f32 %v2050_v6  ;;  %v5501_v6 = vld [vmem:[#allocation9 + $0xd0] sm:$0xff] }
 0x8a2   :  { %3864 = vtanh.f32 %v2054_v19  ;;  %v5510_v19 = vld [vmem:[#allocation9 + $0xa0] sm:$0xff] }
 0x8ab   :  { %v3859_v23 = vpop.eup %3858 }
 0x8ac   :  { %v2058_v27 = vmul.f32 0.5, %v3859_v23  ;;  %v5513_v23 = vld [vmem:[#allocation9 + $0xb0] sm:$0xff] }
 0x8ad   :  { %v3861_v29 = vpop.eup %3860  ;;  %6620 = vst [vmem:[#allocation21_spill] sm:$0xff] %v5513_v23 }
 0x8ae   :  { %v2061_v30 = vadd.f32 0.5, %v2058_v27  ;;  %v2059_v37 = vmul.f32 0.5, %v3861_v29  ;;  %v3863_v8 = vpop.eup %3862  ;;  %v5516_v27 = vld [vmem:[#allocation9 + $0x88] sm:$0xff]  ;;  %v5519_v29 = vld [vmem:[#allocation9 + $0x98] sm:$0xff] }
 0x8af   :  { %v3865_v50 = vpop.eup %3864  ;;  %6621 = vst [vmem:[#allocation31_spill] sm:$0xff] %v5516_v27  ;;  %6622 = vst [vmem:[#allocation22_spill] sm:$0xff] %v5519_v29 }
 0x8b0   :  { %v2062_v51 = vadd.f32 0.5, %v2059_v37  ;;  %v2066_v34 = vmul.f32 %v3863_v8, %v2061_v30  ;;  %v2060_v35 = vmul.f32 0.5, %v3865_v50  ;;  %v5522_v30 = vld [vmem:[#allocation9 + $0x80] sm:$0xff]  ;;  %v5525_v37 = vld [vmem:[#allocation9 + $0x90] sm:$0xff]  ;;  %v5531_v8 = vld [vmem:[#allocation9 + $0x78] sm:$0xff] }
 0x8b1   :  { %6623 = vst [vmem:[#allocation32_spill] sm:$0xff] %v5522_v30  ;;  %6624 = vst [vmem:[#allocation23_spill] sm:$0xff] %v5525_v37  ;;  %v5540_v50 = vld [vmem:[#allocation9 + $0x48] sm:$0xff] }
 0x8b2   :  { %v2065_v12 = vmul.f32 %v2062_v51, %v5303_v5  ;;  %v2063_v46 = vadd.f32 0.5, %v2060_v35  ;;  %v5431_v5 = vld [vmem:[#allocation9 + $0x1d8] sm:$0xff]  ;;  %v5528_v51 = vld [vmem:[#allocation9 + $0x68] sm:$0xff]  ;;  %6626 = vst [vmem:[#allocation24_spill] sm:$0xff] %v5531_v8  ;;  %6629 = vst [vmem:[#allocation35_spill] sm:$0xff] %v5540_v50 }
 0x8b3   :  { %6625 = vst [vmem:[#allocation33_spill] sm:$0xff] %v5528_v51  ;;  %v5543_v35 = vld [vmem:[#allocation9 + $0x58] sm:$0xff] }
 0x8b4   :  { %v5419_v54 = vadd.f32 %v2066_v34, %v2065_v12  ;;  %v5534_v12 = vld [vmem:[#allocation9 + $0x60] sm:$0xff]  ;;  %v5537_v34 = vld [vmem:[#allocation9 + $0x70] sm:$0xff]  ;;  %6630 = vst [vmem:[#allocation26_spill] sm:$0xff] %v5543_v35 }
 0x8b5   :  { %6627 = vst [vmem:[#allocation34_spill] sm:$0xff] %v5534_v12  ;;  %6628 = vst [vmem:[#allocation25_spill] sm:$0xff] %v5537_v34 }
 0x8b6   :  { %3866 = vtanh.f32 %v5419_v54 }
 0x8c3   :  { %v3867_v43 = vpop.eup %3866 }
 0x8c4   :  { %v5422_v52 = vmul.f32 %v3867_v43, %v2063_v46  ;;  %v5546_v46 = vld [vmem:[#allocation9 + $0x40] sm:$0xff]  ;;  %v5549_v43 = vld [vmem:[#allocation9 + $0x50] sm:$0xff] }
 0x8c5   :  { %6631 = vst [vmem:[#allocation36_spill] sm:$0xff] %v5546_v46  ;;  %6632 = vst [vmem:[#allocation27_spill] sm:$0xff] %v5549_v43 }
 0x8c6   :  { %6619 = vst [vmem:[#allocation30_spill] sm:$0xff] %v5422_v52  ;;  %2158 = vmatmul.mubr.f32.vlgmr.msra.gmra.mxu0 %v5422_v52  ;;  %2229 = vmatmul.mubr.f32.vlgmr.msra.gmra.mxu1 %v5422_v52  ;;  %v5555_v52 = vld [vmem:[#allocation9 + $0x38] sm:$0xff] }
 0x8c7   :  { %2277 = vmatpush1.msra.mxu0 %v5306_v11  ;;  %2348 = vmatpush1.msra.mxu1 %v5427_v21  ;;  %6634 = vst [vmem:[#allocation28_spill] sm:$0xff] %v5555_v52 }
 0x8c8   :  { %2278 = vmatprep.subr.mxu0 %v5310_v25  ;;  %2349 = vmatprep.subr.mxu1 %v5431_v5 }
 0x8c9   :  { %2279 = vmatpush1.msra.mxu0 %v5318_v57  ;;  %2350 = vmatpush1.msra.mxu1 %v5435_v32 }
 0x8ca   :  { %2280 = vmatprep.subr.mxu0 %v5322_v16  ;;  %2351 = vmatprep.subr.mxu1 %v5439_v60 }
 0x8cb   :  { %2281 = vmatpush1.msra.mxu0 %v5326_v7  ;;  %2352 = vmatpush1.msra.mxu1 %v5443_v17 }
 0x8cc   :  { %2282 = vmatprep.subr.mxu0 %v5330_v1  ;;  %2353 = vmatprep.subr.mxu1 %v5447_v18 }
 0x8cd   :  { %2283 = vmatpush1.msra.mxu0 %v5334_v48  ;;  %2354 = vmatpush1.msra.mxu1 %v5451_v22 }
 0x8ce   :  { %2284 = vmatprep.subr.mxu0 %v5338_v53  ;;  %2355 = vmatprep.subr.mxu1 %v5455_v28 }
 0x8cf   :  { %2285 = vmatpush1.msra.mxu0 %v5342_v55  ;;  %2356 = vmatpush1.msra.mxu1 %v5459_v40 }
 0x8d0   :  { %2286 = vmatprep.subr.mxu0 %v5346_v31  ;;  %2357 = vmatprep.subr.mxu1 %v5463_v42 }
 0x8d1   :  { %2287 = vmatpush1.msra.mxu0 %v5350_v49  ;;  %2358 = vmatpush1.msra.mxu1 %v5467_v45 }
 0x8d2   :  { %2288 = vmatprep.subr.mxu0 %v5354_v36  ;;  %2359 = vmatprep.subr.mxu1 %v5471_v62 }
 0x8d3   :  { %2289 = vmatpush1.msra.mxu0 %v5358_v38  ;;  %2360 = vmatpush1.msra.mxu1 %v5475_v58 }
 0x8d4   :  { %2290 = vmatprep.subr.mxu0 %v5362_v39  ;;  %2361 = vmatprep.subr.mxu1 %v5479_v59 }
 0x8d5   :  { %2291 = vmatpush1.msra.mxu0 %v5366_v41  ;;  %2362 = vmatpush1.msra.mxu1 %v5483_v61 }
 0x8d6   :  { %2292 = vmatprep.subr.mxu0 %v5370_v10  ;;  %2363 = vmatprep.subr.mxu1 %v5487_v0 }
 0x8d7   :  { %2293 = vmatpush1.msra.mxu0 %v5374_v13  ;;  %2364 = vmatpush1.msra.mxu1 %v5491_v63 }
 0x8d8   :  { %2294 = vmatprep.subr.mxu0 %v5378_v15  ;;  %2365 = vmatprep.subr.mxu1 %v5495_v2 }
 0x8d9   :  { %2295 = vmatpush1.msra.mxu0 %v5498_v4  ;;  %2366 = vmatpush1.msra.mxu1 %v5501_v6 }
 0x8da   :  { %2296 = vmatprep.subr.mxu0 %v5504_v9  ;;  %2367 = vmatprep.subr.mxu1 %v5507_v14 }
 0x8db   :  { %2297 = vmatpush1.msra.mxu0 %v5510_v19  ;;  %2368 = vmatpush1.msra.mxu1 %v5513_v23 }
 0x8dc   :  { %2298 = vmatprep.subr.mxu0 %v5516_v27  ;;  %2369 = vmatprep.subr.mxu1 %v5519_v29 }
 0x8dd   :  { %2299 = vmatpush1.msra.mxu0 %v5522_v30  ;;  %2370 = vmatpush1.msra.mxu1 %v5525_v37 }
 0x8de   :  { %2300 = vmatprep.subr.mxu0 %v5528_v51  ;;  %2371 = vmatprep.subr.mxu1 %v5531_v8 }
 0x8df   :  { %2301 = vmatpush1.msra.mxu0 %v5534_v12  ;;  %2372 = vmatpush1.msra.mxu1 %v5537_v34 }
 0x8e0   :  { %2302 = vmatprep.subr.mxu0 %v5540_v50  ;;  %2373 = vmatprep.subr.mxu1 %v5543_v35  ;;  %v5558_v50 = vld [vmem:[#allocation9 + $0x20] sm:$0xff]  ;;  %v5561_v35 = vld [vmem:[#allocation9 + $0x30] sm:$0xff] }
 0x8e1   :  { %2303 = vmatpush1.msra.mxu0 %v5546_v46  ;;  %2374 = vmatpush1.msra.mxu1 %v5549_v43  ;;  %6635 = vst [vmem:[#allocation19_spill] sm:$0xff] %v5558_v50  ;;  %6636 = vst [vmem:[#allocation17_spill] sm:$0xff] %v5561_v35  ;;  %v5564_v46 = vld [vmem:[#allocation9 + $0x8] sm:$0xff]  ;;  %v5567_v43 = vld [vmem:[#allocation9 + $0x18] sm:$0xff] }
 0x8e2   :  { %2304 = vmatprep.subr.mxu0 %v5552_v56  ;;  %2375 = vmatprep.subr.mxu1 %v5555_v52  ;;  %6637 = vst [vmem:[#allocation42_spill] sm:$0xff] %v5564_v46  ;;  %6638 = vst [vmem:[#allocation38_spill] sm:$0xff] %v5567_v43  ;;  %v5570_v56 = vld [vmem:[#allocation9] sm:$0xff]  ;;  %v5574_v52 = vld [vmem:[#allocation9 + $0x10] sm:$0xff] }
 0x8e3   :  { %2305 = vmatpush1.msra.mxu0 %v5558_v50  ;;  %2376 = vmatpush1.msra.mxu1 %v5561_v35  ;;  %6639 = vst [vmem:[#allocation29_spill] sm:$0xff] %v5570_v56  ;;  %6640 = vst [vmem:[#allocation43_spill] sm:$0xff] %v5574_v52 }
 0x8e4   :  { %2306 = vmatprep.subr.mxu0 %v5564_v46  ;;  %2377 = vmatprep.subr.mxu1 %v5567_v43  ;;  %v2071_v46 = vld [vmem:[#allocation2 + $0x21] ss:$8 sm:$0xf] }
 0x8e5   :  { %2307 = vmatpush1.msra.mxu0 %v5570_v56  ;;  %2340 = vmatprep.mubr.f32.mxu0 %v6613_v20  ;;  %v2076_v35 = vrot.slane %v2071_v46, %v6617_v33  ;;  %v2080_v56 = vrot.slane %v2071_v46, %v6618_v47 }
 0x8e6   :  { %2378 = vmatpush1.msra.mxu1 %v5574_v52  ;;  %2411 = vmatprep.mubr.f32.mxu1 %v6613_v20  ;;  %v2088_v20 = vrot.slane %v2071_v46, %v4617_v44 }
 0x8e7   :  { %2459 = vmatprep.subr.mxu0 %v6615_v24  ;;  %2530 = vmatprep.subr.mxu1 %v5411_v26  ;;  %v2084_v26 = vrot.slane %v2071_v46, %v4615_v3  ;;  %v6648_v46 = vld [vmem:[#allocation25_spill] sm:$0xff] }
 0x986   :  { %v2159_v43 = vpop.f32.mrf.mxu0  ;;  %v2230_v50 = vpop.f32.mrf.mxu1 }
 0x987   :  { %v2160_v34 = vadd.f32 %v2159_v43, %v2076_v35  ;;  %v2231_v30 = vadd.f32 %v2230_v50, %v2084_v26  ;;  %v6647_v50 = vld [vmem:[#allocation34_spill] sm:$0xff] }
 0x988   :  { %v2161_v12 = vpop.f32.mrf.mxu0  ;;  %v2232_v37 = vpop.f32.mrf.mxu1 }
 0x989   :  { %v2235_v8 = vmul.f32 0.5, %v2160_v34  ;;  %v2162_v51 = vadd.f32 %v2161_v12, %v2080_v56  ;;  %v2233_v24 = vadd.f32 %v2232_v37, %v2088_v20  ;;  %v2237_v33 = vmul.f32 0.5, %v2231_v30  ;;  %v6646_v37 = vld [vmem:[#allocation24_spill] sm:$0xff] }
 0x98b   :  { %3868 = vtanh.f32 %v2235_v8  ;;  %v2236_v52 = vmul.f32 0.5, %v2162_v51 }
 0x98d   :  { %3870 = vtanh.f32 %v2236_v52 }
 0x98e   :  { %3872 = vtanh.f32 %v2233_v24 }
 0x98f   :  { %3874 = vtanh.f32 %v2237_v33  ;;  %v6641_v33 = vld [vmem:[#allocation31_spill] sm:$0xff] }
 0x998   :  { %v3869_v29 = vpop.eup %3868 }
 0x999   :  { %v2241_v27 = vmul.f32 0.5, %v3869_v29  ;;  %v6645_v29 = vld [vmem:[#allocation33_spill] sm:$0xff] }
 0x99a   :  { %v3871_v35 = vpop.eup %3870 }
 0x99b   :  { %v2244_v43 = vadd.f32 0.5, %v2241_v27  ;;  %v2242_v47 = vmul.f32 0.5, %v3871_v35  ;;  %v3873_v56 = vpop.eup %3872  ;;  %v6644_v27 = vld [vmem:[#allocation23_spill] sm:$0xff] }
 0x99c   :  { %v3875_v20 = vpop.eup %3874  ;;  %v6649_v35 = vld [vmem:[#allocation35_spill] sm:$0xff] }
 0x99d   :  { %v2245_v34 = vadd.f32 0.5, %v2242_v47  ;;  %v2249_v51 = vmul.f32 %v3873_v56, %v2244_v43  ;;  %v2243_v52 = vmul.f32 0.5, %v3875_v20  ;;  %v6642_v47 = vld [vmem:[#allocation22_spill] sm:$0xff]  ;;  %v6652_v56 = vld [vmem:[#allocation27_spill] sm:$0xff] }
 0x99e   :  { %v6650_v43 = vld [vmem:[#allocation26_spill] sm:$0xff]  ;;  %v6655_v20 = vld [vmem:[#allocation19_spill] sm:$0xff] }
 0x99f   :  { %v2248_v8 = vmul.f32 %v2245_v34, %v5419_v54  ;;  %v2246_v24 = vadd.f32 0.5, %v2243_v52  ;;  %v6643_v54 = vld [vmem:[#allocation32_spill] sm:$0xff]  ;;  %v6656_v52 = vld [vmem:[#allocation17_spill] sm:$0xff] }
 0x9a0   :  { %v6651_v34 = vld [vmem:[#allocation36_spill] sm:$0xff] }
 0x9a1   :  { %v5585_v12 = vadd.f32 %v2249_v51, %v2248_v8  ;;  %v6653_v8 = vld [vmem:[#allocation37_spill] sm:$0xff]  ;;  %v6654_v51 = vld [vmem:[#allocation28_spill] sm:$0xff] }
 0x9a3   :  { %3876 = vtanh.f32 %v5585_v12 }
 0x9b0   :  { %v3877_v26 = vpop.eup %3876 }
 0x9b1   :  { %v5588_v30 = vmul.f32 %v3877_v26, %v2246_v24  ;;  %v6657_v24 = vld [vmem:[#allocation42_spill] sm:$0xff] }
 0x9b2   :  { %v6658_v26 = vld [vmem:[#allocation38_spill] sm:$0xff] }
 0x9b3   :  { %2341 = vmatmul.mubr.f32.vlgmr.msra.gmra.mxu0 %v5588_v30  ;;  %2412 = vmatmul.mubr.f32.vlgmr.msra.gmra.mxu1 %v5588_v30 }
 0x9b4   :  { %2460 = vmatpush1.msra.mxu0 %v5306_v11  ;;  %2531 = vmatpush1.msra.mxu1 %v5427_v21 }
 0x9b5   :  { %2461 = vmatprep.subr.mxu0 %v5310_v25  ;;  %2532 = vmatprep.subr.mxu1 %v5431_v5 }
 0x9b6   :  { %2462 = vmatpush1.msra.mxu0 %v5318_v57  ;;  %2533 = vmatpush1.msra.mxu1 %v5435_v32 }
 0x9b7   :  { %2463 = vmatprep.subr.mxu0 %v5322_v16  ;;  %2534 = vmatprep.subr.mxu1 %v5439_v60 }
 0x9b8   :  { %2464 = vmatpush1.msra.mxu0 %v5326_v7  ;;  %2535 = vmatpush1.msra.mxu1 %v5443_v17 }
 0x9b9   :  { %2465 = vmatprep.subr.mxu0 %v5330_v1  ;;  %2536 = vmatprep.subr.mxu1 %v5447_v18 }
 0x9ba   :  { %2466 = vmatpush1.msra.mxu0 %v5334_v48  ;;  %2537 = vmatpush1.msra.mxu1 %v5451_v22 }
 0x9bb   :  { %2467 = vmatprep.subr.mxu0 %v5338_v53  ;;  %2538 = vmatprep.subr.mxu1 %v5455_v28 }
 0x9bc   :  { %2468 = vmatpush1.msra.mxu0 %v5342_v55  ;;  %2539 = vmatpush1.msra.mxu1 %v5459_v40 }
 0x9bd   :  { %2469 = vmatprep.subr.mxu0 %v5346_v31  ;;  %2540 = vmatprep.subr.mxu1 %v5463_v42 }
 0x9be   :  { %2470 = vmatpush1.msra.mxu0 %v5350_v49  ;;  %2541 = vmatpush1.msra.mxu1 %v5467_v45 }
 0x9bf   :  { %2471 = vmatprep.subr.mxu0 %v5354_v36  ;;  %2542 = vmatprep.subr.mxu1 %v5471_v62 }
 0x9c0   :  { %2472 = vmatpush1.msra.mxu0 %v5358_v38  ;;  %2543 = vmatpush1.msra.mxu1 %v5475_v58 }
 0x9c1   :  { %2473 = vmatprep.subr.mxu0 %v5362_v39  ;;  %2544 = vmatprep.subr.mxu1 %v5479_v59 }
 0x9c2   :  { %2474 = vmatpush1.msra.mxu0 %v5366_v41  ;;  %2545 = vmatpush1.msra.mxu1 %v5483_v61 }
 0x9c3   :  { %2475 = vmatprep.subr.mxu0 %v5370_v10  ;;  %2546 = vmatprep.subr.mxu1 %v5487_v0 }
 0x9c4   :  { %2476 = vmatpush1.msra.mxu0 %v5374_v13  ;;  %2547 = vmatpush1.msra.mxu1 %v5491_v63 }
 0x9c5   :  { %2477 = vmatprep.subr.mxu0 %v5378_v15  ;;  %2548 = vmatprep.subr.mxu1 %v5495_v2 }
 0x9c6   :  { %2478 = vmatpush1.msra.mxu0 %v5498_v4  ;;  %2549 = vmatpush1.msra.mxu1 %v5501_v6 }
 0x9c7   :  { %2479 = vmatprep.subr.mxu0 %v5504_v9  ;;  %2550 = vmatprep.subr.mxu1 %v5507_v14 }
 0x9c8   :  { %2480 = vmatpush1.msra.mxu0 %v5510_v19  ;;  %2551 = vmatpush1.msra.mxu1 %v5513_v23 }
 0x9c9   :  { %2481 = vmatprep.subr.mxu0 %v6641_v33  ;;  %2552 = vmatprep.subr.mxu1 %v6642_v47 }
 0x9ca   :  { %2482 = vmatpush1.msra.mxu0 %v6643_v54  ;;  %2553 = vmatpush1.msra.mxu1 %v6644_v27 }
 0x9cb   :  { %2483 = vmatprep.subr.mxu0 %v6645_v29  ;;  %2554 = vmatprep.subr.mxu1 %v6646_v37  ;;  %v6665_v37 = vld [vmem:[#allocation41_spill] sm:$0xff] }
 0x9cc   :  { %2484 = vmatpush1.msra.mxu0 %v6647_v50  ;;  %2555 = vmatpush1.msra.mxu1 %v6648_v46  ;;  %v6659_v46 = vld [vmem:[#allocation29_spill] sm:$0xff] }
 0x9cd   :  { %2485 = vmatprep.subr.mxu0 %v6649_v35  ;;  %2556 = vmatprep.subr.mxu1 %v6650_v43  ;;  %v6660_v35 = vmov 0.0   ;;  %v6661_v43 = vld [vmem:[#allocation43_spill] sm:$0xff] }
 0x9ce   :  { %2486 = vmatpush1.msra.mxu0 %v6651_v34  ;;  %2557 = vmatpush1.msra.mxu1 %v6652_v56  ;;  %v6662_v56 = vld [vmem:[#allocation39_spill] sm:$0xff] }
 0x9cf   :  { %2487 = vmatprep.subr.mxu0 %v6653_v8  ;;  %2558 = vmatprep.subr.mxu1 %v6654_v51  ;;  %v6663_v8 = vld [vmem:[#allocation20_spill] sm:$0xff] }
 0x9d0   :  { %2488 = vmatpush1.msra.mxu0 %v6655_v20  ;;  %2559 = vmatpush1.msra.mxu1 %v6656_v52  ;;  %v2254_v51 = vld [vmem:[#allocation2 + $0x22] ss:$8 sm:$0xf] }
 0x9d1   :  { %2489 = vmatprep.subr.mxu0 %v6657_v24  ;;  %2560 = vmatprep.subr.mxu1 %v6658_v26  ;;  %v6664_v20 = vld [vmem:[#allocation40_spill] sm:$0xff]  ;;  %v2263_v26 = vrot.slane %v2254_v51, %v6665_v37 }
 0x9d2   :  { %2490 = vmatpush1.msra.mxu0 %v6659_v46  ;;  %2523 = vmatprep.mubr.f32.mxu0 %v6660_v35  ;;  %v2259_v34 = vrot.slane %v2254_v51, %v6664_v20 }
 0x9d3   :  { %2561 = vmatpush1.msra.mxu1 %v6661_v43  ;;  %2594 = vmatprep.mubr.f32.mxu1 %v6660_v35  ;;  %v2271_v35 = vrot.slane %v2254_v51, %v4617_v44 }
 0x9d4   :  { %2642 = vmatprep.subr.mxu0 %v6662_v56  ;;  %2713 = vmatprep.subr.mxu1 %v6663_v8  ;;  %v2267_v8 = vrot.slane %v2254_v51, %v4615_v3  ;;  %v6669_v51 = vld [vmem:[#allocation22_spill] sm:$0xff] }
 0xa73   :  { %v2342_v52 = vpop.f32.mrf.mxu0  ;;  %v2413_v50 = vpop.f32.mrf.mxu1 }
 0xa74   :  { %v2343_v24 = vadd.f32 %v2342_v52, %v2259_v34  ;;  %v2414_v47 = vadd.f32 %v2413_v50, %v2267_v8  ;;  %v6668_v8 = vld [vmem:[#allocation31_spill] sm:$0xff] }
 0xa75   :  { %v2344_v29 = vpop.f32.mrf.mxu0  ;;  %v2415_v54 = vpop.f32.mrf.mxu1 }
 0xa76   :  { %v2418_v46 = vmul.f32 0.5, %v2343_v24  ;;  %v2345_v27 = vadd.f32 %v2344_v29, %v2263_v26  ;;  %v2416_v56 = vadd.f32 %v2415_v54, %v2271_v35  ;;  %v2420_v20 = vmul.f32 0.5, %v2414_v47 }
 0xa77   :  { %v3352_v47 = vrot.slane %v5588_v30, 7  ;;  %v6667_v30 = vld [vmem:[#allocation21_spill] sm:$0xff] }
 0xa78   :  { %3878 = vtanh.f32 %v2418_v46  ;;  %v2419_v43 = vmul.f32 0.5, %v2345_v27 }
 0xa7a   :  { %3880 = vtanh.f32 %v2419_v43 }
 0xa7b   :  { %3882 = vtanh.f32 %v2416_v56 }
 0xa7c   :  { %3884 = vtanh.f32 %v2420_v20  ;;  %v6670_v20 = vld [vmem:[#allocation32_spill] sm:$0xff] }
 0xa85   :  { %v3879_v33 = vpop.eup %3878 }
 0xa86   :  { %v2424_v23 = vmul.f32 0.5, %v3879_v33 }
 0xa87   :  { %v3881_v34 = vpop.eup %3880 }
 0xa88   :  { %v2427_v52 = vadd.f32 0.5, %v2424_v23  ;;  %v2425_v37 = vmul.f32 0.5, %v3881_v34  ;;  %v3883_v29 = vpop.eup %3882  ;;  %v6671_v34 = vld [vmem:[#allocation23_spill] sm:$0xff] }
 0xa89   :  { %v3885_v54 = vpop.eup %3884 }
 0xa8a   :  { %v2428_v24 = vadd.f32 0.5, %v2425_v37  ;;  %v2432_v27 = vmul.f32 %v3883_v29, %v2427_v52  ;;  %v2426_v35 = vmul.f32 0.5, %v3885_v54  ;;  %v6672_v52 = vld [vmem:[#allocation33_spill] sm:$0xff]  ;;  %v6674_v29 = vld [vmem:[#allocation34_spill] sm:$0xff] }
 0xa8b   :  { %v6677_v54 = vld [vmem:[#allocation26_spill] sm:$0xff] }
 0xa8c   :  { %v2431_v46 = vmul.f32 %v2428_v24, %v5585_v12  ;;  %v2429_v43 = vadd.f32 0.5, %v2426_v35  ;;  %v6666_v12 = vld [vmem:[#allocation30_spill] sm:$0xff]  ;;  %v6673_v24 = vld [vmem:[#allocation24_spill] sm:$0xff] }
 0xa8d   :  { %v3372_v37 = vsel %vm1872_vm1, %v6666_v12, %v3352_v47  ;;  %v6678_v35 = vld [vmem:[#allocation36_spill] sm:$0xff]  ;;  %v6684_v12 = vld [vmem:[#allocation42_spill] sm:$0xff] }
 0xa8e   :  { %v5663_v26 = vadd.f32 %v2432_v27, %v2431_v46  ;;  %v6675_v46 = vld [vmem:[#allocation25_spill] sm:$0xff]  ;;  %v6676_v27 = vld [vmem:[#allocation35_spill] sm:$0xff]  ;;  %v6681_v47 = vld [vmem:[#allocation28_spill] sm:$0xff] }
 0xa90   :  { %3886 = vtanh.f32 %v5663_v26 }
 0xa9d   :  { %v3887_v50 = vpop.eup %3886 }
 0xa9e   :  { %v2435_v33 = vmul.f32 %v3887_v50, %v2429_v43  ;;  %v6679_v43 = vld [vmem:[#allocation27_spill] sm:$0xff]  ;;  %v6680_v50 = vld [vmem:[#allocation37_spill] sm:$0xff] }
 0xaa0   :  { %2524 = vmatmul.mubr.f32.vlgmr.msra.gmra.mxu0 %v2435_v33  ;;  %v3355_v23 = vrot.slane %v2435_v33, 6  ;;  %2595 = vmatmul.mubr.f32.vlgmr.msra.gmra.mxu1 %v2435_v33  ;;  %v6682_v33 = vld [vmem:[#allocation19_spill] sm:$0xff] }
 0xaa1   :  { %2643 = vmatpush1.msra.mxu0 %v5306_v11  ;;  %2714 = vmatpush1.msra.mxu1 %v5427_v21 }
 0xaa2   :  { %2644 = vmatprep.subr.mxu0 %v5310_v25  ;;  %2715 = vmatprep.subr.mxu1 %v5431_v5  ;;  %v5674_v56 = vsel %vm1874_vm2, %v3372_v37, %v3355_v23  ;;  %v6683_v23 = vld [vmem:[#allocation17_spill] sm:$0xff]  ;;  %v6685_v37 = vld [vmem:[#allocation38_spill] sm:$0xff] }
 0xaa3   :  { %2645 = vmatpush1.msra.mxu0 %v5318_v57  ;;  %2716 = vmatpush1.msra.mxu1 %v5435_v32 }
 0xaa4   :  { %2646 = vmatprep.subr.mxu0 %v5322_v16  ;;  %2717 = vmatprep.subr.mxu1 %v5439_v60 }
 0xaa5   :  { %2647 = vmatpush1.msra.mxu0 %v5326_v7  ;;  %2718 = vmatpush1.msra.mxu1 %v5443_v17 }
 0xaa6   :  { %2648 = vmatprep.subr.mxu0 %v5330_v1  ;;  %2719 = vmatprep.subr.mxu1 %v5447_v18 }
 0xaa7   :  { %2649 = vmatpush1.msra.mxu0 %v5334_v48  ;;  %2720 = vmatpush1.msra.mxu1 %v5451_v22 }
 0xaa8   :  { %2650 = vmatprep.subr.mxu0 %v5338_v53  ;;  %2721 = vmatprep.subr.mxu1 %v5455_v28 }
 0xaa9   :  { %2651 = vmatpush1.msra.mxu0 %v5342_v55  ;;  %2722 = vmatpush1.msra.mxu1 %v5459_v40 }
 0xaaa   :  { %2652 = vmatprep.subr.mxu0 %v5346_v31  ;;  %2723 = vmatprep.subr.mxu1 %v5463_v42 }
 0xaab   :  { %2653 = vmatpush1.msra.mxu0 %v5350_v49  ;;  %2724 = vmatpush1.msra.mxu1 %v5467_v45 }
 0xaac   :  { %2654 = vmatprep.subr.mxu0 %v5354_v36  ;;  %2725 = vmatprep.subr.mxu1 %v5471_v62 }
 0xaad   :  { %2655 = vmatpush1.msra.mxu0 %v5358_v38  ;;  %2726 = vmatpush1.msra.mxu1 %v5475_v58 }
 0xaae   :  { %2656 = vmatprep.subr.mxu0 %v5362_v39  ;;  %2727 = vmatprep.subr.mxu1 %v5479_v59 }
 0xaaf   :  { %2657 = vmatpush1.msra.mxu0 %v5366_v41  ;;  %2728 = vmatpush1.msra.mxu1 %v5483_v61 }
 0xab0   :  { %2658 = vmatprep.subr.mxu0 %v5370_v10  ;;  %2729 = vmatprep.subr.mxu1 %v5487_v0 }
 0xab1   :  { %2659 = vmatpush1.msra.mxu0 %v5374_v13  ;;  %2730 = vmatpush1.msra.mxu1 %v5491_v63 }
 0xab2   :  { %2660 = vmatprep.subr.mxu0 %v5378_v15  ;;  %2731 = vmatprep.subr.mxu1 %v5495_v2 }
 0xab3   :  { %2661 = vmatpush1.msra.mxu0 %v5498_v4  ;;  %2732 = vmatpush1.msra.mxu1 %v5501_v6 }
 0xab4   :  { %2662 = vmatprep.subr.mxu0 %v5504_v9  ;;  %2733 = vmatprep.subr.mxu1 %v5507_v14 }
 0xab5   :  { %2663 = vmatpush1.msra.mxu0 %v5510_v19  ;;  %2734 = vmatpush1.msra.mxu1 %v6667_v30 }
 0xab6   :  { %2664 = vmatprep.subr.mxu0 %v6668_v8  ;;  %2735 = vmatprep.subr.mxu1 %v6669_v51 }
 0xab7   :  { %2665 = vmatpush1.msra.mxu0 %v6670_v20  ;;  %2736 = vmatpush1.msra.mxu1 %v6671_v34 }
 0xab8   :  { %2666 = vmatprep.subr.mxu0 %v6672_v52  ;;  %2737 = vmatprep.subr.mxu1 %v6673_v24  ;;  %v6692_v24 = vld [vmem:[#allocation41_spill] sm:$0xff] }
 0xab9   :  { %2667 = vmatpush1.msra.mxu0 %v6674_v29  ;;  %2738 = vmatpush1.msra.mxu1 %v6675_v46  ;;  %v6686_v46 = vld [vmem:[#allocation29_spill] sm:$0xff] }
 0xaba   :  { %2668 = vmatprep.subr.mxu0 %v6676_v27  ;;  %2739 = vmatprep.subr.mxu1 %v6677_v54  ;;  %v6687_v27 = vmov 0.0   ;;  %v6688_v54 = vld [vmem:[#allocation43_spill] sm:$0xff] }
 0xabb   :  { %2669 = vmatpush1.msra.mxu0 %v6678_v35  ;;  %2740 = vmatpush1.msra.mxu1 %v6679_v43  ;;  %v6689_v43 = vld [vmem:[#allocation39_spill] sm:$0xff] }
 0xabc   :  { %2670 = vmatprep.subr.mxu0 %v6680_v50  ;;  %2741 = vmatprep.subr.mxu1 %v6681_v47  ;;  %v6690_v50 = vld [vmem:[#allocation20_spill] sm:$0xff] }
 0xabd   :  { %2671 = vmatpush1.msra.mxu0 %v6682_v33  ;;  %2742 = vmatpush1.msra.mxu1 %v6683_v23  ;;  %v2437_v47 = vld [vmem:[#allocation2 + $0x23] ss:$8 sm:$0xf] }
 0xabe   :  { %2672 = vmatprep.subr.mxu0 %v6684_v12  ;;  %2743 = vmatprep.subr.mxu1 %v6685_v37  ;;  %v6691_v33 = vld [vmem:[#allocation40_spill] sm:$0xff]  ;;  %v2446_v37 = vrot.slane %v2437_v47, %v6692_v24 }
 0xabf   :  { %2673 = vmatpush1.msra.mxu0 %v6686_v46  ;;  %2706 = vmatprep.mubr.f32.mxu0 %v6687_v27  ;;  %v2442_v35 = vrot.slane %v2437_v47, %v6691_v33 }
 0xac0   :  { %2744 = vmatpush1.msra.mxu1 %v6688_v54  ;;  %2777 = vmatprep.mubr.f32.mxu1 %v6687_v27  ;;  %v2454_v27 = vrot.slane %v2437_v47, %v4617_v44 }
 0xac1   :  { %2825 = vmatprep.subr.mxu0 %v6689_v43  ;;  %2896 = vmatprep.subr.mxu1 %v6690_v50  ;;  %v2450_v50 = vrot.slane %v2437_v47, %v4615_v3  ;;  %v5814_v47 = vld [vmem:[#allocation9 + $0x1e8] sm:$0xff] }
 0xac2   :  { %6715 = vst [vmem:[#allocation30_spill] sm:$0xff] %v5814_v47 }
 0xb60   :  { %v2525_v23 = vpop.f32.mrf.mxu0  ;;  %v2596_v29 = vpop.f32.mrf.mxu1 }
 0xb61   :  { %v2526_v12 = vadd.f32 %v2525_v23, %v2442_v35  ;;  %v2597_v51 = vadd.f32 %v2596_v29, %v2450_v50  ;;  %v6714_v50 = vld [vmem:[#allocation43_spill] sm:$0xff] }
 0xb62   :  { %v2527_v52 = vpop.f32.mrf.mxu0  ;;  %v2598_v20 = vpop.f32.mrf.mxu1 }
 0xb63   :  { %v2601_v46 = vmul.f32 0.5, %v2526_v12  ;;  %v2528_v34 = vadd.f32 %v2527_v52, %v2446_v37  ;;  %v2599_v43 = vadd.f32 %v2598_v20, %v2454_v27  ;;  %v2603_v33 = vmul.f32 0.5, %v2597_v51 }
 0xb65   :  { %3888 = vtanh.f32 %v2601_v46  ;;  %v2602_v54 = vmul.f32 0.5, %v2528_v34 }
 0xb67   :  { %3890 = vtanh.f32 %v2602_v54 }
 0xb68   :  { %3892 = vtanh.f32 %v2599_v43  ;;  %v2620_v43 = vld [vmem:[#allocation2 + $0x24] ss:$8 sm:$0xf] }
 0xb69   :  { %3894 = vtanh.f32 %v2603_v33  ;;  %v6716_v33 = vld [vmem:[#allocation20_spill] sm:$0xff] }
 0xb72   :  { %v3889_v8 = vpop.eup %3888 }
 0xb73   :  { %v2607_v30 = vmul.f32 0.5, %v3889_v8 }
 0xb74   :  { %v3891_v35 = vpop.eup %3890 }
 0xb75   :  { %v2610_v23 = vadd.f32 0.5, %v2607_v30  ;;  %v2608_v24 = vmul.f32 0.5, %v3891_v35  ;;  %v3893_v52 = vpop.eup %3892  ;;  %v6712_v30 = vld [vmem:[#allocation29_spill] sm:$0xff]  ;;  %v6717_v35 = vld [vmem:[#allocation40_spill] sm:$0xff] }
 0xb76   :  { %v3895_v20 = vpop.eup %3894 }
 0xb77   :  { %v2611_v12 = vadd.f32 0.5, %v2608_v24  ;;  %v2615_v34 = vmul.f32 %v3893_v52, %v2610_v23  ;;  %v2609_v27 = vmul.f32 0.5, %v3895_v20  ;;  %v6713_v24 = vmov 0.0  }
 0xb78   :  { %v2625_v23 = vrot.slane %v2620_v43, %v6717_v35 }
 0xb79   :  { %v2614_v46 = vmul.f32 %v2611_v12, %v5663_v26  ;;  %v2612_v54 = vadd.f32 0.5, %v2609_v27 }
 0xb7b   :  { %v5743_v37 = vadd.f32 %v2615_v34, %v2614_v46  ;;  %v6718_v34 = vld [vmem:[#allocation41_spill] sm:$0xff] }
 0xb7c   :  { %v2629_v20 = vrot.slane %v2620_v43, %v6718_v34 }
 0xb7d   :  { %3896 = vtanh.f32 %v5743_v37 }
 0xb8a   :  { %v3897_v29 = vpop.eup %3896 }
 0xb8b   :  { %v2618_v51 = vmul.f32 %v3897_v29, %v2612_v54 }
 0xb8d   :  { %2707 = vmatmul.mubr.f32.vlgmr.msra.gmra.mxu0 %v2618_v51  ;;  %v3358_v8 = vrot.slane %v2618_v51, 5  ;;  %2778 = vmatmul.mubr.f32.vlgmr.msra.gmra.mxu1 %v2618_v51 }
 0xb8e   :  { %2826 = vmatpush1.msra.mxu0 %v5306_v11  ;;  %2897 = vmatpush1.msra.mxu1 %v5427_v21  ;;  %v6693_v11 = vld [vmem:[#allocation21_spill] sm:$0xff] }
 0xb8f   :  { %2827 = vmatprep.subr.mxu0 %v5310_v25  ;;  %2898 = vmatprep.subr.mxu1 %v5431_v5  ;;  %v5752_v26 = vsel %vm1876_vm3, %v5674_v56, %v3358_v8  ;;  %v6694_v25 = vld [vmem:[#allocation31_spill] sm:$0xff]  ;;  %v6711_v56 = vld [vmem:[#allocation38_spill] sm:$0xff] }
 0xb90   :  { %2828 = vmatpush1.msra.mxu0 %v5318_v57  ;;  %2899 = vmatpush1.msra.mxu1 %v5435_v32  ;;  %v6695_v57 = vld [vmem:[#allocation22_spill] sm:$0xff] }
 0xb91   :  { %2829 = vmatprep.subr.mxu0 %v5322_v16  ;;  %2900 = vmatprep.subr.mxu1 %v5439_v60  ;;  %v6696_v16 = vld [vmem:[#allocation32_spill] sm:$0xff] }
 0xb92   :  { %2830 = vmatpush1.msra.mxu0 %v5326_v7  ;;  %2901 = vmatpush1.msra.mxu1 %v5443_v17  ;;  %v6697_v7 = vld [vmem:[#allocation23_spill] sm:$0xff] }
 0xb93   :  { %2831 = vmatprep.subr.mxu0 %v5330_v1  ;;  %2902 = vmatprep.subr.mxu1 %v5447_v18  ;;  %v6698_v1 = vld [vmem:[#allocation33_spill] sm:$0xff] }
 0xb94   :  { %2832 = vmatpush1.msra.mxu0 %v5334_v48  ;;  %2903 = vmatpush1.msra.mxu1 %v5451_v22  ;;  %v6699_v48 = vld [vmem:[#allocation24_spill] sm:$0xff] }
 0xb95   :  { %2833 = vmatprep.subr.mxu0 %v5338_v53  ;;  %2904 = vmatprep.subr.mxu1 %v5455_v28  ;;  %v6700_v53 = vld [vmem:[#allocation34_spill] sm:$0xff] }
 0xb96   :  { %2834 = vmatpush1.msra.mxu0 %v5342_v55  ;;  %2905 = vmatpush1.msra.mxu1 %v5459_v40  ;;  %v6701_v55 = vld [vmem:[#allocation25_spill] sm:$0xff] }
 0xb97   :  { %2835 = vmatprep.subr.mxu0 %v5346_v31  ;;  %2906 = vmatprep.subr.mxu1 %v5463_v42  ;;  %v6702_v31 = vld [vmem:[#allocation35_spill] sm:$0xff] }
 0xb98   :  { %2836 = vmatpush1.msra.mxu0 %v5350_v49  ;;  %2907 = vmatpush1.msra.mxu1 %v5467_v45  ;;  %v6703_v49 = vld [vmem:[#allocation26_spill] sm:$0xff] }
 0xb99   :  { %2837 = vmatprep.subr.mxu0 %v5354_v36  ;;  %2908 = vmatprep.subr.mxu1 %v5471_v62  ;;  %v6704_v36 = vld [vmem:[#allocation36_spill] sm:$0xff] }
 0xb9a   :  { %2838 = vmatpush1.msra.mxu0 %v5358_v38  ;;  %2909 = vmatpush1.msra.mxu1 %v5475_v58  ;;  %v6705_v38 = vld [vmem:[#allocation27_spill] sm:$0xff] }
 0xb9b   :  { %2839 = vmatprep.subr.mxu0 %v5362_v39  ;;  %2910 = vmatprep.subr.mxu1 %v5479_v59  ;;  %v6706_v39 = vld [vmem:[#allocation37_spill] sm:$0xff] }
 0xb9c   :  { %2840 = vmatpush1.msra.mxu0 %v5366_v41  ;;  %2911 = vmatpush1.msra.mxu1 %v5483_v61  ;;  %v6707_v41 = vld [vmem:[#allocation28_spill] sm:$0xff] }
 0xb9d   :  { %2841 = vmatprep.subr.mxu0 %v5370_v10  ;;  %2912 = vmatprep.subr.mxu1 %v5487_v0  ;;  %v6708_v10 = vld [vmem:[#allocation19_spill] sm:$0xff] }
 0xb9e   :  { %2842 = vmatpush1.msra.mxu0 %v5374_v13  ;;  %2913 = vmatpush1.msra.mxu1 %v5491_v63  ;;  %v6709_v13 = vld [vmem:[#allocation17_spill] sm:$0xff] }
 0xb9f   :  { %2843 = vmatprep.subr.mxu0 %v5378_v15  ;;  %2914 = vmatprep.subr.mxu1 %v5495_v2  ;;  %v6710_v15 = vld [vmem:[#allocation42_spill] sm:$0xff] }
 0xba0   :  { %2844 = vmatpush1.msra.mxu0 %v5498_v4  ;;  %2915 = vmatpush1.msra.mxu1 %v5501_v6 }
 0xba1   :  { %2845 = vmatprep.subr.mxu0 %v5504_v9  ;;  %2916 = vmatprep.subr.mxu1 %v5507_v14 }
 0xba2   :  { %2846 = vmatpush1.msra.mxu0 %v5510_v19  ;;  %2917 = vmatpush1.msra.mxu1 %v6693_v11 }
 0xba3   :  { %2847 = vmatprep.subr.mxu0 %v6694_v25  ;;  %2918 = vmatprep.subr.mxu1 %v6695_v57 }
 0xba4   :  { %2848 = vmatpush1.msra.mxu0 %v6696_v16  ;;  %2919 = vmatpush1.msra.mxu1 %v6697_v7 }
 0xba5   :  { %2849 = vmatprep.subr.mxu0 %v6698_v1  ;;  %2920 = vmatprep.subr.mxu1 %v6699_v48 }
 0xba6   :  { %2850 = vmatpush1.msra.mxu0 %v6700_v53  ;;  %2921 = vmatpush1.msra.mxu1 %v6701_v55 }
 0xba7   :  { %2851 = vmatprep.subr.mxu0 %v6702_v31  ;;  %2922 = vmatprep.subr.mxu1 %v6703_v49 }
 0xba8   :  { %2852 = vmatpush1.msra.mxu0 %v6704_v36  ;;  %2923 = vmatpush1.msra.mxu1 %v6705_v38 }
 0xba9   :  { %2853 = vmatprep.subr.mxu0 %v6706_v39  ;;  %2924 = vmatprep.subr.mxu1 %v6707_v41 }
 0xbaa   :  { %2854 = vmatpush1.msra.mxu0 %v6708_v10  ;;  %2925 = vmatpush1.msra.mxu1 %v6709_v13 }
 0xbab   :  { %2855 = vmatprep.subr.mxu0 %v6710_v15  ;;  %2926 = vmatprep.subr.mxu1 %v6711_v56 }
 0xbac   :  { %2856 = vmatpush1.msra.mxu0 %v6712_v30  ;;  %2889 = vmatprep.mubr.f32.mxu0 %v6713_v24 }
 0xbad   :  { %2927 = vmatpush1.msra.mxu1 %v6714_v50  ;;  %2960 = vmatprep.mubr.f32.mxu1 %v6713_v24  ;;  %v2637_v50 = vrot.slane %v2620_v43, %v4617_v44 }
 0xbae   :  { %3008 = vmatprep.subr.mxu0 %v5814_v47  ;;  %3079 = vmatprep.subr.mxu1 %v6716_v33  ;;  %v2633_v33 = vrot.slane %v2620_v43, %v4615_v3 }
 0xc4d   :  { %v2708_v12 = vpop.f32.mrf.mxu0  ;;  %v2779_v52 = vpop.f32.mrf.mxu1 }
 0xc4e   :  { %v2709_v46 = vadd.f32 %v2708_v12, %v2625_v23  ;;  %v2780_v24 = vadd.f32 %v2779_v52, %v2633_v33 }
 0xc4f   :  { %v2710_v27 = vpop.f32.mrf.mxu0  ;;  %v2781_v51 = vpop.f32.mrf.mxu1 }
 0xc50   :  { %v2784_v54 = vmul.f32 0.5, %v2709_v46  ;;  %v2711_v29 = vadd.f32 %v2710_v27, %v2629_v20  ;;  %v2782_v47 = vadd.f32 %v2781_v51, %v2637_v50  ;;  %v2786_v35 = vmul.f32 0.5, %v2780_v24  ;;  %v5842_v51 = vld [vmem:[#allocation9 + $0x1a8] sm:$0xff] }
 0xc52   :  { %3898 = vtanh.f32 %v2784_v54  ;;  %v2785_v8 = vmul.f32 0.5, %v2711_v29 }
 0xc54   :  { %3900 = vtanh.f32 %v2785_v8 }
 0xc55   :  { %3902 = vtanh.f32 %v2782_v47 }
 0xc56   :  { %3904 = vtanh.f32 %v2786_v35 }
 0xc5f   :  { %v3899_v30 = vpop.eup %3898 }
 0xc60   :  { %v2790_v56 = vmul.f32 0.5, %v3899_v30 }
 0xc61   :  { %v3901_v23 = vpop.eup %3900 }
 0xc62   :  { %v2793_v12 = vadd.f32 0.5, %v2790_v56  ;;  %v2791_v34 = vmul.f32 0.5, %v3901_v23  ;;  %v3903_v20 = vpop.eup %3902  ;;  %v5826_v56 = vld [vmem:[#allocation9 + $0x1e0] sm:$0xff] }
 0xc63   :  { %v3905_v50 = vpop.eup %3904 }
 0xc64   :  { %v2794_v46 = vadd.f32 0.5, %v2791_v34  ;;  %v2798_v54 = vmul.f32 %v3903_v20, %v2793_v12  ;;  %v2792_v43 = vmul.f32 0.5, %v3905_v50  ;;  %v5838_v34 = vld [vmem:[#allocation9 + $0x1c0] sm:$0xff] }
 0xc66   :  { %v2797_v27 = vmul.f32 %v2794_v46, %v5743_v37  ;;  %v2795_v47 = vadd.f32 0.5, %v2792_v43  ;;  %v5830_v37 = vld [vmem:[#allocation9 + $0x1c8] sm:$0xff] }
 0xc68   :  { %v5823_v29 = vadd.f32 %v2798_v54, %v2797_v27 }
 0xc6a   :  { %3906 = vtanh.f32 %v5823_v29 }
 0xc77   :  { %v3907_v52 = vpop.eup %3906 }
 0xc78   :  { %v2801_v24 = vmul.f32 %v3907_v52, %v2795_v47 }
 0xc7a   :  { %2890 = vmatmul.mubr.f32.vlgmr.msra.gmra.mxu0 %v2801_v24  ;;  %v3361_v30 = vrot.slane %v2801_v24, 4  ;;  %2961 = vmatmul.mubr.f32.vlgmr.msra.gmra.mxu1 %v2801_v24  ;;  %v5943_v24 = vld [vmem:[#allocation9 + $0x1f0] sm:$0xff] }
 0xc7b   :  { %3009 = vmatpush1.msra.mxu0 %v5826_v56  ;;  %3080 = vmatpush1.msra.mxu1 %v5427_v21  ;;  %v5846_v21 = vld [vmem:[#allocation9 + $0x1a0] sm:$0xff] }
 0xc7c   :  { %3010 = vmatprep.subr.mxu0 %v5830_v37  ;;  %3081 = vmatprep.subr.mxu1 %v5431_v5  ;;  %v5836_v35 = vsel %vm1878_vm4, %v5752_v26, %v3361_v30  ;;  %v5850_v5 = vld [vmem:[#allocation9 + $0x188] sm:$0xff]  ;;  %v5854_v26 = vld [vmem:[#allocation9 + $0x180] sm:$0xff] }
 0xc7d   :  { %3011 = vmatpush1.msra.mxu0 %v5838_v34  ;;  %3082 = vmatpush1.msra.mxu1 %v5435_v32  ;;  %v5858_v32 = vld [vmem:[#allocation9 + $0x168] sm:$0xff] }
 0xc7e   :  { %3012 = vmatprep.subr.mxu0 %v5842_v51  ;;  %3083 = vmatprep.subr.mxu1 %v5439_v60  ;;  %v5862_v60 = vld [vmem:[#allocation9 + $0x160] sm:$0xff] }
 0xc7f   :  { %3013 = vmatpush1.msra.mxu0 %v5846_v21  ;;  %3084 = vmatpush1.msra.mxu1 %v5443_v17  ;;  %v5866_v17 = vld [vmem:[#allocation9 + $0x148] sm:$0xff] }
 0xc80   :  { %3014 = vmatprep.subr.mxu0 %v5850_v5  ;;  %3085 = vmatprep.subr.mxu1 %v5447_v18  ;;  %v5870_v18 = vld [vmem:[#allocation9 + $0x140] sm:$0xff] }
 0xc81   :  { %3015 = vmatpush1.msra.mxu0 %v5854_v26  ;;  %3086 = vmatpush1.msra.mxu1 %v5451_v22  ;;  %v5874_v22 = vld [vmem:[#allocation9 + $0x128] sm:$0xff] }
 0xc82   :  { %3016 = vmatprep.subr.mxu0 %v5858_v32  ;;  %3087 = vmatprep.subr.mxu1 %v5455_v28  ;;  %v5878_v28 = vld [vmem:[#allocation9 + $0x120] sm:$0xff] }
 0xc83   :  { %3017 = vmatpush1.msra.mxu0 %v5862_v60  ;;  %3088 = vmatpush1.msra.mxu1 %v5459_v40  ;;  %v5882_v40 = vld [vmem:[#allocation9 + $0x108] sm:$0xff] }
 0xc84   :  { %3018 = vmatprep.subr.mxu0 %v5866_v17  ;;  %3089 = vmatprep.subr.mxu1 %v5463_v42  ;;  %v5886_v42 = vld [vmem:[#allocation9 + $0x100] sm:$0xff] }
 0xc85   :  { %3019 = vmatpush1.msra.mxu0 %v5870_v18  ;;  %3090 = vmatpush1.msra.mxu1 %v5467_v45  ;;  %v5890_v45 = vld [vmem:[#allocation9 + $0xe8] sm:$0xff] }
 0xc86   :  { %3020 = vmatprep.subr.mxu0 %v5874_v22  ;;  %3091 = vmatprep.subr.mxu1 %v5471_v62  ;;  %v5894_v62 = vld [vmem:[#allocation9 + $0xe0] sm:$0xff] }
 0xc87   :  { %3021 = vmatpush1.msra.mxu0 %v5878_v28  ;;  %3092 = vmatpush1.msra.mxu1 %v5475_v58  ;;  %v5898_v58 = vld [vmem:[#allocation9 + $0xc8] sm:$0xff] }
 0xc88   :  { %3022 = vmatprep.subr.mxu0 %v5882_v40  ;;  %3093 = vmatprep.subr.mxu1 %v5479_v59  ;;  %v6719_v59 = vld [vmem:[#allocation38_spill] sm:$0xff] }
 0xc89   :  { %3023 = vmatpush1.msra.mxu0 %v5886_v42  ;;  %3094 = vmatpush1.msra.mxu1 %v5483_v61  ;;  %v6720_v61 = vld [vmem:[#allocation29_spill] sm:$0xff] }
 0xc8a   :  { %3024 = vmatprep.subr.mxu0 %v5890_v45  ;;  %3095 = vmatprep.subr.mxu1 %v5487_v0  ;;  %v6721_v0 = vmov 0.0  }
 0xc8b   :  { %3025 = vmatpush1.msra.mxu0 %v5894_v62  ;;  %3096 = vmatpush1.msra.mxu1 %v5491_v63  ;;  %v6722_v63 = vld [vmem:[#allocation43_spill] sm:$0xff] }
 0xc8c   :  { %3026 = vmatprep.subr.mxu0 %v5898_v58  ;;  %3097 = vmatprep.subr.mxu1 %v5495_v2  ;;  %v6723_v2 = vld [vmem:[#allocation30_spill] sm:$0xff] }
 0xc8d   :  { %3027 = vmatpush1.msra.mxu0 %v5498_v4  ;;  %3098 = vmatpush1.msra.mxu1 %v5501_v6  ;;  %v5931_v4 = vld [vmem:[#allocation9 + $0x1f8] sm:$0xff] }
 0xc8e   :  { %3028 = vmatprep.subr.mxu0 %v5504_v9  ;;  %3099 = vmatprep.subr.mxu1 %v5507_v14  ;;  %v2803_v6 = vld [vmem:[#allocation2 + $0x25] ss:$8 sm:$0xf] }
 0xc8f   :  { %3029 = vmatpush1.msra.mxu0 %v5510_v19  ;;  %3100 = vmatpush1.msra.mxu1 %v6693_v11  ;;  %v6724_v9 = vld [vmem:[#allocation40_spill] sm:$0xff] }
 0xc90   :  { %3030 = vmatprep.subr.mxu0 %v6694_v25  ;;  %3101 = vmatprep.subr.mxu1 %v6695_v57  ;;  %v2808_v14 = vrot.slane %v2803_v6, %v6724_v9  ;;  %v6725_v57 = vld [vmem:[#allocation41_spill] sm:$0xff] }
 0xc91   :  { %3031 = vmatpush1.msra.mxu0 %v6696_v16  ;;  %3102 = vmatpush1.msra.mxu1 %v6697_v7  ;;  %v2812_v16 = vrot.slane %v2803_v6, %v6725_v57 }
 0xc92   :  { %3032 = vmatprep.subr.mxu0 %v6698_v1  ;;  %3103 = vmatprep.subr.mxu1 %v6699_v48 }
 0xc93   :  { %3033 = vmatpush1.msra.mxu0 %v6700_v53  ;;  %3104 = vmatpush1.msra.mxu1 %v6701_v55 }
 0xc94   :  { %3034 = vmatprep.subr.mxu0 %v6702_v31  ;;  %3105 = vmatprep.subr.mxu1 %v6703_v49  ;;  %v2820_v31 = vrot.slane %v2803_v6, %v4617_v44 }
 0xc95   :  { %3035 = vmatpush1.msra.mxu0 %v6704_v36  ;;  %3106 = vmatpush1.msra.mxu1 %v6705_v38  ;;  %v2816_v36 = vrot.slane %v2803_v6, %v4615_v3  ;;  %v5971_v6 = vld [vmem:[#allocation9 + $0x190] sm:$0xff] }
 0xc96   :  { %3036 = vmatprep.subr.mxu0 %v6706_v39  ;;  %3107 = vmatprep.subr.mxu1 %v6707_v41 }
 0xc97   :  { %3037 = vmatpush1.msra.mxu0 %v6708_v10  ;;  %3108 = vmatpush1.msra.mxu1 %v6709_v13 }
 0xc98   :  { %3038 = vmatprep.subr.mxu0 %v6710_v15  ;;  %3109 = vmatprep.subr.mxu1 %v6719_v59  ;;  %v5955_v59 = vld [vmem:[#allocation9 + $0x1d0] sm:$0xff] }
 0xc99   :  { %3039 = vmatpush1.msra.mxu0 %v6720_v61  ;;  %3072 = vmatprep.mubr.f32.mxu0 %v6721_v0  ;;  %v5959_v61 = vld [vmem:[#allocation9 + $0x1b8] sm:$0xff] }
 0xc9a   :  { %3110 = vmatpush1.msra.mxu1 %v6722_v63  ;;  %3143 = vmatprep.mubr.f32.mxu1 %v6721_v0  ;;  %v5963_v63 = vld [vmem:[#allocation9 + $0x1b0] sm:$0xff] }
 0xc9b   :  { %3191 = vmatprep.subr.mxu0 %v6723_v2  ;;  %3262 = vmatprep.subr.mxu1 %v5931_v4 }
 0xd3a   :  { %v2891_v19 = vpop.f32.mrf.mxu0  ;;  %v2962_v11 = vpop.f32.mrf.mxu1 }
 0xd3b   :  { %v2892_v25 = vadd.f32 %v2891_v19, %v2808_v14  ;;  %v2963_v38 = vadd.f32 %v2962_v11, %v2816_v36  ;;  %v5975_v14 = vld [vmem:[#allocation9 + $0x178] sm:$0xff]  ;;  %v5979_v19 = vld [vmem:[#allocation9 + $0x170] sm:$0xff] }
 0xd3c   :  { %v2893_v7 = vpop.f32.mrf.mxu0  ;;  %v2964_v53 = vpop.f32.mrf.mxu1  ;;  %v5983_v11 = vld [vmem:[#allocation9 + $0x158] sm:$0xff]  ;;  %v6021_v36 = vld [vmem:[#allocation9 + $0xd0] sm:$0xff] }
 0xd3d   :  { %v2967_v1 = vmul.f32 0.5, %v2892_v25  ;;  %v2894_v48 = vadd.f32 %v2893_v7, %v2812_v16  ;;  %v2965_v49 = vadd.f32 %v2964_v53, %v2820_v31  ;;  %v2969_v39 = vmul.f32 0.5, %v2963_v38  ;;  %v5987_v25 = vld [vmem:[#allocation9 + $0x150] sm:$0xff]  ;;  %v5991_v16 = vld [vmem:[#allocation9 + $0x138] sm:$0xff]  ;;  %v6024_v38 = vld [vmem:[#allocation9 + $0xa8] sm:$0xff] }
 0xd3e   :  { %v5995_v7 = vld [vmem:[#allocation9 + $0x130] sm:$0xff]  ;;  %v6007_v53 = vld [vmem:[#allocation9 + $0xf8] sm:$0xff] }
 0xd3f   :  { %3908 = vtanh.f32 %v2967_v1  ;;  %v2968_v55 = vmul.f32 0.5, %v2894_v48  ;;  %v5999_v1 = vld [vmem:[#allocation9 + $0x118] sm:$0xff]  ;;  %v6003_v48 = vld [vmem:[#allocation9 + $0x110] sm:$0xff] }
 0xd40   :  { %v6015_v31 = vld [vmem:[#allocation9 + $0xd8] sm:$0xff] }
 0xd41   :  { %3910 = vtanh.f32 %v2968_v55  ;;  %v6011_v55 = vld [vmem:[#allocation9 + $0xf0] sm:$0xff] }
 0xd42   :  { %3912 = vtanh.f32 %v2965_v49  ;;  %v6018_v49 = vld [vmem:[#allocation9 + $0xc0] sm:$0xff] }
 0xd43   :  { %3914 = vtanh.f32 %v2969_v39  ;;  %v6027_v39 = vld [vmem:[#allocation9 + $0xb8] sm:$0xff] }
 0xd4c   :  { %v3909_v41 = vpop.eup %3908 }
 0xd4d   :  { %v2973_v10 = vmul.f32 0.5, %v3909_v41  ;;  %v6030_v41 = vld [vmem:[#allocation9 + $0xa0] sm:$0xff] }
 0xd4e   :  { %v3911_v13 = vpop.eup %3910 }
 0xd4f   :  { %v2976_v15 = vadd.f32 0.5, %v2973_v10  ;;  %v2974_v8 = vmul.f32 0.5, %v3911_v13  ;;  %v3913_v23 = vpop.eup %3912  ;;  %v6033_v10 = vld [vmem:[#allocation9 + $0xb0] sm:$0xff]  ;;  %v6036_v13 = vld [vmem:[#allocation9 + $0x88] sm:$0xff] }
 0xd50   :  { %v3915_v27 = vpop.eup %3914  ;;  %6726 = vst [vmem:[#allocation39_spill] sm:$0xff] %v6033_v10  ;;  %6727 = vst [vmem:[#allocation21_spill] sm:$0xff] %v6036_v13 }
 0xd51   :  { %v2977_v33 = vadd.f32 0.5, %v2974_v8  ;;  %v2981_v46 = vmul.f32 %v3913_v23, %v2976_v15  ;;  %v2975_v54 = vmul.f32 0.5, %v3915_v27  ;;  %v6039_v15 = vld [vmem:[#allocation9 + $0x98] sm:$0xff]  ;;  %v6042_v8 = vld [vmem:[#allocation9 + $0x80] sm:$0xff]  ;;  %v6048_v23 = vld [vmem:[#allocation9 + $0x68] sm:$0xff] }
 0xd52   :  { %6728 = vst [vmem:[#allocation31_spill] sm:$0xff] %v6039_v15  ;;  %6729 = vst [vmem:[#allocation22_spill] sm:$0xff] %v6042_v8  ;;  %v6057_v27 = vld [vmem:[#allocation9 + $0x70] sm:$0xff] }
 0xd53   :  { %v2980_v12 = vmul.f32 %v2977_v33, %v5823_v29  ;;  %v2978_v50 = vadd.f32 0.5, %v2975_v54  ;;  %v5947_v29 = vld [vmem:[#allocation9 + $0x1d8] sm:$0xff]  ;;  %v6045_v33 = vld [vmem:[#allocation9 + $0x90] sm:$0xff]  ;;  %6731 = vst [vmem:[#allocation23_spill] sm:$0xff] %v6048_v23  ;;  %6734 = vst [vmem:[#allocation34_spill] sm:$0xff] %v6057_v27 }
 0xd54   :  { %6730 = vst [vmem:[#allocation32_spill] sm:$0xff] %v6045_v33  ;;  %v6060_v54 = vld [vmem:[#allocation9 + $0x48] sm:$0xff] }
 0xd55   :  { %v5939_v20 = vadd.f32 %v2981_v46, %v2980_v12  ;;  %v6051_v12 = vld [vmem:[#allocation9 + $0x78] sm:$0xff]  ;;  %v6054_v46 = vld [vmem:[#allocation9 + $0x60] sm:$0xff]  ;;  %6735 = vst [vmem:[#allocation25_spill] sm:$0xff] %v6060_v54 }
 0xd56   :  { %6732 = vst [vmem:[#allocation33_spill] sm:$0xff] %v6051_v12  ;;  %6733 = vst [vmem:[#allocation24_spill] sm:$0xff] %v6054_v46 }
 0xd57   :  { %3916 = vtanh.f32 %v5939_v20 }
 0xd64   :  { %v3917_v43 = vpop.eup %3916 }
 0xd65   :  { %v2984_v47 = vmul.f32 %v3917_v43, %v2978_v50  ;;  %v6063_v50 = vld [vmem:[#allocation9 + $0x58] sm:$0xff]  ;;  %v6066_v43 = vld [vmem:[#allocation9 + $0x40] sm:$0xff] }
 0xd66   :  { %6736 = vst [vmem:[#allocation35_spill] sm:$0xff] %v6063_v50  ;;  %6737 = vst [vmem:[#allocation26_spill] sm:$0xff] %v6066_v43 }
 0xd67   :  { %3073 = vmatmul.mubr.f32.vlgmr.msra.gmra.mxu0 %v2984_v47  ;;  %3144 = vmatmul.mubr.f32.vlgmr.msra.gmra.mxu1 %v2984_v47  ;;  %v3364_v52 = vrot.slane %v2984_v47, 3  ;;  %v6069_v47 = vld [vmem:[#allocation9 + $0x50] sm:$0xff] }
 0xd68   :  { %3192 = vmatpush1.msra.mxu0 %v5826_v56  ;;  %3263 = vmatpush1.msra.mxu1 %v5943_v24  ;;  %6738 = vst [vmem:[#allocation36_spill] sm:$0xff] %v6069_v47 }
 0xd69   :  { %3193 = vmatprep.subr.mxu0 %v5830_v37  ;;  %3264 = vmatprep.subr.mxu1 %v5947_v29  ;;  %v5952_v30 = vsel %vm1880_vm5, %v5836_v35, %v3364_v52  ;;  %v5967_v35 = vld [vmem:[#allocation9 + $0x198] sm:$0xff]  ;;  %v6072_v52 = vld [vmem:[#allocation9 + $0x28] sm:$0xff] }
 0xd6a   :  { %3194 = vmatpush1.msra.mxu0 %v5838_v34  ;;  %3265 = vmatpush1.msra.mxu1 %v5955_v59  ;;  %6739 = vst [vmem:[#allocation27_spill] sm:$0xff] %v6072_v52 }
 0xd6b   :  { %3195 = vmatprep.subr.mxu0 %v5842_v51  ;;  %3266 = vmatprep.subr.mxu1 %v5959_v61 }
 0xd6c   :  { %3196 = vmatpush1.msra.mxu0 %v5846_v21  ;;  %3267 = vmatpush1.msra.mxu1 %v5963_v63 }
 0xd6d   :  { %3197 = vmatprep.subr.mxu0 %v5850_v5  ;;  %3268 = vmatprep.subr.mxu1 %v5967_v35 }
 0xd6e   :  { %3198 = vmatpush1.msra.mxu0 %v5854_v26  ;;  %3269 = vmatpush1.msra.mxu1 %v5971_v6 }
 0xd6f   :  { %3199 = vmatprep.subr.mxu0 %v5858_v32  ;;  %3270 = vmatprep.subr.mxu1 %v5975_v14 }
 0xd70   :  { %3200 = vmatpush1.msra.mxu0 %v5862_v60  ;;  %3271 = vmatpush1.msra.mxu1 %v5979_v19 }
 0xd71   :  { %3201 = vmatprep.subr.mxu0 %v5866_v17  ;;  %3272 = vmatprep.subr.mxu1 %v5983_v11 }
 0xd72   :  { %3202 = vmatpush1.msra.mxu0 %v5870_v18  ;;  %3273 = vmatpush1.msra.mxu1 %v5987_v25 }
 0xd73   :  { %3203 = vmatprep.subr.mxu0 %v5874_v22  ;;  %3274 = vmatprep.subr.mxu1 %v5991_v16 }
 0xd74   :  { %3204 = vmatpush1.msra.mxu0 %v5878_v28  ;;  %3275 = vmatpush1.msra.mxu1 %v5995_v7 }
 0xd75   :  { %3205 = vmatprep.subr.mxu0 %v5882_v40  ;;  %3276 = vmatprep.subr.mxu1 %v5999_v1 }
 0xd76   :  { %3206 = vmatpush1.msra.mxu0 %v5886_v42  ;;  %3277 = vmatpush1.msra.mxu1 %v6003_v48 }
 0xd77   :  { %3207 = vmatprep.subr.mxu0 %v5890_v45  ;;  %3278 = vmatprep.subr.mxu1 %v6007_v53 }
 0xd78   :  { %3208 = vmatpush1.msra.mxu0 %v5894_v62  ;;  %3279 = vmatpush1.msra.mxu1 %v6011_v55 }
 0xd79   :  { %3209 = vmatprep.subr.mxu0 %v5898_v58  ;;  %3280 = vmatprep.subr.mxu1 %v6015_v31 }
 0xd7a   :  { %3210 = vmatpush1.msra.mxu0 %v6018_v49  ;;  %3281 = vmatpush1.msra.mxu1 %v6021_v36 }
 0xd7b   :  { %3211 = vmatprep.subr.mxu0 %v6024_v38  ;;  %3282 = vmatprep.subr.mxu1 %v6027_v39 }
 0xd7c   :  { %3212 = vmatpush1.msra.mxu0 %v6030_v41  ;;  %3283 = vmatpush1.msra.mxu1 %v6033_v10 }
 0xd7d   :  { %3213 = vmatprep.subr.mxu0 %v6036_v13  ;;  %3284 = vmatprep.subr.mxu1 %v6039_v15 }
 0xd7e   :  { %3214 = vmatpush1.msra.mxu0 %v6042_v8  ;;  %3285 = vmatpush1.msra.mxu1 %v6045_v33 }
 0xd7f   :  { %3215 = vmatprep.subr.mxu0 %v6048_v23  ;;  %3286 = vmatprep.subr.mxu1 %v6051_v12 }
 0xd80   :  { %3216 = vmatpush1.msra.mxu0 %v6054_v46  ;;  %3287 = vmatpush1.msra.mxu1 %v6057_v27  ;;  %v6075_v27 = vld [vmem:[#allocation9 + $0x38] sm:$0xff] }
 0xd81   :  { %3217 = vmatprep.subr.mxu0 %v6060_v54  ;;  %3288 = vmatprep.subr.mxu1 %v6063_v50  ;;  %6740 = vst [vmem:[#allocation37_spill] sm:$0xff] %v6075_v27  ;;  %v6078_v54 = vld [vmem:[#allocation9 + $0x20] sm:$0xff]  ;;  %v6081_v50 = vld [vmem:[#allocation9 + $0x30] sm:$0xff] }
 0xd82   :  { %3218 = vmatpush1.msra.mxu0 %v6066_v43  ;;  %3289 = vmatpush1.msra.mxu1 %v6069_v47  ;;  %6741 = vst [vmem:[#allocation28_spill] sm:$0xff] %v6078_v54  ;;  %6742 = vst [vmem:[#allocation19_spill] sm:$0xff] %v6081_v50  ;;  %v6084_v43 = vld [vmem:[#allocation9 + $0x8] sm:$0xff]  ;;  %v6087_v47 = vld [vmem:[#allocation9 + $0x18] sm:$0xff] }
 0xd83   :  { %3219 = vmatprep.subr.mxu0 %v6072_v52  ;;  %3290 = vmatprep.subr.mxu1 %v6075_v27  ;;  %6743 = vst [vmem:[#allocation17_spill] sm:$0xff] %v6084_v43  ;;  %6744 = vst [vmem:[#allocation42_spill] sm:$0xff] %v6087_v47  ;;  %v6090_v52 = vld [vmem:[#allocation9] sm:$0xff]  ;;  %v6094_v27 = vld [vmem:[#allocation9 + $0x10] sm:$0xff] }
 0xd84   :  { %3220 = vmatpush1.msra.mxu0 %v6078_v54  ;;  %3291 = vmatpush1.msra.mxu1 %v6081_v50  ;;  %6745 = vst [vmem:[#allocation20_spill] sm:$0xff] %v6090_v52  ;;  %6746 = vst [vmem:[#allocation38_spill] sm:$0xff] %v6094_v27 }
 0xd85   :  { %3221 = vmatprep.subr.mxu0 %v6084_v43  ;;  %3292 = vmatprep.subr.mxu1 %v6087_v47  ;;  %v2986_v43 = vld [vmem:[#allocation2 + $0x26] ss:$8 sm:$0xf] }
 0xd86   :  { %3222 = vmatpush1.msra.mxu0 %v6090_v52  ;;  %3255 = vmatprep.mubr.f32.mxu0 %v6721_v0  ;;  %v2991_v50 = vrot.slane %v2986_v43, %v6724_v9  ;;  %v2995_v52 = vrot.slane %v2986_v43, %v6725_v57 }
 0xd87   :  { %3293 = vmatpush1.msra.mxu1 %v6094_v27  ;;  %3326 = vmatprep.mubr.f32.mxu1 %v6721_v0  ;;  %v3003_v0 = vrot.slane %v2986_v43, %v4617_v44 }
 0xd88   :  { %3403 = vmatprep.subr.mxu0 %v6723_v2  ;;  %3474 = vmatprep.subr.mxu1 %v5931_v4  ;;  %v2999_v4 = vrot.slane %v2986_v43, %v4615_v3 }
 0xe27   :  { %v3074_v47 = vpop.f32.mrf.mxu0  ;;  %v3145_v54 = vpop.f32.mrf.mxu1 }
 0xe28   :  { %v3075_v46 = vadd.f32 %v3074_v47, %v2991_v50  ;;  %v3146_v15 = vadd.f32 %v3145_v54, %v2999_v4 }
 0xe29   :  { %v3076_v12 = vpop.f32.mrf.mxu0  ;;  %v3147_v8 = vpop.f32.mrf.mxu1 }
 0xe2a   :  { %v3150_v23 = vmul.f32 0.5, %v3075_v46  ;;  %v3077_v33 = vadd.f32 %v3076_v12, %v2995_v52  ;;  %v3148_v2 = vadd.f32 %v3147_v8, %v3003_v0  ;;  %v3152_v9 = vmul.f32 0.5, %v3146_v15 }
 0xe2c   :  { %3918 = vtanh.f32 %v3150_v23  ;;  %v3151_v27 = vmul.f32 0.5, %v3077_v33 }
 0xe2e   :  { %3920 = vtanh.f32 %v3151_v27 }
 0xe2f   :  { %3922 = vtanh.f32 %v3148_v2 }
 0xe30   :  { %3924 = vtanh.f32 %v3152_v9 }
 0xe39   :  { %v3919_v13 = vpop.eup %3918 }
 0xe3a   :  { %v3156_v10 = vmul.f32 0.5, %v3919_v13 }
 0xe3b   :  { %v3921_v50 = vpop.eup %3920 }
 0xe3c   :  { %v3159_v47 = vadd.f32 0.5, %v3156_v10  ;;  %v3157_v57 = vmul.f32 0.5, %v3921_v50  ;;  %v3923_v12 = vpop.eup %3922 }
 0xe3d   :  { %v3925_v0 = vpop.eup %3924 }
 0xe3e   :  { %v3160_v46 = vadd.f32 0.5, %v3157_v57  ;;  %v3164_v33 = vmul.f32 %v3923_v12, %v3159_v47  ;;  %v3158_v8 = vmul.f32 0.5, %v3925_v0  ;;  %v6765_v57 = vld [vmem:[#allocation42_spill] sm:$0xff] }
 0xe40   :  { %v3163_v23 = vmul.f32 %v3160_v46, %v5939_v20  ;;  %v3161_v27 = vadd.f32 0.5, %v3158_v8  ;;  %v6766_v20 = vld [vmem:[#allocation20_spill] sm:$0xff]  ;;  %v3589_v8 = vld [vmem:[#allocation10 + $0x78] sm:$0xff] }
 0xe42   :  { %v6105_v52 = vadd.f32 %v3164_v33, %v3163_v23 }
 0xe44   :  { %3926 = vtanh.f32 %v6105_v52 }
 0xe51   :  { %v3927_v54 = vpop.eup %3926 }
 0xe52   :  { %v3167_v15 = vmul.f32 %v3927_v54, %v3161_v27  ;;  %v3588_v27 = vld [vmem:[#allocation10 + $0x70] sm:$0xff]  ;;  %v3586_v54 = vld [vmem:[#allocation10 + $0x60] sm:$0xff] }
 0xe54   :  { %3256 = vmatmul.mubr.f32.vlgmr.msra.gmra.mxu0 %v3167_v15  ;;  %3327 = vmatmul.mubr.f32.vlgmr.msra.gmra.mxu1 %v3167_v15  ;;  %v3367_v13 = vrot.slane %v3167_v15, 2  ;;  %v3585_v15 = vld [vmem:[#allocation10 + $0x58] sm:$0xff] }
 0xe55   :  { %3404 = vmatpush1.msra.mxu0 %v5826_v56  ;;  %3475 = vmatpush1.msra.mxu1 %v5943_v24  ;;  %v6747_v56 = vld [vmem:[#allocation39_spill] sm:$0xff]  ;;  %v6767_v24 = vmov 0.0  }
 0xe56   :  { %3405 = vmatprep.subr.mxu0 %v5830_v37  ;;  %3476 = vmatprep.subr.mxu1 %v5947_v29  ;;  %v6114_v9 = vsel %vm1882_vm6, %v5952_v30, %v3367_v13  ;;  %v6748_v37 = vld [vmem:[#allocation21_spill] sm:$0xff]  ;;  %v6768_v29 = vld [vmem:[#allocation38_spill] sm:$0xff]  ;;  %v3584_v13 = vld [vmem:[#allocation10 + $0x50] sm:$0xff] }
 0xe57   :  { %3406 = vmatpush1.msra.mxu0 %v5838_v34  ;;  %3477 = vmatpush1.msra.mxu1 %v5955_v59  ;;  %v6749_v34 = vld [vmem:[#allocation31_spill] sm:$0xff]  ;;  %v6769_v59 = vld [vmem:[#allocation40_spill] sm:$0xff] }
 0xe58   :  { %3407 = vmatprep.subr.mxu0 %v5842_v51  ;;  %3478 = vmatprep.subr.mxu1 %v5959_v61  ;;  %v6750_v51 = vld [vmem:[#allocation22_spill] sm:$0xff] }
 0xe59   :  { %3408 = vmatpush1.msra.mxu0 %v5846_v21  ;;  %3479 = vmatpush1.msra.mxu1 %v5963_v63  ;;  %v6751_v21 = vld [vmem:[#allocation32_spill] sm:$0xff] }
 0xe5a   :  { %3409 = vmatprep.subr.mxu0 %v5850_v5  ;;  %3480 = vmatprep.subr.mxu1 %v5967_v35  ;;  %v6752_v5 = vld [vmem:[#allocation23_spill] sm:$0xff] }
 0xe5b   :  { %3410 = vmatpush1.msra.mxu0 %v5854_v26  ;;  %3481 = vmatpush1.msra.mxu1 %v5971_v6  ;;  %v6753_v26 = vld [vmem:[#allocation33_spill] sm:$0xff] }
 0xe5c   :  { %3411 = vmatprep.subr.mxu0 %v5858_v32  ;;  %3482 = vmatprep.subr.mxu1 %v5975_v14  ;;  %v6754_v32 = vld [vmem:[#allocation24_spill] sm:$0xff]  ;;  %v6770_v14 = vld [vmem:[#allocation41_spill] sm:$0xff] }
 0xe5d   :  { %3412 = vmatpush1.msra.mxu0 %v5862_v60  ;;  %3483 = vmatpush1.msra.mxu1 %v5979_v19  ;;  %v6755_v60 = vld [vmem:[#allocation34_spill] sm:$0xff] }
 0xe5e   :  { %3413 = vmatprep.subr.mxu0 %v5866_v17  ;;  %3484 = vmatprep.subr.mxu1 %v5983_v11  ;;  %v6756_v17 = vld [vmem:[#allocation25_spill] sm:$0xff] }
 0xe5f   :  { %3414 = vmatpush1.msra.mxu0 %v5870_v18  ;;  %3485 = vmatpush1.msra.mxu1 %v5987_v25  ;;  %v6757_v18 = vld [vmem:[#allocation35_spill] sm:$0xff] }
 0xe60   :  { %3415 = vmatprep.subr.mxu0 %v5874_v22  ;;  %3486 = vmatprep.subr.mxu1 %v5991_v16  ;;  %v6758_v22 = vld [vmem:[#allocation26_spill] sm:$0xff] }
 0xe61   :  { %3416 = vmatpush1.msra.mxu0 %v5878_v28  ;;  %3487 = vmatpush1.msra.mxu1 %v5995_v7  ;;  %v6759_v28 = vld [vmem:[#allocation36_spill] sm:$0xff] }
 0xe62   :  { %3417 = vmatprep.subr.mxu0 %v5882_v40  ;;  %3488 = vmatprep.subr.mxu1 %v5999_v1  ;;  %v6760_v40 = vld [vmem:[#allocation27_spill] sm:$0xff] }
 0xe63   :  { %3418 = vmatpush1.msra.mxu0 %v5886_v42  ;;  %3489 = vmatpush1.msra.mxu1 %v6003_v48  ;;  %v6761_v42 = vld [vmem:[#allocation37_spill] sm:$0xff] }
 0xe64   :  { %3419 = vmatprep.subr.mxu0 %v5890_v45  ;;  %3490 = vmatprep.subr.mxu1 %v6007_v53  ;;  %v6762_v45 = vld [vmem:[#allocation28_spill] sm:$0xff] }
 0xe65   :  { %3420 = vmatpush1.msra.mxu0 %v5894_v62  ;;  %3491 = vmatpush1.msra.mxu1 %v6011_v55  ;;  %v6763_v62 = vld [vmem:[#allocation19_spill] sm:$0xff] }
 0xe66   :  { %3421 = vmatprep.subr.mxu0 %v5898_v58  ;;  %3492 = vmatprep.subr.mxu1 %v6015_v31  ;;  %v6764_v58 = vld [vmem:[#allocation17_spill] sm:$0xff] }
 0xe67   :  { %3422 = vmatpush1.msra.mxu0 %v6018_v49  ;;  %3493 = vmatpush1.msra.mxu1 %v6021_v36  ;;  %v3169_v30 = vld [vmem:[#allocation2 + $0x27] ss:$8 sm:$0xf] }
 0xe68   :  { %3423 = vmatprep.subr.mxu0 %v6024_v38  ;;  %3494 = vmatprep.subr.mxu1 %v6027_v39  ;;  %v3174_v61 = vrot.slane %v3169_v30, %v6769_v59  ;;  %v3178_v19 = vrot.slane %v3169_v30, %v6770_v14  ;;  %v3186_v48 = vrot.slane %v3169_v30, %v4617_v44 }
 0xe69   :  { %3424 = vmatpush1.msra.mxu0 %v6030_v41  ;;  %3495 = vmatpush1.msra.mxu1 %v6747_v56  ;;  %v3182_v55 = vrot.slane %v3169_v30, %v4615_v3  ;;  %v3583_v56 = vld [vmem:[#allocation10 + $0x48] sm:$0xff] }
 0xe6a   :  { %3425 = vmatprep.subr.mxu0 %v6748_v37  ;;  %3496 = vmatprep.subr.mxu1 %v6749_v34  ;;  %v3582_v37 = vld [vmem:[#allocation10 + $0x40] sm:$0xff]  ;;  %v3581_v34 = vld [vmem:[#allocation10 + $0x38] sm:$0xff] }
 0xe6b   :  { %3426 = vmatpush1.msra.mxu0 %v6750_v51  ;;  %3497 = vmatpush1.msra.mxu1 %v6751_v21  ;;  %v3580_v51 = vld [vmem:[#allocation10 + $0x30] sm:$0xff]  ;;  %v3579_v21 = vld [vmem:[#allocation10 + $0x28] sm:$0xff] }
 0xe6c   :  { %3427 = vmatprep.subr.mxu0 %v6752_v5  ;;  %3498 = vmatprep.subr.mxu1 %v6753_v26  ;;  %v3578_v5 = vld [vmem:[#allocation10 + $0x20] sm:$0xff]  ;;  %v3577_v26 = vld [vmem:[#allocation10 + $0x18] sm:$0xff] }
 0xe6d   :  { %3428 = vmatpush1.msra.mxu0 %v6754_v32  ;;  %3499 = vmatpush1.msra.mxu1 %v6755_v60  ;;  %v3576_v32 = vld [vmem:[#allocation10 + $0x10] sm:$0xff]  ;;  %v3575_v60 = vld [vmem:[#allocation10 + $0x8] sm:$0xff] }
 0xe6e   :  { %3429 = vmatprep.subr.mxu0 %v6756_v17  ;;  %3500 = vmatprep.subr.mxu1 %v6757_v18  ;;  %v3574_v17 = vld [vmem:[#allocation10] sm:$0xff] }
 0xe6f   :  { %3430 = vmatpush1.msra.mxu0 %v6758_v22  ;;  %3501 = vmatpush1.msra.mxu1 %v6759_v28  ;;  %v6771_v22 = vld [vmem:[#allocation18_spill] sm:$0xff] }
 0xe70   :  { %3431 = vmatprep.subr.mxu0 %v6760_v40  ;;  %3502 = vmatprep.subr.mxu1 %v6761_v42  ;;  %v3381_v40 = vld [vmem:[#allocation2 + $0x40] ss:$8 sm:$0xf] }
 0xe71   :  { %3432 = vmatpush1.msra.mxu0 %v6762_v45  ;;  %3503 = vmatpush1.msra.mxu1 %v6763_v62  ;;  %v3386_v42 = vrot.slane %v3381_v40, %v6769_v59 }
 0xe72   :  { %3433 = vmatprep.subr.mxu0 %v6764_v58  ;;  %3504 = vmatprep.subr.mxu1 %v6765_v57  ;;  %v3390_v57 = vrot.slane %v3381_v40, %v6770_v14 }
 0xe73   :  { %3434 = vmatpush1.msra.mxu0 %v6766_v20  ;;  %3467 = vmatprep.mubr.f32.mxu0 %v6767_v24 }
 0xe74   :  { %3505 = vmatpush1.msra.mxu1 %v6768_v29  ;;  %3538 = vmatprep.mubr.f32.mxu1 %v6767_v24 }
 0xe75   :  { %3726 = vmatprep.subr.mxu0 %v6767_v24 }
 0xf14   :  { %v3257_v63 = vpop.f32.mrf.mxu0  ;;  %v3328_v35 = vpop.f32.mrf.mxu1 }
 0xf15   :  { %v3258_v6 = vadd.f32 %v3257_v63, %v3174_v61  ;;  %v3329_v31 = vadd.f32 %v3328_v35, %v3182_v55 }
 0xf16   :  { %v3259_v11 = vpop.f32.mrf.mxu0  ;;  %v3330_v7 = vpop.f32.mrf.mxu1 }
 0xf17   :  { %v3333_v25 = vmul.f32 0.5, %v3258_v6  ;;  %v3260_v16 = vadd.f32 %v3259_v11, %v3178_v19  ;;  %v3331_v53 = vadd.f32 %v3330_v7, %v3186_v48  ;;  %v3335_v49 = vmul.f32 0.5, %v3329_v31 }
 0xf19   :  { %3928 = vtanh.f32 %v3333_v25  ;;  %v3334_v1 = vmul.f32 0.5, %v3260_v16 }
 0xf1b   :  { %3930 = vtanh.f32 %v3334_v1 }
 0xf1c   :  { %3932 = vtanh.f32 %v3331_v53 }
 0xf1d   :  { %3934 = vtanh.f32 %v3335_v49 }
 0xf26   :  { %v3929_v36 = vpop.eup %3928 }
 0xf27   :  { %v3339_v38 = vmul.f32 0.5, %v3929_v36 }
 0xf28   :  { %v3931_v39 = vpop.eup %3930 }
 0xf29   :  { %v3342_v41 = vadd.f32 0.5, %v3339_v38  ;;  %v3340_v10 = vmul.f32 0.5, %v3931_v39  ;;  %v3933_v2 = vpop.eup %3932 }
 0xf2a   :  { %v3935_v46 = vpop.eup %3934 }
 0xf2b   :  { %v3343_v43 = vadd.f32 0.5, %v3340_v10  ;;  %v3347_v50 = vmul.f32 %v3933_v2, %v3342_v41  ;;  %v3341_v12 = vmul.f32 0.5, %v3935_v46 }
 0xf2d   :  { %v3346_v4 = vmul.f32 %v3343_v43, %v6105_v52  ;;  %v3344_v23 = vadd.f32 0.5, %v3341_v12  ;;  %v3587_v52 = vld [vmem:[#allocation10 + $0x68] sm:$0xff] }
 0xf2f   :  { %v6182_v47 = vadd.f32 %v3347_v50, %v3346_v4 }
 0xf31   :  { %3936 = vtanh.f32 %v6182_v47 }
 0xf3e   :  { %v3937_v33 = vpop.eup %3936 }
 0xf3f   :  { %v3350_v0 = vmul.f32 %v3937_v33, %v3344_v23 }
 0xf41   :  { %3468 = vmatmul.mubr.f32.vlgmr.msra.gmra.mxu0 %v3350_v0  ;;  %3539 = vmatmul.mubr.f32.vlgmr.msra.gmra.mxu1 %v3350_v0  ;;  %v3370_v18 = vrot.slane %v3350_v0, 1 }
 0xf42   :  { %3727 = vmatpush3.msra.mxu0 %v3589_v8  ;;  %3758 = vmatprep.mubr.msk.f32.mxu0 %vm4257_vm8, %v6767_v24 }
 0xf43   :  { %3728 = vmatprep.subr.mxu0 %v6767_v24  ;;  %v3378_v28 = vsel %vm1884_vm7, %v6114_v9, %v3370_v18  ;;  %v3398_v9 = vrot.slane %v3381_v40, %v4617_v44 }
 0xf44   :  { %3729 = vmatpush3.msra.mxu0 %v3588_v27 }
 0xf45   :  { %3730 = vmatprep.subr.mxu0 %v6767_v24 }
 0xf46   :  { %3731 = vmatpush3.msra.mxu0 %v3587_v52 }
 0xf47   :  { %3732 = vmatprep.subr.mxu0 %v6767_v24 }
 0xf48   :  { %3733 = vmatpush3.msra.mxu0 %v3586_v54 }
 0xf49   :  { %3734 = vmatprep.subr.mxu0 %v6767_v24 }
 0xf4a   :  { %3735 = vmatpush3.msra.mxu0 %v3585_v15 }
 0xf4b   :  { %3736 = vmatprep.subr.mxu0 %v6767_v24 }
 0xf4c   :  { %3737 = vmatpush3.msra.mxu0 %v3584_v13 }
 0xf4d   :  { %3738 = vmatprep.subr.mxu0 %v6767_v24 }
 0xf4e   :  { %3739 = vmatpush3.msra.mxu0 %v3583_v56 }
 0xf4f   :  { %3740 = vmatprep.subr.mxu0 %v6767_v24 }
 0xf50   :  { %3741 = vmatpush3.msra.mxu0 %v3582_v37 }
 0xf51   :  { %3742 = vmatprep.subr.mxu0 %v6767_v24 }
 0xf52   :  { %3743 = vmatpush3.msra.mxu0 %v3581_v34 }
 0xf53   :  { %3744 = vmatprep.subr.mxu0 %v6767_v24 }
 0xf54   :  { %3745 = vmatpush3.msra.mxu0 %v3580_v51 }
 0xf55   :  { %3746 = vmatprep.subr.mxu0 %v6767_v24 }
 0xf56   :  { %3747 = vmatpush3.msra.mxu0 %v3579_v21 }
 0xf57   :  { %3748 = vmatprep.subr.mxu0 %v6767_v24 }
 0xf58   :  { %3749 = vmatpush3.msra.mxu0 %v3578_v5 }
 0xf59   :  { %3750 = vmatprep.subr.mxu0 %v6767_v24 }
 0xf5a   :  { %3751 = vmatpush3.msra.mxu0 %v3577_v26 }
 0xf5b   :  { %3752 = vmatprep.subr.mxu0 %v6767_v24 }
 0xf5c   :  { %3753 = vmatpush3.msra.mxu0 %v3576_v32 }
 0xf5d   :  { %3754 = vmatprep.subr.mxu0 %v6767_v24 }
 0xf5e   :  { %3755 = vmatpush3.msra.mxu0 %v3575_v60 }
 0xf5f   :  { %3756 = vmatprep.subr.mxu0 %v6767_v24 }
 0xf60   :  { %3757 = vmatpush3.msra.mxu0 %v3574_v17 }
 0xf61   :  { %3759 = vmatmul.mubr.f32.vlgmr.msra.gmra.mxu0 %v6771_v22 }
 0xf62   :  { %3761 = vmatprep.mubr.msk.f32.mxu0 %vm4257_vm8, %v6767_v24 }
 0xf65   :  { %3762 = vmatmul.mubr.f32.gmra.mxu0 %v3378_v28 }
 0xf66   :  { %3764 = vmatprep.mubr.msk.f32.mxu0 %vm4257_vm8, %v6767_v24  ;;  %v3394_v24 = vrot.slane %v3381_v40, %v4615_v3  ;;  %v3705_v3 = vld [vmem:[%s6235_s5] ss:$0 sm:$0xff]  ;;  %s4258_s5 = smov [#allocation12]  }
 0xf67   :  { %s3685_s20 = sshll.u32 %s4258_s5, 4  ;;  %s3686_s20 = int_to_ptr.vmem [resolvable:$true] %s3685_s20 }
 0xf68   :  { %s4220_s21 = scalar_lea.vmem %s3686_s20, 384  ;;  %p4225_p7 = scmp.lt.s32.totalorder %s3686_s20, %s3686_s20 }
 0xf69   :  { %p4221_p6 = scmp.ne.s32.totalorder %s3686_s20, %s4220_s21  ;;  %p4226_p8 = scmp.lt.s32.totalorder %s4220_s21, %s4220_s21 }
 0xf6b   :  { %p4227_p9 = por %p4226_p8, %p4225_p7 }
 0xf6d   :  { %p4228_p10 = pnand %p4227_p9, %p4221_p6 }
0x1001   :  { %v3469_v45 = vpop.f32.mrf.mxu0  ;;  %v3540_v62 = vpop.f32.mrf.mxu1 }
0x1002   :  { %v3470_v58 = vadd.f32 %v3469_v45, %v3386_v42  ;;  %v3541_v6 = vadd.f32 %v3540_v62, %v3394_v24 }
0x1003   :  { %v3471_v20 = vpop.f32.mrf.mxu0  ;;  %v3542_v61 = vpop.f32.mrf.mxu1 }
0x1004   :  { %v3545_v29 = vmul.f32 0.5, %v3470_v58  ;;  %v3472_v30 = vadd.f32 %v3471_v20, %v3390_v57  ;;  %v3543_v35 = vadd.f32 %v3542_v61, %v3398_v9  ;;  %v3547_v59 = vmul.f32 0.5, %v3541_v6 }
0x1006   :  { %3938 = vtanh.f32 %v3545_v29  ;;  %v3546_v63 = vmul.f32 0.5, %v3472_v30 }
0x1008   :  { %3940 = vtanh.f32 %v3546_v63 }
0x1009   :  { %3942 = vtanh.f32 %v3543_v35 }
0x100a   :  { %3944 = vtanh.f32 %v3547_v59 }
0x1013   :  { %v3939_v19 = vpop.eup %3938 }
0x1014   :  { %v3551_v11 = vmul.f32 0.5, %v3939_v19 }
0x1015   :  { %v3941_v25 = vpop.eup %3940 }
0x1016   :  { %v3554_v16 = vadd.f32 0.5, %v3551_v11  ;;  %v3552_v14 = vmul.f32 0.5, %v3941_v25  ;;  %v3943_v1 = vpop.eup %3942 }
0x1017   :  { %v3945_v49 = vpop.eup %3944 }
0x1018   :  { %v3555_v7 = vadd.f32 0.5, %v3552_v14  ;;  %v3559_v53 = vmul.f32 %v3943_v1, %v3554_v16  ;;  %v3553_v39 = vmul.f32 0.5, %v3945_v49 }
0x101a   :  { %v3558_v48 = vmul.f32 %v3555_v7, %v6182_v47  ;;  %v3556_v43 = vadd.f32 0.5, %v3553_v39 }
0x101c   :  { %v3560_v55 = vadd.f32 %v3559_v53, %v3558_v48 }
0x101e   :  { %3946 = vtanh.f32 %v3560_v55 }
0x1021   :  { %v3663_v44 = vpop.f32.mrf.mxu0 }
0x1022   :  { %v3664_v31 = vadd.f32 %v3705_v3, %v3663_v44 }
0x1023   :  { %v3760_v36 = vpop.f32.mrf.mxu0 }
0x1024   :  { %3677 = vst [vmem:[#allocation12] sm:$0xff] %v3664_v31 }
0x1025   :  { %v3668_v38 = vpop.f32.mrf.mxu0 }
0x1026   :  { %v3669_v41 = vadd.f32 %v3705_v3, %v3668_v38 }
0x1027   :  { %v3763_v10 = vpop.f32.mrf.mxu0 }
0x1028   :  { %3678 = vst [vmem:[#allocation12 + $0x8] sm:$0xff] %v3669_v41 }
0x102b   :  { %v3947_v2 = vpop.eup %3946 }
0x102c   :  { %v3562_v4 = vmul.f32 %v3947_v2, %v3556_v43 }
0x102e   :  { %v3563_v50 = vsel %vm1872_vm1, %v3562_v4, 0.0 }
0x102f   :  { %v3564_v47 = vsel %vm1874_vm2, %v3563_v50, 0.0 }
0x1030   :  { %v3565_v46 = vsel %vm1876_vm3, %v3564_v47, 0.0 }
0x1031   :  { %v3566_v12 = vsel %vm1878_vm4, %v3565_v46, 0.0 }
0x1032   :  { %v3567_v23 = vsel %vm1880_vm5, %v3566_v12, 0.0 }
0x1033   :  { %v3568_v33 = vsel %vm1882_vm6, %v3567_v23, 0.0 }
0x1034   :  { %3765 = vmatmul.mubr.msk.f32.gmra.mxu0 %vm1884_vm7, %v3568_v33 }
0x10f4   :  { %v3673_v0 = vpop.f32.mrf.mxu0 }
0x10f5   :  { %v3674_v8 = vadd.f32 %v3705_v3, %v3673_v0 }
0x10f6   :  { %v3766_v27 = vpop.f32.mrf.mxu0 }
0x10f7   :  { %3679 = vst [vmem:[#allocation12 + $0x10] sm:$0xff] %v3674_v8 }
0x10f8   :  { %4231 = shalt.err (!%p4228_p10)
}
0x10f9   :  { %3691 = dma.vmem_to_hbm [thread:$0]  %s3686_s20, 384, %s6236_s6, [#allocation6], %s4252_s7, %s4252_s7, %s4253_s8  }
0x10fa   :  { %4246 = dma.done.wait [#allocation6], 384  }
0x10fb   :  { %4247 = vsyncadd [#allocation6], 4294966912 }
0x10fc   :  { %3695 = vsyncpa [#allocation5], 1 }
0x10fd   :  { %3696 = vsyncpa [#allocation8], 1 }
0x10fe   :  { %3697 = vsyncpa [#allocation11], 1 }
0x10ff   :  { %3698 = vsyncpa [#allocation6], 1 }

</bundles_post_ra>
